<compile_context>
chip_gen: v7x
topology: tpu7x:2x2x1
jax: 0.10.0
libtpu: 0.0.40
codegen_flags: <defaults>
</compile_context>

<pallas_src>
import math

import jax
import jax.numpy as jnp
from jax import lax
from jax.experimental import pallas as pl
from jax.experimental.pallas import tpu as pltpu

# ----- model config (raw_input=True) -----
D_MODEL = 2
N_HEADS = 2
HEAD_DIM = D_MODEL // N_HEADS          # == 1
N_LAYERS = 4
D_FF = 2048                            # TransformerEncoderLayer default
LN_EPS = 1e-5


def transformer_kernel(x_ref,
                       wqkv_ref, bqkv_ref, wo_ref, bo_ref,
                       n1w_ref, n1b_ref, n2w_ref, n2b_ref,
                       w1_ref, b1_ref, w2_ref, b2_ref,
                       fcw_ref, fcb_ref,
                       o_ref):
    _, D, L = x_ref.shape                       # block is (1, D, L) for one batch element
    scale = 1.0 / math.sqrt(HEAD_DIM)           # == 1.0 for head_dim 1

    # Identity mask used to move L-element vectors between lanes and sublanes
    # (replaces K=1 MXU matmuls / hardware transposes). Hoisted out of all loops.
    eye_f = (lax.broadcasted_iota(jnp.int32, (L, L), 0)
             == lax.broadcasted_iota(jnp.int32, (L, L), 1)).astype(jnp.float32)

    def row_to_col(r):                          # (1, L) -> (L, 1)
        return jnp.sum(r * eye_f, axis=1, keepdims=True)

    def col_to_row(c):                          # (L, 1) -> (1, L)
        return jnp.sum(c * eye_f, axis=0, keepdims=True)

    def layer_norm(h, g, b):
        # D == 2: explicit two-column statistics (biased var, eps=1e-5, PyTorch semantics).
        c0 = h[:, 0:1]
        c1 = h[:, 1:2]
        mu = 0.5 * (c0 + c1)
        var = 0.25 * (c0 - c1) ** 2
        rstd = lax.rsqrt(var + LN_EPS)
        return (h - mu) * rstd * g + b

    # Fold the NCL -> NLD permute into the kernel: x arrives as (D, L).
    xt = x_ref[0]                                                   # (D, L)
    xb = jnp.concatenate([row_to_col(xt[0:1, :]),
                          row_to_col(xt[1:2, :])], axis=1)          # (L, D)

    for l in range(N_LAYERS):
        # ---------- self-attention block (norm_first) ----------
        h = layer_norm(xb, n1w_ref[l], n1b_ref[l])                  # (L, D)
        qkv = jnp.dot(h, wqkv_ref[l],
                      preferred_element_type=jnp.float32) + bqkv_ref[l]   # (L, 3D)

        attn = jnp.zeros((L, D_MODEL), jnp.float32)
        for hh in range(N_HEADS):                                   # head_dim == 1
            q_col = qkv[:, hh:hh + 1] * scale                                # (L, 1)
            k_row = col_to_row(qkv[:, D_MODEL + hh:D_MODEL + hh + 1])        # (1, L)
            v_row = col_to_row(qkv[:, 2 * D_MODEL + hh:2 * D_MODEL + hh + 1])  # (1, L)

            s = q_col * k_row                       # (L, L) VPU broadcast outer product
            m = jnp.max(s, axis=-1, keepdims=True)
            e = jnp.exp(s - m)
            den = jnp.sum(e, axis=-1, keepdims=True)
            num = jnp.sum(e * v_row, axis=-1, keepdims=True)
            oh = num * pl.reciprocal(den, approx=True)              # (L, 1)
            # this head's slice of the output projection (broadcast outer product)
            attn = attn + oh * wo_ref[l][hh:hh + 1, :]              # (L, D)
        xb = xb + attn + bo_ref[l]                  # dropout -> identity (eval)

        # ---------- feed-forward block (norm_first) ----------
        h2 = layer_norm(xb, n2w_ref[l], n2b_ref[l])
        # up-projection: bf16 weights/activations at the dot, f32 accumulate + f32 elementwise
        ff = jnp.dot(h2.astype(jnp.bfloat16), w1_ref[l],
                     preferred_element_type=jnp.float32) + b1_ref[l]         # (L, F)
        ff = jnp.maximum(ff, 0.0)                                   # relu in f32
        # down-projection: contract over F with the lane-dense (D, F) weight (A @ B^T)
        ffo = lax.dot_general(ff.astype(jnp.bfloat16), w2_ref[l],
                              (((1,), (1,)), ((), ())),
                              preferred_element_type=jnp.float32) + b2_ref[l]  # (L, D)
        xb = xb + ffo                               # dropout -> identity (eval)

    # AdaptiveAvgPool1d(1) over the sequence dim + final Linear(D, 1)
    pooled = jnp.mean(xb, axis=0, keepdims=True)                    # (1, D)
    o_ref[0] = (jnp.sum(pooled * fcw_ref[...], axis=-1, keepdims=True)
                + fcb_ref[...])                                     # (1, 1)


def init_params(key):
    ks = jax.random.split(key, 9)

    def nrm(k, shape, s=0.1):
        return s * jax.random.normal(k, shape, dtype=jnp.float32)

    NL, D, F = N_LAYERS, D_MODEL, D_FF
    return dict(
        # fused in_proj (q|k|v), pre-transposed to (D_in, 3*D_out)
        wqkv_t=nrm(ks[0], (NL, D, 3 * D)), bqkv=nrm(ks[1], (NL, 1, 3 * D), 0.01),
        # out_proj, pre-transposed
        wo_t=nrm(ks[2], (NL, D, D)), bo=nrm(ks[3], (NL, 1, D), 0.01),
        # layer norms
        n1w=jnp.ones((NL, 1, D), jnp.float32), n1b=jnp.zeros((NL, 1, D), jnp.float32),
        n2w=jnp.ones((NL, 1, D), jnp.float32), n2b=jnp.zeros((NL, 1, D), jnp.float32),
        # feed-forward: both weights lane-dense (F on the last axis), stored in bf16
        #   w1_t = linear1.weight.T : (D, F)
        #   w2   = linear2.weight   : (D, F)   (native layout, contracted over F)
        w1_t=nrm(ks[4], (NL, D, F), 0.05).astype(jnp.bfloat16),
        b1=nrm(ks[5], (NL, 1, F), 0.01),
        w2=nrm(ks[6], (NL, D, F), 0.05).astype(jnp.bfloat16),
        b2=nrm(ks[7], (NL, 1, D), 0.01),
        # final fc (native (1, D) layout)
        fc_w=nrm(ks[8], (1, D)),
        fc_b=jnp.full((1, 1), 0.05, jnp.float32),
    )


def transformer_forward(x_ncl, params):
    # x stays in its native NCL = (B, D, L) layout; the permute is folded into the kernel.
    x = x_ncl.astype(jnp.float32)
    B, D, L = x.shape

    inputs = (x,
              params['wqkv_t'], params['bqkv'], params['wo_t'], params['bo'],
              params['n1w'], params['n1b'], params['n2w'], params['n2b'],
              params['w1_t'], params['b1'], params['w2'], params['b2'],
              params['fc_w'], params['fc_b'])

    # x: one batch element per grid step; weights: full arrays, resident across the grid.
    in_specs = [pl.BlockSpec((1, D, L), lambda b: (b, 0, 0))]
    in_specs += [pl.BlockSpec(a.shape, lambda b, n=a.ndim: (0,) * n)
                 for a in inputs[1:]]

    out = pl.pallas_call(
        transformer_kernel,
        out_shape=jax.ShapeDtypeStruct((B, 1, 1), jnp.float32),
        grid=(B,),
        in_specs=in_specs,
        out_specs=pl.BlockSpec((1, 1, 1), lambda b: (b, 0, 0)),
        compiler_params=pltpu.CompilerParams(
            dimension_semantics=("parallel",)),        # both TCs on v7x
    )(*inputs)
    return out.reshape(B, 1)


def reference_forward(x_ncl, params):
    # pure-JAX reference implementing the same (eval-mode) math in f32
    x = jnp.transpose(x_ncl, (0, 2, 1)).astype(jnp.float32)   # (B, L, D)
    scale = 1.0 / math.sqrt(HEAD_DIM)
    w1 = params['w1_t'].astype(jnp.float32)
    w2 = params['w2'].astype(jnp.float32)

    def ln(h, g, b):
        mu = jnp.mean(h, -1, keepdims=True)
        var = jnp.mean((h - mu) ** 2, -1, keepdims=True)
        return (h - mu) / jnp.sqrt(var + LN_EPS) * g + b

    for l in range(N_LAYERS):
        h = ln(x, params['n1w'][l], params['n1b'][l])
        qkv = h @ params['wqkv_t'][l] + params['bqkv'][l]
        attn = jnp.zeros_like(x)
        for hh in range(N_HEADS):
            q = qkv[..., hh:hh + 1] * scale
            k = qkv[..., D_MODEL + hh:D_MODEL + hh + 1]
            v = qkv[..., 2 * D_MODEL + hh:2 * D_MODEL + hh + 1]
            s = jnp.einsum('bqe,bke->bqk', q, k)
            p = jax.nn.softmax(s, axis=-1)
            oh = jnp.einsum('bqk,bke->bqe', p, v)
            attn = attn + oh * params['wo_t'][l][hh]
        x = x + attn + params['bo'][l]
        h2 = ln(x, params['n2w'][l], params['n2b'][l])
        ff = jnp.maximum(h2 @ w1[l] + params['b1'][l], 0.0)
        x = x + ff @ w2[l].T + params['b2'][l]
    pooled = jnp.mean(x, axis=1)                              # (B, D)
    return pooled @ params['fc_w'].T + params['fc_b']


if __name__ == "__main__":
    key = jax.random.PRNGKey(0)
    kx, kp = jax.random.split(key)
    B, C_IN, L = 2, 2, 16
    x = jax.random.normal(kx, (B, C_IN, L), dtype=jnp.float32)   # NCL, like the PyTorch input
    params = init_params(kp)

    out = jax.block_until_ready(transformer_forward(x, params))
    ref = jax.block_until_ready(reference_forward(x, params))

    assert out.shape == (B, 1)
    assert bool(jnp.all(jnp.isfinite(out)))
    assert bool(jnp.allclose(out, ref, atol=2e-2, rtol=2e-2)), (out, ref)
    print("KERNEL_OK")
</pallas_src>

<mosaic_0001>
module attributes {stable_mosaic.version = 11 : i64} {
  func.func @transformer_kernel(%arg0: i32, %arg1: memref<1x2x16xf32, #tpu.memory_space<vmem>>, %arg2: memref<4x2x6xf32, #tpu.memory_space<vmem>>, %arg3: memref<4x1x6xf32, #tpu.memory_space<vmem>>, %arg4: memref<4x2x2xf32, #tpu.memory_space<vmem>>, %arg5: memref<4x1x2xf32, #tpu.memory_space<vmem>>, %arg6: memref<4x1x2xf32, #tpu.memory_space<vmem>>, %arg7: memref<4x1x2xf32, #tpu.memory_space<vmem>>, %arg8: memref<4x1x2xf32, #tpu.memory_space<vmem>>, %arg9: memref<4x1x2xf32, #tpu.memory_space<vmem>>, %arg10: memref<4x2x2048xbf16, #tpu.memory_space<vmem>>, %arg11: memref<4x1x2048xf32, #tpu.memory_space<vmem>>, %arg12: memref<4x2x2048xbf16, #tpu.memory_space<vmem>>, %arg13: memref<4x1x2xf32, #tpu.memory_space<vmem>>, %arg14: memref<1x2xf32, #tpu.memory_space<vmem>>, %arg15: memref<1x1xf32, #tpu.memory_space<vmem>>, %arg16: memref<1x1x1xf32, #tpu.memory_space<vmem>>) attributes {dimension_semantics = [#tpu.dimension_semantics<parallel>], iteration_bounds = array<i64: 2>, scalar_prefetch = 0 : i64, scratch_operands = 0 : i64, tpu.core_type = #tpu.core_type<tc>, window_params = [{transform_indices = @transform_0, window_bounds = array<i64: 1, 2, 16>}, {pipeline_mode = #tpu.pipeline_mode<synchronous>, transform_indices = @transform_1, window_bounds = array<i64: 4, 2, 6>}, {pipeline_mode = #tpu.pipeline_mode<synchronous>, transform_indices = @transform_2, window_bounds = array<i64: 4, 1, 6>}, {pipeline_mode = #tpu.pipeline_mode<synchronous>, transform_indices = @transform_3, window_bounds = array<i64: 4, 2, 2>}, {pipeline_mode = #tpu.pipeline_mode<synchronous>, transform_indices = @transform_4, window_bounds = array<i64: 4, 1, 2>}, {pipeline_mode = #tpu.pipeline_mode<synchronous>, transform_indices = @transform_5, window_bounds = array<i64: 4, 1, 2>}, {pipeline_mode = #tpu.pipeline_mode<synchronous>, transform_indices = @transform_6, window_bounds = array<i64: 4, 1, 2>}, {pipeline_mode = #tpu.pipeline_mode<synchronous>, transform_indices = @transform_7, window_bounds = array<i64: 4, 1, 2>}, {pipeline_mode = #tpu.pipeline_mode<synchronous>, transform_indices = @transform_8, window_bounds = array<i64: 4, 1, 2>}, {pipeline_mode = #tpu.pipeline_mode<synchronous>, transform_indices = @transform_9, window_bounds = array<i64: 4, 2, 2048>}, {pipeline_mode = #tpu.pipeline_mode<synchronous>, transform_indices = @transform_10, window_bounds = array<i64: 4, 1, 2048>}, {pipeline_mode = #tpu.pipeline_mode<synchronous>, transform_indices = @transform_11, window_bounds = array<i64: 4, 2, 2048>}, {pipeline_mode = #tpu.pipeline_mode<synchronous>, transform_indices = @transform_12, window_bounds = array<i64: 4, 1, 2>}, {pipeline_mode = #tpu.pipeline_mode<synchronous>, transform_indices = @transform_13, window_bounds = array<i64: 1, 2>}, {pipeline_mode = #tpu.pipeline_mode<synchronous>, transform_indices = @transform_14, window_bounds = array<i64: 1, 1>}, {transform_indices = @transform_15, window_bounds = array<i64: 1, 1, 1>}]} {
    %0 = tpu.iota {dimensions = array<i32: 0>} : vector<16x16xi32>
    %1 = tpu.iota {dimensions = array<i32: 1>} : vector<16x16xi32>
    %2 = arith.cmpi eq, %0, %1 : vector<16x16xi32>
    %3 = arith.extui %2 : vector<16x16xi1> to vector<16x16xi32>
    %4 = arith.sitofp %3 : vector<16x16xi32> to vector<16x16xf32>
    %c0 = arith.constant 0 : index
    %c0_0 = arith.constant 0 : index
    %c0_1 = arith.constant 0 : index
    %5 = vector.load %arg1[%c0, %c0_0, %c0_1] : memref<1x2x16xf32, #tpu.memory_space<vmem>>, vector<1x2x16xf32>
    %6 = vector.shape_cast %5 : vector<1x2x16xf32> to vector<2x16xf32>
    %7 = vector.extract_strided_slice %6 {offsets = [0, 0], sizes = [1, 16], strides = [1, 1]} : vector<2x16xf32> to vector<1x16xf32>
    %8 = vector.broadcast %7 : vector<1x16xf32> to vector<16x16xf32>
    %9 = arith.mulf %8, %4 : vector<16x16xf32>
    %cst = arith.constant dense<0.000000e+00> : vector<16xf32>
    %10 = vector.multi_reduction <add>, %9, %cst [1] : vector<16x16xf32> to vector<16xf32>
    %11 = vector.shape_cast %10 : vector<16xf32> to vector<16x1xf32>
    %12 = vector.extract_strided_slice %6 {offsets = [1, 0], sizes = [1, 16], strides = [1, 1]} : vector<2x16xf32> to vector<1x16xf32>
    %13 = vector.broadcast %12 : vector<1x16xf32> to vector<16x16xf32>
    %14 = arith.mulf %13, %4 : vector<16x16xf32>
    %cst_2 = arith.constant dense<0.000000e+00> : vector<16xf32>
    %15 = vector.multi_reduction <add>, %14, %cst_2 [1] : vector<16x16xf32> to vector<16xf32>
    %16 = vector.shape_cast %15 : vector<16xf32> to vector<16x1xf32>
    %17 = tpu.concatenate %11, %16 in 1 : vector<16x1xf32>, vector<16x1xf32> -> vector<16x2xf32>
    %c0_3 = arith.constant 0 : index
    %c0_4 = arith.constant 0 : index
    %c0_5 = arith.constant 0 : index
    %18 = vector.load %arg6[%c0_3, %c0_4, %c0_5] : memref<4x1x2xf32, #tpu.memory_space<vmem>>, vector<1x1x2xf32>
    %19 = vector.shape_cast %18 : vector<1x1x2xf32> to vector<1x2xf32>
    %c0_6 = arith.constant 0 : index
    %c0_7 = arith.constant 0 : index
    %c0_8 = arith.constant 0 : index
    %20 = vector.load %arg7[%c0_6, %c0_7, %c0_8] : memref<4x1x2xf32, #tpu.memory_space<vmem>>, vector<1x1x2xf32>
    %21 = vector.shape_cast %20 : vector<1x1x2xf32> to vector<1x2xf32>
    %22 = vector.extract_strided_slice %17 {offsets = [0, 0], sizes = [16, 1], strides = [1, 1]} : vector<16x2xf32> to vector<16x1xf32>
    %23 = vector.extract_strided_slice %17 {offsets = [0, 1], sizes = [16, 1], strides = [1, 1]} : vector<16x2xf32> to vector<16x1xf32>
    %24 = arith.addf %22, %23 : vector<16x1xf32>
    %cst_9 = arith.constant 5.000000e-01 : f32
    %25 = vector.broadcast %cst_9 : f32 to vector<16x1xf32>
    %26 = arith.mulf %25, %24 : vector<16x1xf32>
    %27 = arith.subf %22, %23 : vector<16x1xf32>
    %28 = arith.mulf %27, %27 : vector<16x1xf32>
    %cst_10 = arith.constant 2.500000e-01 : f32
    %29 = vector.broadcast %cst_10 : f32 to vector<16x1xf32>
    %30 = arith.mulf %29, %28 : vector<16x1xf32>
    %cst_11 = arith.constant 9.99999974E-6 : f32
    %31 = vector.broadcast %cst_11 : f32 to vector<16x1xf32>
    %32 = arith.addf %30, %31 : vector<16x1xf32>
    %33 = math.rsqrt %32 : vector<16x1xf32>
    %34 = vector.broadcast %26 : vector<16x1xf32> to vector<16x2xf32>
    %35 = arith.subf %17, %34 : vector<16x2xf32>
    %36 = vector.broadcast %33 : vector<16x1xf32> to vector<16x2xf32>
    %37 = arith.mulf %35, %36 : vector<16x2xf32>
    %38 = vector.broadcast %19 : vector<1x2xf32> to vector<16x2xf32>
    %39 = arith.mulf %37, %38 : vector<16x2xf32>
    %40 = vector.broadcast %21 : vector<1x2xf32> to vector<16x2xf32>
    %41 = arith.addf %39, %40 : vector<16x2xf32>
    %c0_12 = arith.constant 0 : index
    %c0_13 = arith.constant 0 : index
    %c0_14 = arith.constant 0 : index
    %42 = vector.load %arg2[%c0_12, %c0_13, %c0_14] : memref<4x2x6xf32, #tpu.memory_space<vmem>>, vector<1x2x6xf32>
    %43 = vector.shape_cast %42 : vector<1x2x6xf32> to vector<2x6xf32>
    %cst_15 = arith.constant dense<0.000000e+00> : vector<16x6xf32>
    %44 = tpu.matmul %41, %43, %cst_15 {dimension_numbers = #tpu.dot_dimension_numbers<[1], [0], [0], [1], [0, 0, 1, 1], [], []>} : vector<16x2xf32>, vector<2x6xf32>, vector<16x6xf32> -> vector<16x6xf32>
    %c0_16 = arith.constant 0 : index
    %c0_17 = arith.constant 0 : index
    %c0_18 = arith.constant 0 : index
    %45 = vector.load %arg3[%c0_16, %c0_17, %c0_18] : memref<4x1x6xf32, #tpu.memory_space<vmem>>, vector<1x1x6xf32>
    %46 = vector.shape_cast %45 : vector<1x1x6xf32> to vector<1x6xf32>
    %47 = vector.broadcast %46 : vector<1x6xf32> to vector<16x6xf32>
    %48 = arith.addf %44, %47 : vector<16x6xf32>
    %cst_19 = arith.constant 0.000000e+00 : f32
    %49 = vector.broadcast %cst_19 : f32 to vector<16x2xf32>
    %50 = vector.extract_strided_slice %48 {offsets = [0, 0], sizes = [16, 1], strides = [1, 1]} : vector<16x6xf32> to vector<16x1xf32>
    %cst_20 = arith.constant 1.000000e+00 : f32
    %51 = vector.broadcast %cst_20 : f32 to vector<16x1xf32>
    %52 = arith.mulf %50, %51 : vector<16x1xf32>
    %53 = vector.extract_strided_slice %48 {offsets = [0, 2], sizes = [16, 1], strides = [1, 1]} : vector<16x6xf32> to vector<16x1xf32>
    %54 = vector.broadcast %53 : vector<16x1xf32> to vector<16x16xf32>
    %55 = arith.mulf %54, %4 : vector<16x16xf32>
    %cst_21 = arith.constant dense<0.000000e+00> : vector<16xf32>
    %56 = vector.multi_reduction <add>, %55, %cst_21 [0] : vector<16x16xf32> to vector<16xf32>
    %57 = vector.shape_cast %56 : vector<16xf32> to vector<1x16xf32>
    %58 = vector.extract_strided_slice %48 {offsets = [0, 4], sizes = [16, 1], strides = [1, 1]} : vector<16x6xf32> to vector<16x1xf32>
    %59 = vector.broadcast %58 : vector<16x1xf32> to vector<16x16xf32>
    %60 = arith.mulf %59, %4 : vector<16x16xf32>
    %cst_22 = arith.constant dense<0.000000e+00> : vector<16xf32>
    %61 = vector.multi_reduction <add>, %60, %cst_22 [0] : vector<16x16xf32> to vector<16xf32>
    %62 = vector.shape_cast %61 : vector<16xf32> to vector<1x16xf32>
    %63 = vector.broadcast %52 : vector<16x1xf32> to vector<16x16xf32>
    %64 = vector.broadcast %57 : vector<1x16xf32> to vector<16x16xf32>
    %65 = arith.mulf %63, %64 : vector<16x16xf32>
    %cst_23 = arith.constant dense<0xFF800000> : vector<16xf32>
    %66 = vector.multi_reduction <maximumf>, %65, %cst_23 [1] : vector<16x16xf32> to vector<16xf32>
    %67 = vector.shape_cast %66 : vector<16xf32> to vector<16x1xf32>
    %68 = vector.broadcast %67 : vector<16x1xf32> to vector<16x16xf32>
    %69 = arith.subf %65, %68 : vector<16x16xf32>
    %70 = math.exp %69 : vector<16x16xf32>
    %cst_24 = arith.constant dense<0.000000e+00> : vector<16xf32>
    %71 = vector.multi_reduction <add>, %70, %cst_24 [1] : vector<16x16xf32> to vector<16xf32>
    %72 = vector.shape_cast %71 : vector<16xf32> to vector<16x1xf32>
    %73 = vector.broadcast %62 : vector<1x16xf32> to vector<16x16xf32>
    %74 = arith.mulf %70, %73 : vector<16x16xf32>
    %cst_25 = arith.constant dense<0.000000e+00> : vector<16xf32>
    %75 = vector.multi_reduction <add>, %74, %cst_25 [1] : vector<16x16xf32> to vector<16xf32>
    %76 = vector.shape_cast %75 : vector<16xf32> to vector<16x1xf32>
    %77 = tpu.reciprocal %72 {approx = true} : vector<16x1xf32> -> vector<16x1xf32>
    %78 = arith.mulf %76, %77 : vector<16x1xf32>
    %c0_26 = arith.constant 0 : index
    %c0_27 = arith.constant 0 : index
    %c0_28 = arith.constant 0 : index
    %79 = vector.load %arg4[%c0_26, %c0_27, %c0_28] : memref<4x2x2xf32, #tpu.memory_space<vmem>>, vector<1x2x2xf32>
    %80 = vector.shape_cast %79 : vector<1x2x2xf32> to vector<2x2xf32>
    %81 = vector.extract_strided_slice %80 {offsets = [0, 0], sizes = [1, 2], strides = [1, 1]} : vector<2x2xf32> to vector<1x2xf32>
    %82 = vector.broadcast %78 : vector<16x1xf32> to vector<16x2xf32>
    %83 = vector.broadcast %81 : vector<1x2xf32> to vector<16x2xf32>
    %84 = arith.mulf %82, %83 : vector<16x2xf32>
    %85 = arith.addf %49, %84 : vector<16x2xf32>
    %86 = vector.extract_strided_slice %48 {offsets = [0, 1], sizes = [16, 1], strides = [1, 1]} : vector<16x6xf32> to vector<16x1xf32>
    %cst_29 = arith.constant 1.000000e+00 : f32
    %87 = vector.broadcast %cst_29 : f32 to vector<16x1xf32>
    %88 = arith.mulf %86, %87 : vector<16x1xf32>
    %89 = vector.extract_strided_slice %48 {offsets = [0, 3], sizes = [16, 1], strides = [1, 1]} : vector<16x6xf32> to vector<16x1xf32>
    %90 = vector.broadcast %89 : vector<16x1xf32> to vector<16x16xf32>
    %91 = arith.mulf %90, %4 : vector<16x16xf32>
    %cst_30 = arith.constant dense<0.000000e+00> : vector<16xf32>
    %92 = vector.multi_reduction <add>, %91, %cst_30 [0] : vector<16x16xf32> to vector<16xf32>
    %93 = vector.shape_cast %92 : vector<16xf32> to vector<1x16xf32>
    %94 = vector.extract_strided_slice %48 {offsets = [0, 5], sizes = [16, 1], strides = [1, 1]} : vector<16x6xf32> to vector<16x1xf32>
    %95 = vector.broadcast %94 : vector<16x1xf32> to vector<16x16xf32>
    %96 = arith.mulf %95, %4 : vector<16x16xf32>
    %cst_31 = arith.constant dense<0.000000e+00> : vector<16xf32>
    %97 = vector.multi_reduction <add>, %96, %cst_31 [0] : vector<16x16xf32> to vector<16xf32>
    %98 = vector.shape_cast %97 : vector<16xf32> to vector<1x16xf32>
    %99 = vector.broadcast %88 : vector<16x1xf32> to vector<16x16xf32>
    %100 = vector.broadcast %93 : vector<1x16xf32> to vector<16x16xf32>
    %101 = arith.mulf %99, %100 : vector<16x16xf32>
    %cst_32 = arith.constant dense<0xFF800000> : vector<16xf32>
    %102 = vector.multi_reduction <maximumf>, %101, %cst_32 [1] : vector<16x16xf32> to vector<16xf32>
    %103 = vector.shape_cast %102 : vector<16xf32> to vector<16x1xf32>
    %104 = vector.broadcast %103 : vector<16x1xf32> to vector<16x16xf32>
    %105 = arith.subf %101, %104 : vector<16x16xf32>
    %106 = math.exp %105 : vector<16x16xf32>
    %cst_33 = arith.constant dense<0.000000e+00> : vector<16xf32>
    %107 = vector.multi_reduction <add>, %106, %cst_33 [1] : vector<16x16xf32> to vector<16xf32>
    %108 = vector.shape_cast %107 : vector<16xf32> to vector<16x1xf32>
    %109 = vector.broadcast %98 : vector<1x16xf32> to vector<16x16xf32>
    %110 = arith.mulf %106, %109 : vector<16x16xf32>
    %cst_34 = arith.constant dense<0.000000e+00> : vector<16xf32>
    %111 = vector.multi_reduction <add>, %110, %cst_34 [1] : vector<16x16xf32> to vector<16xf32>
    %112 = vector.shape_cast %111 : vector<16xf32> to vector<16x1xf32>
    %113 = tpu.reciprocal %108 {approx = true} : vector<16x1xf32> -> vector<16x1xf32>
    %114 = arith.mulf %112, %113 : vector<16x1xf32>
    %c0_35 = arith.constant 0 : index
    %c0_36 = arith.constant 0 : index
    %c0_37 = arith.constant 0 : index
    %115 = vector.load %arg4[%c0_35, %c0_36, %c0_37] : memref<4x2x2xf32, #tpu.memory_space<vmem>>, vector<1x2x2xf32>
    %116 = vector.shape_cast %115 : vector<1x2x2xf32> to vector<2x2xf32>
    %117 = vector.extract_strided_slice %116 {offsets = [1, 0], sizes = [1, 2], strides = [1, 1]} : vector<2x2xf32> to vector<1x2xf32>
    %118 = vector.broadcast %114 : vector<16x1xf32> to vector<16x2xf32>
    %119 = vector.broadcast %117 : vector<1x2xf32> to vector<16x2xf32>
    %120 = arith.mulf %118, %119 : vector<16x2xf32>
    %121 = arith.addf %85, %120 : vector<16x2xf32>
    %122 = arith.addf %17, %121 : vector<16x2xf32>
    %c0_38 = arith.constant 0 : index
    %c0_39 = arith.constant 0 : index
    %c0_40 = arith.constant 0 : index
    %123 = vector.load %arg5[%c0_38, %c0_39, %c0_40] : memref<4x1x2xf32, #tpu.memory_space<vmem>>, vector<1x1x2xf32>
    %124 = vector.shape_cast %123 : vector<1x1x2xf32> to vector<1x2xf32>
    %125 = vector.broadcast %124 : vector<1x2xf32> to vector<16x2xf32>
    %126 = arith.addf %122, %125 : vector<16x2xf32>
    %c0_41 = arith.constant 0 : index
    %c0_42 = arith.constant 0 : index
    %c0_43 = arith.constant 0 : index
    %127 = vector.load %arg8[%c0_41, %c0_42, %c0_43] : memref<4x1x2xf32, #tpu.memory_space<vmem>>, vector<1x1x2xf32>
    %128 = vector.shape_cast %127 : vector<1x1x2xf32> to vector<1x2xf32>
    %c0_44 = arith.constant 0 : index
    %c0_45 = arith.constant 0 : index
    %c0_46 = arith.constant 0 : index
    %129 = vector.load %arg9[%c0_44, %c0_45, %c0_46] : memref<4x1x2xf32, #tpu.memory_space<vmem>>, vector<1x1x2xf32>
    %130 = vector.shape_cast %129 : vector<1x1x2xf32> to vector<1x2xf32>
    %131 = vector.extract_strided_slice %126 {offsets = [0, 0], sizes = [16, 1], strides = [1, 1]} : vector<16x2xf32> to vector<16x1xf32>
    %132 = vector.extract_strided_slice %126 {offsets = [0, 1], sizes = [16, 1], strides = [1, 1]} : vector<16x2xf32> to vector<16x1xf32>
    %133 = arith.addf %131, %132 : vector<16x1xf32>
    %cst_47 = arith.constant 5.000000e-01 : f32
    %134 = vector.broadcast %cst_47 : f32 to vector<16x1xf32>
    %135 = arith.mulf %134, %133 : vector<16x1xf32>
    %136 = arith.subf %131, %132 : vector<16x1xf32>
    %137 = arith.mulf %136, %136 : vector<16x1xf32>
    %cst_48 = arith.constant 2.500000e-01 : f32
    %138 = vector.broadcast %cst_48 : f32 to vector<16x1xf32>
    %139 = arith.mulf %138, %137 : vector<16x1xf32>
    %cst_49 = arith.constant 9.99999974E-6 : f32
    %140 = vector.broadcast %cst_49 : f32 to vector<16x1xf32>
    %141 = arith.addf %139, %140 : vector<16x1xf32>
    %142 = math.rsqrt %141 : vector<16x1xf32>
    %143 = vector.broadcast %135 : vector<16x1xf32> to vector<16x2xf32>
    %144 = arith.subf %126, %143 : vector<16x2xf32>
    %145 = vector.broadcast %142 : vector<16x1xf32> to vector<16x2xf32>
    %146 = arith.mulf %144, %145 : vector<16x2xf32>
    %147 = vector.broadcast %128 : vector<1x2xf32> to vector<16x2xf32>
    %148 = arith.mulf %146, %147 : vector<16x2xf32>
    %149 = vector.broadcast %130 : vector<1x2xf32> to vector<16x2xf32>
    %150 = arith.addf %148, %149 : vector<16x2xf32>
    %151 = arith.truncf %150 : vector<16x2xf32> to vector<16x2xbf16>
    %c0_50 = arith.constant 0 : index
    %c0_51 = arith.constant 0 : index
    %c0_52 = arith.constant 0 : index
    %152 = vector.load %arg10[%c0_50, %c0_51, %c0_52] : memref<4x2x2048xbf16, #tpu.memory_space<vmem>>, vector<1x2x2048xbf16>
    %153 = vector.shape_cast %152 : vector<1x2x2048xbf16> to vector<2x2048xbf16>
    %cst_53 = arith.constant dense<0.000000e+00> : vector<16x2048xf32>
    %154 = tpu.matmul %151, %153, %cst_53 {dimension_numbers = #tpu.dot_dimension_numbers<[1], [0], [0], [1], [0, 0, 1, 1], [], []>} : vector<16x2xbf16>, vector<2x2048xbf16>, vector<16x2048xf32> -> vector<16x2048xf32>
    %c0_54 = arith.constant 0 : index
    %c0_55 = arith.constant 0 : index
    %c0_56 = arith.constant 0 : index
    %155 = vector.load %arg11[%c0_54, %c0_55, %c0_56] : memref<4x1x2048xf32, #tpu.memory_space<vmem>>, vector<1x1x2048xf32>
    %156 = vector.shape_cast %155 : vector<1x1x2048xf32> to vector<1x2048xf32>
    %157 = vector.broadcast %156 : vector<1x2048xf32> to vector<16x2048xf32>
    %158 = arith.addf %154, %157 : vector<16x2048xf32>
    %cst_57 = arith.constant 0.000000e+00 : f32
    %159 = vector.broadcast %cst_57 : f32 to vector<16x2048xf32>
    %160 = arith.maximumf %158, %159 : vector<16x2048xf32>
    %161 = arith.truncf %160 : vector<16x2048xf32> to vector<16x2048xbf16>
    %c0_58 = arith.constant 0 : index
    %c0_59 = arith.constant 0 : index
    %c0_60 = arith.constant 0 : index
    %162 = vector.load %arg12[%c0_58, %c0_59, %c0_60] : memref<4x2x2048xbf16, #tpu.memory_space<vmem>>, vector<1x2x2048xbf16>
    %163 = vector.shape_cast %162 : vector<1x2x2048xbf16> to vector<2x2048xbf16>
    %cst_61 = arith.constant dense<0.000000e+00> : vector<16x2xf32>
    %164 = tpu.matmul %161, %163, %cst_61 {dimension_numbers = #tpu.dot_dimension_numbers<[1], [1], [0], [0], [0, 0, 1, 0], [], []>} : vector<16x2048xbf16>, vector<2x2048xbf16>, vector<16x2xf32> -> vector<16x2xf32>
    %c0_62 = arith.constant 0 : index
    %c0_63 = arith.constant 0 : index
    %c0_64 = arith.constant 0 : index
    %165 = vector.load %arg13[%c0_62, %c0_63, %c0_64] : memref<4x1x2xf32, #tpu.memory_space<vmem>>, vector<1x1x2xf32>
    %166 = vector.shape_cast %165 : vector<1x1x2xf32> to vector<1x2xf32>
    %167 = vector.broadcast %166 : vector<1x2xf32> to vector<16x2xf32>
    %168 = arith.addf %164, %167 : vector<16x2xf32>
    %169 = arith.addf %126, %168 : vector<16x2xf32>
    %c1 = arith.constant 1 : index
    %c0_65 = arith.constant 0 : index
    %c0_66 = arith.constant 0 : index
    %170 = vector.load %arg6[%c1, %c0_65, %c0_66] : memref<4x1x2xf32, #tpu.memory_space<vmem>>, vector<1x1x2xf32>
    %171 = vector.shape_cast %170 : vector<1x1x2xf32> to vector<1x2xf32>
    %c1_67 = arith.constant 1 : index
    %c0_68 = arith.constant 0 : index
    %c0_69 = arith.constant 0 : index
    %172 = vector.load %arg7[%c1_67, %c0_68, %c0_69] : memref<4x1x2xf32, #tpu.memory_space<vmem>>, vector<1x1x2xf32>
    %173 = vector.shape_cast %172 : vector<1x1x2xf32> to vector<1x2xf32>
    %174 = vector.extract_strided_slice %169 {offsets = [0, 0], sizes = [16, 1], strides = [1, 1]} : vector<16x2xf32> to vector<16x1xf32>
    %175 = vector.extract_strided_slice %169 {offsets = [0, 1], sizes = [16, 1], strides = [1, 1]} : vector<16x2xf32> to vector<16x1xf32>
    %176 = arith.addf %174, %175 : vector<16x1xf32>
    %cst_70 = arith.constant 5.000000e-01 : f32
    %177 = vector.broadcast %cst_70 : f32 to vector<16x1xf32>
    %178 = arith.mulf %177, %176 : vector<16x1xf32>
    %179 = arith.subf %174, %175 : vector<16x1xf32>
    %180 = arith.mulf %179, %179 : vector<16x1xf32>
    %cst_71 = arith.constant 2.500000e-01 : f32
    %181 = vector.broadcast %cst_71 : f32 to vector<16x1xf32>
    %182 = arith.mulf %181, %180 : vector<16x1xf32>
    %cst_72 = arith.constant 9.99999974E-6 : f32
    %183 = vector.broadcast %cst_72 : f32 to vector<16x1xf32>
    %184 = arith.addf %182, %183 : vector<16x1xf32>
    %185 = math.rsqrt %184 : vector<16x1xf32>
    %186 = vector.broadcast %178 : vector<16x1xf32> to vector<16x2xf32>
    %187 = arith.subf %169, %186 : vector<16x2xf32>
    %188 = vector.broadcast %185 : vector<16x1xf32> to vector<16x2xf32>
    %189 = arith.mulf %187, %188 : vector<16x2xf32>
    %190 = vector.broadcast %171 : vector<1x2xf32> to vector<16x2xf32>
    %191 = arith.mulf %189, %190 : vector<16x2xf32>
    %192 = vector.broadcast %173 : vector<1x2xf32> to vector<16x2xf32>
    %193 = arith.addf %191, %192 : vector<16x2xf32>
    %c1_73 = arith.constant 1 : index
    %c0_74 = arith.constant 0 : index
    %c0_75 = arith.constant 0 : index
    %194 = vector.load %arg2[%c1_73, %c0_74, %c0_75] : memref<4x2x6xf32, #tpu.memory_space<vmem>>, vector<1x2x6xf32>
    %195 = vector.shape_cast %194 : vector<1x2x6xf32> to vector<2x6xf32>
    %cst_76 = arith.constant dense<0.000000e+00> : vector<16x6xf32>
    %196 = tpu.matmul %193, %195, %cst_76 {dimension_numbers = #tpu.dot_dimension_numbers<[1], [0], [0], [1], [0, 0, 1, 1], [], []>} : vector<16x2xf32>, vector<2x6xf32>, vector<16x6xf32> -> vector<16x6xf32>
    %c1_77 = arith.constant 1 : index
    %c0_78 = arith.constant 0 : index
    %c0_79 = arith.constant 0 : index
    %197 = vector.load %arg3[%c1_77, %c0_78, %c0_79] : memref<4x1x6xf32, #tpu.memory_space<vmem>>, vector<1x1x6xf32>
    %198 = vector.shape_cast %197 : vector<1x1x6xf32> to vector<1x6xf32>
    %199 = vector.broadcast %198 : vector<1x6xf32> to vector<16x6xf32>
    %200 = arith.addf %196, %199 : vector<16x6xf32>
    %cst_80 = arith.constant 0.000000e+00 : f32
    %201 = vector.broadcast %cst_80 : f32 to vector<16x2xf32>
    %202 = vector.extract_strided_slice %200 {offsets = [0, 0], sizes = [16, 1], strides = [1, 1]} : vector<16x6xf32> to vector<16x1xf32>
    %cst_81 = arith.constant 1.000000e+00 : f32
    %203 = vector.broadcast %cst_81 : f32 to vector<16x1xf32>
    %204 = arith.mulf %202, %203 : vector<16x1xf32>
    %205 = vector.extract_strided_slice %200 {offsets = [0, 2], sizes = [16, 1], strides = [1, 1]} : vector<16x6xf32> to vector<16x1xf32>
    %206 = vector.broadcast %205 : vector<16x1xf32> to vector<16x16xf32>
    %207 = arith.mulf %206, %4 : vector<16x16xf32>
    %cst_82 = arith.constant dense<0.000000e+00> : vector<16xf32>
    %208 = vector.multi_reduction <add>, %207, %cst_82 [0] : vector<16x16xf32> to vector<16xf32>
    %209 = vector.shape_cast %208 : vector<16xf32> to vector<1x16xf32>
    %210 = vector.extract_strided_slice %200 {offsets = [0, 4], sizes = [16, 1], strides = [1, 1]} : vector<16x6xf32> to vector<16x1xf32>
    %211 = vector.broadcast %210 : vector<16x1xf32> to vector<16x16xf32>
    %212 = arith.mulf %211, %4 : vector<16x16xf32>
    %cst_83 = arith.constant dense<0.000000e+00> : vector<16xf32>
    %213 = vector.multi_reduction <add>, %212, %cst_83 [0] : vector<16x16xf32> to vector<16xf32>
    %214 = vector.shape_cast %213 : vector<16xf32> to vector<1x16xf32>
    %215 = vector.broadcast %204 : vector<16x1xf32> to vector<16x16xf32>
    %216 = vector.broadcast %209 : vector<1x16xf32> to vector<16x16xf32>
    %217 = arith.mulf %215, %216 : vector<16x16xf32>
    %cst_84 = arith.constant dense<0xFF800000> : vector<16xf32>
    %218 = vector.multi_reduction <maximumf>, %217, %cst_84 [1] : vector<16x16xf32> to vector<16xf32>
    %219 = vector.shape_cast %218 : vector<16xf32> to vector<16x1xf32>
    %220 = vector.broadcast %219 : vector<16x1xf32> to vector<16x16xf32>
    %221 = arith.subf %217, %220 : vector<16x16xf32>
    %222 = math.exp %221 : vector<16x16xf32>
    %cst_85 = arith.constant dense<0.000000e+00> : vector<16xf32>
    %223 = vector.multi_reduction <add>, %222, %cst_85 [1] : vector<16x16xf32> to vector<16xf32>
    %224 = vector.shape_cast %223 : vector<16xf32> to vector<16x1xf32>
    %225 = vector.broadcast %214 : vector<1x16xf32> to vector<16x16xf32>
    %226 = arith.mulf %222, %225 : vector<16x16xf32>
    %cst_86 = arith.constant dense<0.000000e+00> : vector<16xf32>
    %227 = vector.multi_reduction <add>, %226, %cst_86 [1] : vector<16x16xf32> to vector<16xf32>
    %228 = vector.shape_cast %227 : vector<16xf32> to vector<16x1xf32>
    %229 = tpu.reciprocal %224 {approx = true} : vector<16x1xf32> -> vector<16x1xf32>
    %230 = arith.mulf %228, %229 : vector<16x1xf32>
    %c1_87 = arith.constant 1 : index
    %c0_88 = arith.constant 0 : index
    %c0_89 = arith.constant 0 : index
    %231 = vector.load %arg4[%c1_87, %c0_88, %c0_89] : memref<4x2x2xf32, #tpu.memory_space<vmem>>, vector<1x2x2xf32>
    %232 = vector.shape_cast %231 : vector<1x2x2xf32> to vector<2x2xf32>
    %233 = vector.extract_strided_slice %232 {offsets = [0, 0], sizes = [1, 2], strides = [1, 1]} : vector<2x2xf32> to vector<1x2xf32>
    %234 = vector.broadcast %230 : vector<16x1xf32> to vector<16x2xf32>
    %235 = vector.broadcast %233 : vector<1x2xf32> to vector<16x2xf32>
    %236 = arith.mulf %234, %235 : vector<16x2xf32>
    %237 = arith.addf %201, %236 : vector<16x2xf32>
    %238 = vector.extract_strided_slice %200 {offsets = [0, 1], sizes = [16, 1], strides = [1, 1]} : vector<16x6xf32> to vector<16x1xf32>
    %cst_90 = arith.constant 1.000000e+00 : f32
    %239 = vector.broadcast %cst_90 : f32 to vector<16x1xf32>
    %240 = arith.mulf %238, %239 : vector<16x1xf32>
    %241 = vector.extract_strided_slice %200 {offsets = [0, 3], sizes = [16, 1], strides = [1, 1]} : vector<16x6xf32> to vector<16x1xf32>
    %242 = vector.broadcast %241 : vector<16x1xf32> to vector<16x16xf32>
    %243 = arith.mulf %242, %4 : vector<16x16xf32>
    %cst_91 = arith.constant dense<0.000000e+00> : vector<16xf32>
    %244 = vector.multi_reduction <add>, %243, %cst_91 [0] : vector<16x16xf32> to vector<16xf32>
    %245 = vector.shape_cast %244 : vector<16xf32> to vector<1x16xf32>
    %246 = vector.extract_strided_slice %200 {offsets = [0, 5], sizes = [16, 1], strides = [1, 1]} : vector<16x6xf32> to vector<16x1xf32>
    %247 = vector.broadcast %246 : vector<16x1xf32> to vector<16x16xf32>
    %248 = arith.mulf %247, %4 : vector<16x16xf32>
    %cst_92 = arith.constant dense<0.000000e+00> : vector<16xf32>
    %249 = vector.multi_reduction <add>, %248, %cst_92 [0] : vector<16x16xf32> to vector<16xf32>
    %250 = vector.shape_cast %249 : vector<16xf32> to vector<1x16xf32>
    %251 = vector.broadcast %240 : vector<16x1xf32> to vector<16x16xf32>
    %252 = vector.broadcast %245 : vector<1x16xf32> to vector<16x16xf32>
    %253 = arith.mulf %251, %252 : vector<16x16xf32>
    %cst_93 = arith.constant dense<0xFF800000> : vector<16xf32>
    %254 = vector.multi_reduction <maximumf>, %253, %cst_93 [1] : vector<16x16xf32> to vector<16xf32>
    %255 = vector.shape_cast %254 : vector<16xf32> to vector<16x1xf32>
    %256 = vector.broadcast %255 : vector<16x1xf32> to vector<16x16xf32>
    %257 = arith.subf %253, %256 : vector<16x16xf32>
    %258 = math.exp %257 : vector<16x16xf32>
    %cst_94 = arith.constant dense<0.000000e+00> : vector<16xf32>
    %259 = vector.multi_reduction <add>, %258, %cst_94 [1] : vector<16x16xf32> to vector<16xf32>
    %260 = vector.shape_cast %259 : vector<16xf32> to vector<16x1xf32>
    %261 = vector.broadcast %250 : vector<1x16xf32> to vector<16x16xf32>
    %262 = arith.mulf %258, %261 : vector<16x16xf32>
    %cst_95 = arith.constant dense<0.000000e+00> : vector<16xf32>
    %263 = vector.multi_reduction <add>, %262, %cst_95 [1] : vector<16x16xf32> to vector<16xf32>
    %264 = vector.shape_cast %263 : vector<16xf32> to vector<16x1xf32>
    %265 = tpu.reciprocal %260 {approx = true} : vector<16x1xf32> -> vector<16x1xf32>
    %266 = arith.mulf %264, %265 : vector<16x1xf32>
    %c1_96 = arith.constant 1 : index
    %c0_97 = arith.constant 0 : index
    %c0_98 = arith.constant 0 : index
    %267 = vector.load %arg4[%c1_96, %c0_97, %c0_98] : memref<4x2x2xf32, #tpu.memory_space<vmem>>, vector<1x2x2xf32>
    %268 = vector.shape_cast %267 : vector<1x2x2xf32> to vector<2x2xf32>
    %269 = vector.extract_strided_slice %268 {offsets = [1, 0], sizes = [1, 2], strides = [1, 1]} : vector<2x2xf32> to vector<1x2xf32>
    %270 = vector.broadcast %266 : vector<16x1xf32> to vector<16x2xf32>
    %271 = vector.broadcast %269 : vector<1x2xf32> to vector<16x2xf32>
    %272 = arith.mulf %270, %271 : vector<16x2xf32>
    %273 = arith.addf %237, %272 : vector<16x2xf32>
    %274 = arith.addf %169, %273 : vector<16x2xf32>
    %c1_99 = arith.constant 1 : index
    %c0_100 = arith.constant 0 : index
    %c0_101 = arith.constant 0 : index
    %275 = vector.load %arg5[%c1_99, %c0_100, %c0_101] : memref<4x1x2xf32, #tpu.memory_space<vmem>>, vector<1x1x2xf32>
    %276 = vector.shape_cast %275 : vector<1x1x2xf32> to vector<1x2xf32>
    %277 = vector.broadcast %276 : vector<1x2xf32> to vector<16x2xf32>
    %278 = arith.addf %274, %277 : vector<16x2xf32>
    %c1_102 = arith.constant 1 : index
    %c0_103 = arith.constant 0 : index
    %c0_104 = arith.constant 0 : index
    %279 = vector.load %arg8[%c1_102, %c0_103, %c0_104] : memref<4x1x2xf32, #tpu.memory_space<vmem>>, vector<1x1x2xf32>
    %280 = vector.shape_cast %279 : vector<1x1x2xf32> to vector<1x2xf32>
    %c1_105 = arith.constant 1 : index
    %c0_106 = arith.constant 0 : index
    %c0_107 = arith.constant 0 : index
    %281 = vector.load %arg9[%c1_105, %c0_106, %c0_107] : memref<4x1x2xf32, #tpu.memory_space<vmem>>, vector<1x1x2xf32>
    %282 = vector.shape_cast %281 : vector<1x1x2xf32> to vector<1x2xf32>
    %283 = vector.extract_strided_slice %278 {offsets = [0, 0], sizes = [16, 1], strides = [1, 1]} : vector<16x2xf32> to vector<16x1xf32>
    %284 = vector.extract_strided_slice %278 {offsets = [0, 1], sizes = [16, 1], strides = [1, 1]} : vector<16x2xf32> to vector<16x1xf32>
    %285 = arith.addf %283, %284 : vector<16x1xf32>
    %cst_108 = arith.constant 5.000000e-01 : f32
    %286 = vector.broadcast %cst_108 : f32 to vector<16x1xf32>
    %287 = arith.mulf %286, %285 : vector<16x1xf32>
    %288 = arith.subf %283, %284 : vector<16x1xf32>
    %289 = arith.mulf %288, %288 : vector<16x1xf32>
    %cst_109 = arith.constant 2.500000e-01 : f32
    %290 = vector.broadcast %cst_109 : f32 to vector<16x1xf32>
    %291 = arith.mulf %290, %289 : vector<16x1xf32>
    %cst_110 = arith.constant 9.99999974E-6 : f32
    %292 = vector.broadcast %cst_110 : f32 to vector<16x1xf32>
    %293 = arith.addf %291, %292 : vector<16x1xf32>
    %294 = math.rsqrt %293 : vector<16x1xf32>
    %295 = vector.broadcast %287 : vector<16x1xf32> to vector<16x2xf32>
    %296 = arith.subf %278, %295 : vector<16x2xf32>
    %297 = vector.broadcast %294 : vector<16x1xf32> to vector<16x2xf32>
    %298 = arith.mulf %296, %297 : vector<16x2xf32>
    %299 = vector.broadcast %280 : vector<1x2xf32> to vector<16x2xf32>
    %300 = arith.mulf %298, %299 : vector<16x2xf32>
    %301 = vector.broadcast %282 : vector<1x2xf32> to vector<16x2xf32>
    %302 = arith.addf %300, %301 : vector<16x2xf32>
    %303 = arith.truncf %302 : vector<16x2xf32> to vector<16x2xbf16>
    %c1_111 = arith.constant 1 : index
    %c0_112 = arith.constant 0 : index
    %c0_113 = arith.constant 0 : index
    %304 = vector.load %arg10[%c1_111, %c0_112, %c0_113] : memref<4x2x2048xbf16, #tpu.memory_space<vmem>>, vector<1x2x2048xbf16>
    %305 = vector.shape_cast %304 : vector<1x2x2048xbf16> to vector<2x2048xbf16>
    %cst_114 = arith.constant dense<0.000000e+00> : vector<16x2048xf32>
    %306 = tpu.matmul %303, %305, %cst_114 {dimension_numbers = #tpu.dot_dimension_numbers<[1], [0], [0], [1], [0, 0, 1, 1], [], []>} : vector<16x2xbf16>, vector<2x2048xbf16>, vector<16x2048xf32> -> vector<16x2048xf32>
    %c1_115 = arith.constant 1 : index
    %c0_116 = arith.constant 0 : index
    %c0_117 = arith.constant 0 : index
    %307 = vector.load %arg11[%c1_115, %c0_116, %c0_117] : memref<4x1x2048xf32, #tpu.memory_space<vmem>>, vector<1x1x2048xf32>
    %308 = vector.shape_cast %307 : vector<1x1x2048xf32> to vector<1x2048xf32>
    %309 = vector.broadcast %308 : vector<1x2048xf32> to vector<16x2048xf32>
    %310 = arith.addf %306, %309 : vector<16x2048xf32>
    %cst_118 = arith.constant 0.000000e+00 : f32
    %311 = vector.broadcast %cst_118 : f32 to vector<16x2048xf32>
    %312 = arith.maximumf %310, %311 : vector<16x2048xf32>
    %313 = arith.truncf %312 : vector<16x2048xf32> to vector<16x2048xbf16>
    %c1_119 = arith.constant 1 : index
    %c0_120 = arith.constant 0 : index
    %c0_121 = arith.constant 0 : index
    %314 = vector.load %arg12[%c1_119, %c0_120, %c0_121] : memref<4x2x2048xbf16, #tpu.memory_space<vmem>>, vector<1x2x2048xbf16>
    %315 = vector.shape_cast %314 : vector<1x2x2048xbf16> to vector<2x2048xbf16>
    %cst_122 = arith.constant dense<0.000000e+00> : vector<16x2xf32>
    %316 = tpu.matmul %313, %315, %cst_122 {dimension_numbers = #tpu.dot_dimension_numbers<[1], [1], [0], [0], [0, 0, 1, 0], [], []>} : vector<16x2048xbf16>, vector<2x2048xbf16>, vector<16x2xf32> -> vector<16x2xf32>
    %c1_123 = arith.constant 1 : index
    %c0_124 = arith.constant 0 : index
    %c0_125 = arith.constant 0 : index
    %317 = vector.load %arg13[%c1_123, %c0_124, %c0_125] : memref<4x1x2xf32, #tpu.memory_space<vmem>>, vector<1x1x2xf32>
    %318 = vector.shape_cast %317 : vector<1x1x2xf32> to vector<1x2xf32>
    %319 = vector.broadcast %318 : vector<1x2xf32> to vector<16x2xf32>
    %320 = arith.addf %316, %319 : vector<16x2xf32>
    %321 = arith.addf %278, %320 : vector<16x2xf32>
    %c2 = arith.constant 2 : index
    %c0_126 = arith.constant 0 : index
    %c0_127 = arith.constant 0 : index
    %322 = vector.load %arg6[%c2, %c0_126, %c0_127] : memref<4x1x2xf32, #tpu.memory_space<vmem>>, vector<1x1x2xf32>
    %323 = vector.shape_cast %322 : vector<1x1x2xf32> to vector<1x2xf32>
    %c2_128 = arith.constant 2 : index
    %c0_129 = arith.constant 0 : index
    %c0_130 = arith.constant 0 : index
    %324 = vector.load %arg7[%c2_128, %c0_129, %c0_130] : memref<4x1x2xf32, #tpu.memory_space<vmem>>, vector<1x1x2xf32>
    %325 = vector.shape_cast %324 : vector<1x1x2xf32> to vector<1x2xf32>
    %326 = vector.extract_strided_slice %321 {offsets = [0, 0], sizes = [16, 1], strides = [1, 1]} : vector<16x2xf32> to vector<16x1xf32>
    %327 = vector.extract_strided_slice %321 {offsets = [0, 1], sizes = [16, 1], strides = [1, 1]} : vector<16x2xf32> to vector<16x1xf32>
    %328 = arith.addf %326, %327 : vector<16x1xf32>
    %cst_131 = arith.constant 5.000000e-01 : f32
    %329 = vector.broadcast %cst_131 : f32 to vector<16x1xf32>
    %330 = arith.mulf %329, %328 : vector<16x1xf32>
    %331 = arith.subf %326, %327 : vector<16x1xf32>
    %332 = arith.mulf %331, %331 : vector<16x1xf32>
    %cst_132 = arith.constant 2.500000e-01 : f32
    %333 = vector.broadcast %cst_132 : f32 to vector<16x1xf32>
    %334 = arith.mulf %333, %332 : vector<16x1xf32>
    %cst_133 = arith.constant 9.99999974E-6 : f32
    %335 = vector.broadcast %cst_133 : f32 to vector<16x1xf32>
    %336 = arith.addf %334, %335 : vector<16x1xf32>
    %337 = math.rsqrt %336 : vector<16x1xf32>
    %338 = vector.broadcast %330 : vector<16x1xf32> to vector<16x2xf32>
    %339 = arith.subf %321, %338 : vector<16x2xf32>
    %340 = vector.broadcast %337 : vector<16x1xf32> to vector<16x2xf32>
    %341 = arith.mulf %339, %340 : vector<16x2xf32>
    %342 = vector.broadcast %323 : vector<1x2xf32> to vector<16x2xf32>
    %343 = arith.mulf %341, %342 : vector<16x2xf32>
    %344 = vector.broadcast %325 : vector<1x2xf32> to vector<16x2xf32>
    %345 = arith.addf %343, %344 : vector<16x2xf32>
    %c2_134 = arith.constant 2 : index
    %c0_135 = arith.constant 0 : index
    %c0_136 = arith.constant 0 : index
    %346 = vector.load %arg2[%c2_134, %c0_135, %c0_136] : memref<4x2x6xf32, #tpu.memory_space<vmem>>, vector<1x2x6xf32>
    %347 = vector.shape_cast %346 : vector<1x2x6xf32> to vector<2x6xf32>
    %cst_137 = arith.constant dense<0.000000e+00> : vector<16x6xf32>
    %348 = tpu.matmul %345, %347, %cst_137 {dimension_numbers = #tpu.dot_dimension_numbers<[1], [0], [0], [1], [0, 0, 1, 1], [], []>} : vector<16x2xf32>, vector<2x6xf32>, vector<16x6xf32> -> vector<16x6xf32>
    %c2_138 = arith.constant 2 : index
    %c0_139 = arith.constant 0 : index
    %c0_140 = arith.constant 0 : index
    %349 = vector.load %arg3[%c2_138, %c0_139, %c0_140] : memref<4x1x6xf32, #tpu.memory_space<vmem>>, vector<1x1x6xf32>
    %350 = vector.shape_cast %349 : vector<1x1x6xf32> to vector<1x6xf32>
    %351 = vector.broadcast %350 : vector<1x6xf32> to vector<16x6xf32>
    %352 = arith.addf %348, %351 : vector<16x6xf32>
    %cst_141 = arith.constant 0.000000e+00 : f32
    %353 = vector.broadcast %cst_141 : f32 to vector<16x2xf32>
    %354 = vector.extract_strided_slice %352 {offsets = [0, 0], sizes = [16, 1], strides = [1, 1]} : vector<16x6xf32> to vector<16x1xf32>
    %cst_142 = arith.constant 1.000000e+00 : f32
    %355 = vector.broadcast %cst_142 : f32 to vector<16x1xf32>
    %356 = arith.mulf %354, %355 : vector<16x1xf32>
    %357 = vector.extract_strided_slice %352 {offsets = [0, 2], sizes = [16, 1], strides = [1, 1]} : vector<16x6xf32> to vector<16x1xf32>
    %358 = vector.broadcast %357 : vector<16x1xf32> to vector<16x16xf32>
    %359 = arith.mulf %358, %4 : vector<16x16xf32>
    %cst_143 = arith.constant dense<0.000000e+00> : vector<16xf32>
    %360 = vector.multi_reduction <add>, %359, %cst_143 [0] : vector<16x16xf32> to vector<16xf32>
    %361 = vector.shape_cast %360 : vector<16xf32> to vector<1x16xf32>
    %362 = vector.extract_strided_slice %352 {offsets = [0, 4], sizes = [16, 1], strides = [1, 1]} : vector<16x6xf32> to vector<16x1xf32>
    %363 = vector.broadcast %362 : vector<16x1xf32> to vector<16x16xf32>
    %364 = arith.mulf %363, %4 : vector<16x16xf32>
    %cst_144 = arith.constant dense<0.000000e+00> : vector<16xf32>
    %365 = vector.multi_reduction <add>, %364, %cst_144 [0] : vector<16x16xf32> to vector<16xf32>
    %366 = vector.shape_cast %365 : vector<16xf32> to vector<1x16xf32>
    %367 = vector.broadcast %356 : vector<16x1xf32> to vector<16x16xf32>
    %368 = vector.broadcast %361 : vector<1x16xf32> to vector<16x16xf32>
    %369 = arith.mulf %367, %368 : vector<16x16xf32>
    %cst_145 = arith.constant dense<0xFF800000> : vector<16xf32>
    %370 = vector.multi_reduction <maximumf>, %369, %cst_145 [1] : vector<16x16xf32> to vector<16xf32>
    %371 = vector.shape_cast %370 : vector<16xf32> to vector<16x1xf32>
    %372 = vector.broadcast %371 : vector<16x1xf32> to vector<16x16xf32>
    %373 = arith.subf %369, %372 : vector<16x16xf32>
    %374 = math.exp %373 : vector<16x16xf32>
    %cst_146 = arith.constant dense<0.000000e+00> : vector<16xf32>
    %375 = vector.multi_reduction <add>, %374, %cst_146 [1] : vector<16x16xf32> to vector<16xf32>
    %376 = vector.shape_cast %375 : vector<16xf32> to vector<16x1xf32>
    %377 = vector.broadcast %366 : vector<1x16xf32> to vector<16x16xf32>
    %378 = arith.mulf %374, %377 : vector<16x16xf32>
    %cst_147 = arith.constant dense<0.000000e+00> : vector<16xf32>
    %379 = vector.multi_reduction <add>, %378, %cst_147 [1] : vector<16x16xf32> to vector<16xf32>
    %380 = vector.shape_cast %379 : vector<16xf32> to vector<16x1xf32>
    %381 = tpu.reciprocal %376 {approx = true} : vector<16x1xf32> -> vector<16x1xf32>
    %382 = arith.mulf %380, %381 : vector<16x1xf32>
    %c2_148 = arith.constant 2 : index
    %c0_149 = arith.constant 0 : index
    %c0_150 = arith.constant 0 : index
    %383 = vector.load %arg4[%c2_148, %c0_149, %c0_150] : memref<4x2x2xf32, #tpu.memory_space<vmem>>, vector<1x2x2xf32>
    %384 = vector.shape_cast %383 : vector<1x2x2xf32> to vector<2x2xf32>
    %385 = vector.extract_strided_slice %384 {offsets = [0, 0], sizes = [1, 2], strides = [1, 1]} : vector<2x2xf32> to vector<1x2xf32>
    %386 = vector.broadcast %382 : vector<16x1xf32> to vector<16x2xf32>
    %387 = vector.broadcast %385 : vector<1x2xf32> to vector<16x2xf32>
    %388 = arith.mulf %386, %387 : vector<16x2xf32>
    %389 = arith.addf %353, %388 : vector<16x2xf32>
    %390 = vector.extract_strided_slice %352 {offsets = [0, 1], sizes = [16, 1], strides = [1, 1]} : vector<16x6xf32> to vector<16x1xf32>
    %cst_151 = arith.constant 1.000000e+00 : f32
    %391 = vector.broadcast %cst_151 : f32 to vector<16x1xf32>
    %392 = arith.mulf %390, %391 : vector<16x1xf32>
    %393 = vector.extract_strided_slice %352 {offsets = [0, 3], sizes = [16, 1], strides = [1, 1]} : vector<16x6xf32> to vector<16x1xf32>
    %394 = vector.broadcast %393 : vector<16x1xf32> to vector<16x16xf32>
    %395 = arith.mulf %394, %4 : vector<16x16xf32>
    %cst_152 = arith.constant dense<0.000000e+00> : vector<16xf32>
    %396 = vector.multi_reduction <add>, %395, %cst_152 [0] : vector<16x16xf32> to vector<16xf32>
    %397 = vector.shape_cast %396 : vector<16xf32> to vector<1x16xf32>
    %398 = vector.extract_strided_slice %352 {offsets = [0, 5], sizes = [16, 1], strides = [1, 1]} : vector<16x6xf32> to vector<16x1xf32>
    %399 = vector.broadcast %398 : vector<16x1xf32> to vector<16x16xf32>
    %400 = arith.mulf %399, %4 : vector<16x16xf32>
    %cst_153 = arith.constant dense<0.000000e+00> : vector<16xf32>
    %401 = vector.multi_reduction <add>, %400, %cst_153 [0] : vector<16x16xf32> to vector<16xf32>
    %402 = vector.shape_cast %401 : vector<16xf32> to vector<1x16xf32>
    %403 = vector.broadcast %392 : vector<16x1xf32> to vector<16x16xf32>
    %404 = vector.broadcast %397 : vector<1x16xf32> to vector<16x16xf32>
    %405 = arith.mulf %403, %404 : vector<16x16xf32>
    %cst_154 = arith.constant dense<0xFF800000> : vector<16xf32>
    %406 = vector.multi_reduction <maximumf>, %405, %cst_154 [1] : vector<16x16xf32> to vector<16xf32>
    %407 = vector.shape_cast %406 : vector<16xf32> to vector<16x1xf32>
    %408 = vector.broadcast %407 : vector<16x1xf32> to vector<16x16xf32>
    %409 = arith.subf %405, %408 : vector<16x16xf32>
    %410 = math.exp %409 : vector<16x16xf32>
    %cst_155 = arith.constant dense<0.000000e+00> : vector<16xf32>
    %411 = vector.multi_reduction <add>, %410, %cst_155 [1] : vector<16x16xf32> to vector<16xf32>
    %412 = vector.shape_cast %411 : vector<16xf32> to vector<16x1xf32>
    %413 = vector.broadcast %402 : vector<1x16xf32> to vector<16x16xf32>
    %414 = arith.mulf %410, %413 : vector<16x16xf32>
    %cst_156 = arith.constant dense<0.000000e+00> : vector<16xf32>
    %415 = vector.multi_reduction <add>, %414, %cst_156 [1] : vector<16x16xf32> to vector<16xf32>
    %416 = vector.shape_cast %415 : vector<16xf32> to vector<16x1xf32>
    %417 = tpu.reciprocal %412 {approx = true} : vector<16x1xf32> -> vector<16x1xf32>
    %418 = arith.mulf %416, %417 : vector<16x1xf32>
    %c2_157 = arith.constant 2 : index
    %c0_158 = arith.constant 0 : index
    %c0_159 = arith.constant 0 : index
    %419 = vector.load %arg4[%c2_157, %c0_158, %c0_159] : memref<4x2x2xf32, #tpu.memory_space<vmem>>, vector<1x2x2xf32>
    %420 = vector.shape_cast %419 : vector<1x2x2xf32> to vector<2x2xf32>
    %421 = vector.extract_strided_slice %420 {offsets = [1, 0], sizes = [1, 2], strides = [1, 1]} : vector<2x2xf32> to vector<1x2xf32>
    %422 = vector.broadcast %418 : vector<16x1xf32> to vector<16x2xf32>
    %423 = vector.broadcast %421 : vector<1x2xf32> to vector<16x2xf32>
    %424 = arith.mulf %422, %423 : vector<16x2xf32>
    %425 = arith.addf %389, %424 : vector<16x2xf32>
    %426 = arith.addf %321, %425 : vector<16x2xf32>
    %c2_160 = arith.constant 2 : index
    %c0_161 = arith.constant 0 : index
    %c0_162 = arith.constant 0 : index
    %427 = vector.load %arg5[%c2_160, %c0_161, %c0_162] : memref<4x1x2xf32, #tpu.memory_space<vmem>>, vector<1x1x2xf32>
    %428 = vector.shape_cast %427 : vector<1x1x2xf32> to vector<1x2xf32>
    %429 = vector.broadcast %428 : vector<1x2xf32> to vector<16x2xf32>
    %430 = arith.addf %426, %429 : vector<16x2xf32>
    %c2_163 = arith.constant 2 : index
    %c0_164 = arith.constant 0 : index
    %c0_165 = arith.constant 0 : index
    %431 = vector.load %arg8[%c2_163, %c0_164, %c0_165] : memref<4x1x2xf32, #tpu.memory_space<vmem>>, vector<1x1x2xf32>
    %432 = vector.shape_cast %431 : vector<1x1x2xf32> to vector<1x2xf32>
    %c2_166 = arith.constant 2 : index
    %c0_167 = arith.constant 0 : index
    %c0_168 = arith.constant 0 : index
    %433 = vector.load %arg9[%c2_166, %c0_167, %c0_168] : memref<4x1x2xf32, #tpu.memory_space<vmem>>, vector<1x1x2xf32>
    %434 = vector.shape_cast %433 : vector<1x1x2xf32> to vector<1x2xf32>
    %435 = vector.extract_strided_slice %430 {offsets = [0, 0], sizes = [16, 1], strides = [1, 1]} : vector<16x2xf32> to vector<16x1xf32>
    %436 = vector.extract_strided_slice %430 {offsets = [0, 1], sizes = [16, 1], strides = [1, 1]} : vector<16x2xf32> to vector<16x1xf32>
    %437 = arith.addf %435, %436 : vector<16x1xf32>
    %cst_169 = arith.constant 5.000000e-01 : f32
    %438 = vector.broadcast %cst_169 : f32 to vector<16x1xf32>
    %439 = arith.mulf %438, %437 : vector<16x1xf32>
    %440 = arith.subf %435, %436 : vector<16x1xf32>
    %441 = arith.mulf %440, %440 : vector<16x1xf32>
    %cst_170 = arith.constant 2.500000e-01 : f32
    %442 = vector.broadcast %cst_170 : f32 to vector<16x1xf32>
    %443 = arith.mulf %442, %441 : vector<16x1xf32>
    %cst_171 = arith.constant 9.99999974E-6 : f32
    %444 = vector.broadcast %cst_171 : f32 to vector<16x1xf32>
    %445 = arith.addf %443, %444 : vector<16x1xf32>
    %446 = math.rsqrt %445 : vector<16x1xf32>
    %447 = vector.broadcast %439 : vector<16x1xf32> to vector<16x2xf32>
    %448 = arith.subf %430, %447 : vector<16x2xf32>
    %449 = vector.broadcast %446 : vector<16x1xf32> to vector<16x2xf32>
    %450 = arith.mulf %448, %449 : vector<16x2xf32>
    %451 = vector.broadcast %432 : vector<1x2xf32> to vector<16x2xf32>
    %452 = arith.mulf %450, %451 : vector<16x2xf32>
    %453 = vector.broadcast %434 : vector<1x2xf32> to vector<16x2xf32>
    %454 = arith.addf %452, %453 : vector<16x2xf32>
    %455 = arith.truncf %454 : vector<16x2xf32> to vector<16x2xbf16>
    %c2_172 = arith.constant 2 : index
    %c0_173 = arith.constant 0 : index
    %c0_174 = arith.constant 0 : index
    %456 = vector.load %arg10[%c2_172, %c0_173, %c0_174] : memref<4x2x2048xbf16, #tpu.memory_space<vmem>>, vector<1x2x2048xbf16>
    %457 = vector.shape_cast %456 : vector<1x2x2048xbf16> to vector<2x2048xbf16>
    %cst_175 = arith.constant dense<0.000000e+00> : vector<16x2048xf32>
    %458 = tpu.matmul %455, %457, %cst_175 {dimension_numbers = #tpu.dot_dimension_numbers<[1], [0], [0], [1], [0, 0, 1, 1], [], []>} : vector<16x2xbf16>, vector<2x2048xbf16>, vector<16x2048xf32> -> vector<16x2048xf32>
    %c2_176 = arith.constant 2 : index
    %c0_177 = arith.constant 0 : index
    %c0_178 = arith.constant 0 : index
    %459 = vector.load %arg11[%c2_176, %c0_177, %c0_178] : memref<4x1x2048xf32, #tpu.memory_space<vmem>>, vector<1x1x2048xf32>
    %460 = vector.shape_cast %459 : vector<1x1x2048xf32> to vector<1x2048xf32>
    %461 = vector.broadcast %460 : vector<1x2048xf32> to vector<16x2048xf32>
    %462 = arith.addf %458, %461 : vector<16x2048xf32>
    %cst_179 = arith.constant 0.000000e+00 : f32
    %463 = vector.broadcast %cst_179 : f32 to vector<16x2048xf32>
    %464 = arith.maximumf %462, %463 : vector<16x2048xf32>
    %465 = arith.truncf %464 : vector<16x2048xf32> to vector<16x2048xbf16>
    %c2_180 = arith.constant 2 : index
    %c0_181 = arith.constant 0 : index
    %c0_182 = arith.constant 0 : index
    %466 = vector.load %arg12[%c2_180, %c0_181, %c0_182] : memref<4x2x2048xbf16, #tpu.memory_space<vmem>>, vector<1x2x2048xbf16>
    %467 = vector.shape_cast %466 : vector<1x2x2048xbf16> to vector<2x2048xbf16>
    %cst_183 = arith.constant dense<0.000000e+00> : vector<16x2xf32>
    %468 = tpu.matmul %465, %467, %cst_183 {dimension_numbers = #tpu.dot_dimension_numbers<[1], [1], [0], [0], [0, 0, 1, 0], [], []>} : vector<16x2048xbf16>, vector<2x2048xbf16>, vector<16x2xf32> -> vector<16x2xf32>
    %c2_184 = arith.constant 2 : index
    %c0_185 = arith.constant 0 : index
    %c0_186 = arith.constant 0 : index
    %469 = vector.load %arg13[%c2_184, %c0_185, %c0_186] : memref<4x1x2xf32, #tpu.memory_space<vmem>>, vector<1x1x2xf32>
    %470 = vector.shape_cast %469 : vector<1x1x2xf32> to vector<1x2xf32>
    %471 = vector.broadcast %470 : vector<1x2xf32> to vector<16x2xf32>
    %472 = arith.addf %468, %471 : vector<16x2xf32>
    %473 = arith.addf %430, %472 : vector<16x2xf32>
    %c3 = arith.constant 3 : index
    %c0_187 = arith.constant 0 : index
    %c0_188 = arith.constant 0 : index
    %474 = vector.load %arg6[%c3, %c0_187, %c0_188] : memref<4x1x2xf32, #tpu.memory_space<vmem>>, vector<1x1x2xf32>
    %475 = vector.shape_cast %474 : vector<1x1x2xf32> to vector<1x2xf32>
    %c3_189 = arith.constant 3 : index
    %c0_190 = arith.constant 0 : index
    %c0_191 = arith.constant 0 : index
    %476 = vector.load %arg7[%c3_189, %c0_190, %c0_191] : memref<4x1x2xf32, #tpu.memory_space<vmem>>, vector<1x1x2xf32>
    %477 = vector.shape_cast %476 : vector<1x1x2xf32> to vector<1x2xf32>
    %478 = vector.extract_strided_slice %473 {offsets = [0, 0], sizes = [16, 1], strides = [1, 1]} : vector<16x2xf32> to vector<16x1xf32>
    %479 = vector.extract_strided_slice %473 {offsets = [0, 1], sizes = [16, 1], strides = [1, 1]} : vector<16x2xf32> to vector<16x1xf32>
    %480 = arith.addf %478, %479 : vector<16x1xf32>
    %cst_192 = arith.constant 5.000000e-01 : f32
    %481 = vector.broadcast %cst_192 : f32 to vector<16x1xf32>
    %482 = arith.mulf %481, %480 : vector<16x1xf32>
    %483 = arith.subf %478, %479 : vector<16x1xf32>
    %484 = arith.mulf %483, %483 : vector<16x1xf32>
    %cst_193 = arith.constant 2.500000e-01 : f32
    %485 = vector.broadcast %cst_193 : f32 to vector<16x1xf32>
    %486 = arith.mulf %485, %484 : vector<16x1xf32>
    %cst_194 = arith.constant 9.99999974E-6 : f32
    %487 = vector.broadcast %cst_194 : f32 to vector<16x1xf32>
    %488 = arith.addf %486, %487 : vector<16x1xf32>
    %489 = math.rsqrt %488 : vector<16x1xf32>
    %490 = vector.broadcast %482 : vector<16x1xf32> to vector<16x2xf32>
    %491 = arith.subf %473, %490 : vector<16x2xf32>
    %492 = vector.broadcast %489 : vector<16x1xf32> to vector<16x2xf32>
    %493 = arith.mulf %491, %492 : vector<16x2xf32>
    %494 = vector.broadcast %475 : vector<1x2xf32> to vector<16x2xf32>
    %495 = arith.mulf %493, %494 : vector<16x2xf32>
    %496 = vector.broadcast %477 : vector<1x2xf32> to vector<16x2xf32>
    %497 = arith.addf %495, %496 : vector<16x2xf32>
    %c3_195 = arith.constant 3 : index
    %c0_196 = arith.constant 0 : index
    %c0_197 = arith.constant 0 : index
    %498 = vector.load %arg2[%c3_195, %c0_196, %c0_197] : memref<4x2x6xf32, #tpu.memory_space<vmem>>, vector<1x2x6xf32>
    %499 = vector.shape_cast %498 : vector<1x2x6xf32> to vector<2x6xf32>
    %cst_198 = arith.constant dense<0.000000e+00> : vector<16x6xf32>
    %500 = tpu.matmul %497, %499, %cst_198 {dimension_numbers = #tpu.dot_dimension_numbers<[1], [0], [0], [1], [0, 0, 1, 1], [], []>} : vector<16x2xf32>, vector<2x6xf32>, vector<16x6xf32> -> vector<16x6xf32>
    %c3_199 = arith.constant 3 : index
    %c0_200 = arith.constant 0 : index
    %c0_201 = arith.constant 0 : index
    %501 = vector.load %arg3[%c3_199, %c0_200, %c0_201] : memref<4x1x6xf32, #tpu.memory_space<vmem>>, vector<1x1x6xf32>
    %502 = vector.shape_cast %501 : vector<1x1x6xf32> to vector<1x6xf32>
    %503 = vector.broadcast %502 : vector<1x6xf32> to vector<16x6xf32>
    %504 = arith.addf %500, %503 : vector<16x6xf32>
    %cst_202 = arith.constant 0.000000e+00 : f32
    %505 = vector.broadcast %cst_202 : f32 to vector<16x2xf32>
    %506 = vector.extract_strided_slice %504 {offsets = [0, 0], sizes = [16, 1], strides = [1, 1]} : vector<16x6xf32> to vector<16x1xf32>
    %cst_203 = arith.constant 1.000000e+00 : f32
    %507 = vector.broadcast %cst_203 : f32 to vector<16x1xf32>
    %508 = arith.mulf %506, %507 : vector<16x1xf32>
    %509 = vector.extract_strided_slice %504 {offsets = [0, 2], sizes = [16, 1], strides = [1, 1]} : vector<16x6xf32> to vector<16x1xf32>
    %510 = vector.broadcast %509 : vector<16x1xf32> to vector<16x16xf32>
    %511 = arith.mulf %510, %4 : vector<16x16xf32>
    %cst_204 = arith.constant dense<0.000000e+00> : vector<16xf32>
    %512 = vector.multi_reduction <add>, %511, %cst_204 [0] : vector<16x16xf32> to vector<16xf32>
    %513 = vector.shape_cast %512 : vector<16xf32> to vector<1x16xf32>
    %514 = vector.extract_strided_slice %504 {offsets = [0, 4], sizes = [16, 1], strides = [1, 1]} : vector<16x6xf32> to vector<16x1xf32>
    %515 = vector.broadcast %514 : vector<16x1xf32> to vector<16x16xf32>
    %516 = arith.mulf %515, %4 : vector<16x16xf32>
    %cst_205 = arith.constant dense<0.000000e+00> : vector<16xf32>
    %517 = vector.multi_reduction <add>, %516, %cst_205 [0] : vector<16x16xf32> to vector<16xf32>
    %518 = vector.shape_cast %517 : vector<16xf32> to vector<1x16xf32>
    %519 = vector.broadcast %508 : vector<16x1xf32> to vector<16x16xf32>
    %520 = vector.broadcast %513 : vector<1x16xf32> to vector<16x16xf32>
    %521 = arith.mulf %519, %520 : vector<16x16xf32>
    %cst_206 = arith.constant dense<0xFF800000> : vector<16xf32>
    %522 = vector.multi_reduction <maximumf>, %521, %cst_206 [1] : vector<16x16xf32> to vector<16xf32>
    %523 = vector.shape_cast %522 : vector<16xf32> to vector<16x1xf32>
    %524 = vector.broadcast %523 : vector<16x1xf32> to vector<16x16xf32>
    %525 = arith.subf %521, %524 : vector<16x16xf32>
    %526 = math.exp %525 : vector<16x16xf32>
    %cst_207 = arith.constant dense<0.000000e+00> : vector<16xf32>
    %527 = vector.multi_reduction <add>, %526, %cst_207 [1] : vector<16x16xf32> to vector<16xf32>
    %528 = vector.shape_cast %527 : vector<16xf32> to vector<16x1xf32>
    %529 = vector.broadcast %518 : vector<1x16xf32> to vector<16x16xf32>
    %530 = arith.mulf %526, %529 : vector<16x16xf32>
    %cst_208 = arith.constant dense<0.000000e+00> : vector<16xf32>
    %531 = vector.multi_reduction <add>, %530, %cst_208 [1] : vector<16x16xf32> to vector<16xf32>
    %532 = vector.shape_cast %531 : vector<16xf32> to vector<16x1xf32>
    %533 = tpu.reciprocal %528 {approx = true} : vector<16x1xf32> -> vector<16x1xf32>
    %534 = arith.mulf %532, %533 : vector<16x1xf32>
    %c3_209 = arith.constant 3 : index
    %c0_210 = arith.constant 0 : index
    %c0_211 = arith.constant 0 : index
    %535 = vector.load %arg4[%c3_209, %c0_210, %c0_211] : memref<4x2x2xf32, #tpu.memory_space<vmem>>, vector<1x2x2xf32>
    %536 = vector.shape_cast %535 : vector<1x2x2xf32> to vector<2x2xf32>
    %537 = vector.extract_strided_slice %536 {offsets = [0, 0], sizes = [1, 2], strides = [1, 1]} : vector<2x2xf32> to vector<1x2xf32>
    %538 = vector.broadcast %534 : vector<16x1xf32> to vector<16x2xf32>
    %539 = vector.broadcast %537 : vector<1x2xf32> to vector<16x2xf32>
    %540 = arith.mulf %538, %539 : vector<16x2xf32>
    %541 = arith.addf %505, %540 : vector<16x2xf32>
    %542 = vector.extract_strided_slice %504 {offsets = [0, 1], sizes = [16, 1], strides = [1, 1]} : vector<16x6xf32> to vector<16x1xf32>
    %cst_212 = arith.constant 1.000000e+00 : f32
    %543 = vector.broadcast %cst_212 : f32 to vector<16x1xf32>
    %544 = arith.mulf %542, %543 : vector<16x1xf32>
    %545 = vector.extract_strided_slice %504 {offsets = [0, 3], sizes = [16, 1], strides = [1, 1]} : vector<16x6xf32> to vector<16x1xf32>
    %546 = vector.broadcast %545 : vector<16x1xf32> to vector<16x16xf32>
    %547 = arith.mulf %546, %4 : vector<16x16xf32>
    %cst_213 = arith.constant dense<0.000000e+00> : vector<16xf32>
    %548 = vector.multi_reduction <add>, %547, %cst_213 [0] : vector<16x16xf32> to vector<16xf32>
    %549 = vector.shape_cast %548 : vector<16xf32> to vector<1x16xf32>
    %550 = vector.extract_strided_slice %504 {offsets = [0, 5], sizes = [16, 1], strides = [1, 1]} : vector<16x6xf32> to vector<16x1xf32>
    %551 = vector.broadcast %550 : vector<16x1xf32> to vector<16x16xf32>
    %552 = arith.mulf %551, %4 : vector<16x16xf32>
    %cst_214 = arith.constant dense<0.000000e+00> : vector<16xf32>
    %553 = vector.multi_reduction <add>, %552, %cst_214 [0] : vector<16x16xf32> to vector<16xf32>
    %554 = vector.shape_cast %553 : vector<16xf32> to vector<1x16xf32>
    %555 = vector.broadcast %544 : vector<16x1xf32> to vector<16x16xf32>
    %556 = vector.broadcast %549 : vector<1x16xf32> to vector<16x16xf32>
    %557 = arith.mulf %555, %556 : vector<16x16xf32>
    %cst_215 = arith.constant dense<0xFF800000> : vector<16xf32>
    %558 = vector.multi_reduction <maximumf>, %557, %cst_215 [1] : vector<16x16xf32> to vector<16xf32>
    %559 = vector.shape_cast %558 : vector<16xf32> to vector<16x1xf32>
    %560 = vector.broadcast %559 : vector<16x1xf32> to vector<16x16xf32>
    %561 = arith.subf %557, %560 : vector<16x16xf32>
    %562 = math.exp %561 : vector<16x16xf32>
    %cst_216 = arith.constant dense<0.000000e+00> : vector<16xf32>
    %563 = vector.multi_reduction <add>, %562, %cst_216 [1] : vector<16x16xf32> to vector<16xf32>
    %564 = vector.shape_cast %563 : vector<16xf32> to vector<16x1xf32>
    %565 = vector.broadcast %554 : vector<1x16xf32> to vector<16x16xf32>
    %566 = arith.mulf %562, %565 : vector<16x16xf32>
    %cst_217 = arith.constant dense<0.000000e+00> : vector<16xf32>
    %567 = vector.multi_reduction <add>, %566, %cst_217 [1] : vector<16x16xf32> to vector<16xf32>
    %568 = vector.shape_cast %567 : vector<16xf32> to vector<16x1xf32>
    %569 = tpu.reciprocal %564 {approx = true} : vector<16x1xf32> -> vector<16x1xf32>
    %570 = arith.mulf %568, %569 : vector<16x1xf32>
    %c3_218 = arith.constant 3 : index
    %c0_219 = arith.constant 0 : index
    %c0_220 = arith.constant 0 : index
    %571 = vector.load %arg4[%c3_218, %c0_219, %c0_220] : memref<4x2x2xf32, #tpu.memory_space<vmem>>, vector<1x2x2xf32>
    %572 = vector.shape_cast %571 : vector<1x2x2xf32> to vector<2x2xf32>
    %573 = vector.extract_strided_slice %572 {offsets = [1, 0], sizes = [1, 2], strides = [1, 1]} : vector<2x2xf32> to vector<1x2xf32>
    %574 = vector.broadcast %570 : vector<16x1xf32> to vector<16x2xf32>
    %575 = vector.broadcast %573 : vector<1x2xf32> to vector<16x2xf32>
    %576 = arith.mulf %574, %575 : vector<16x2xf32>
    %577 = arith.addf %541, %576 : vector<16x2xf32>
    %578 = arith.addf %473, %577 : vector<16x2xf32>
    %c3_221 = arith.constant 3 : index
    %c0_222 = arith.constant 0 : index
    %c0_223 = arith.constant 0 : index
    %579 = vector.load %arg5[%c3_221, %c0_222, %c0_223] : memref<4x1x2xf32, #tpu.memory_space<vmem>>, vector<1x1x2xf32>
    %580 = vector.shape_cast %579 : vector<1x1x2xf32> to vector<1x2xf32>
    %581 = vector.broadcast %580 : vector<1x2xf32> to vector<16x2xf32>
    %582 = arith.addf %578, %581 : vector<16x2xf32>
    %c3_224 = arith.constant 3 : index
    %c0_225 = arith.constant 0 : index
    %c0_226 = arith.constant 0 : index
    %583 = vector.load %arg8[%c3_224, %c0_225, %c0_226] : memref<4x1x2xf32, #tpu.memory_space<vmem>>, vector<1x1x2xf32>
    %584 = vector.shape_cast %583 : vector<1x1x2xf32> to vector<1x2xf32>
    %c3_227 = arith.constant 3 : index
    %c0_228 = arith.constant 0 : index
    %c0_229 = arith.constant 0 : index
    %585 = vector.load %arg9[%c3_227, %c0_228, %c0_229] : memref<4x1x2xf32, #tpu.memory_space<vmem>>, vector<1x1x2xf32>
    %586 = vector.shape_cast %585 : vector<1x1x2xf32> to vector<1x2xf32>
    %587 = vector.extract_strided_slice %582 {offsets = [0, 0], sizes = [16, 1], strides = [1, 1]} : vector<16x2xf32> to vector<16x1xf32>
    %588 = vector.extract_strided_slice %582 {offsets = [0, 1], sizes = [16, 1], strides = [1, 1]} : vector<16x2xf32> to vector<16x1xf32>
    %589 = arith.addf %587, %588 : vector<16x1xf32>
    %cst_230 = arith.constant 5.000000e-01 : f32
    %590 = vector.broadcast %cst_230 : f32 to vector<16x1xf32>
    %591 = arith.mulf %590, %589 : vector<16x1xf32>
    %592 = arith.subf %587, %588 : vector<16x1xf32>
    %593 = arith.mulf %592, %592 : vector<16x1xf32>
    %cst_231 = arith.constant 2.500000e-01 : f32
    %594 = vector.broadcast %cst_231 : f32 to vector<16x1xf32>
    %595 = arith.mulf %594, %593 : vector<16x1xf32>
    %cst_232 = arith.constant 9.99999974E-6 : f32
    %596 = vector.broadcast %cst_232 : f32 to vector<16x1xf32>
    %597 = arith.addf %595, %596 : vector<16x1xf32>
    %598 = math.rsqrt %597 : vector<16x1xf32>
    %599 = vector.broadcast %591 : vector<16x1xf32> to vector<16x2xf32>
    %600 = arith.subf %582, %599 : vector<16x2xf32>
    %601 = vector.broadcast %598 : vector<16x1xf32> to vector<16x2xf32>
    %602 = arith.mulf %600, %601 : vector<16x2xf32>
    %603 = vector.broadcast %584 : vector<1x2xf32> to vector<16x2xf32>
    %604 = arith.mulf %602, %603 : vector<16x2xf32>
    %605 = vector.broadcast %586 : vector<1x2xf32> to vector<16x2xf32>
    %606 = arith.addf %604, %605 : vector<16x2xf32>
    %607 = arith.truncf %606 : vector<16x2xf32> to vector<16x2xbf16>
    %c3_233 = arith.constant 3 : index
    %c0_234 = arith.constant 0 : index
    %c0_235 = arith.constant 0 : index
    %608 = vector.load %arg10[%c3_233, %c0_234, %c0_235] : memref<4x2x2048xbf16, #tpu.memory_space<vmem>>, vector<1x2x2048xbf16>
    %609 = vector.shape_cast %608 : vector<1x2x2048xbf16> to vector<2x2048xbf16>
    %cst_236 = arith.constant dense<0.000000e+00> : vector<16x2048xf32>
    %610 = tpu.matmul %607, %609, %cst_236 {dimension_numbers = #tpu.dot_dimension_numbers<[1], [0], [0], [1], [0, 0, 1, 1], [], []>} : vector<16x2xbf16>, vector<2x2048xbf16>, vector<16x2048xf32> -> vector<16x2048xf32>
    %c3_237 = arith.constant 3 : index
    %c0_238 = arith.constant 0 : index
    %c0_239 = arith.constant 0 : index
    %611 = vector.load %arg11[%c3_237, %c0_238, %c0_239] : memref<4x1x2048xf32, #tpu.memory_space<vmem>>, vector<1x1x2048xf32>
    %612 = vector.shape_cast %611 : vector<1x1x2048xf32> to vector<1x2048xf32>
    %613 = vector.broadcast %612 : vector<1x2048xf32> to vector<16x2048xf32>
    %614 = arith.addf %610, %613 : vector<16x2048xf32>
    %cst_240 = arith.constant 0.000000e+00 : f32
    %615 = vector.broadcast %cst_240 : f32 to vector<16x2048xf32>
    %616 = arith.maximumf %614, %615 : vector<16x2048xf32>
    %617 = arith.truncf %616 : vector<16x2048xf32> to vector<16x2048xbf16>
    %c3_241 = arith.constant 3 : index
    %c0_242 = arith.constant 0 : index
    %c0_243 = arith.constant 0 : index
    %618 = vector.load %arg12[%c3_241, %c0_242, %c0_243] : memref<4x2x2048xbf16, #tpu.memory_space<vmem>>, vector<1x2x2048xbf16>
    %619 = vector.shape_cast %618 : vector<1x2x2048xbf16> to vector<2x2048xbf16>
    %cst_244 = arith.constant dense<0.000000e+00> : vector<16x2xf32>
    %620 = tpu.matmul %617, %619, %cst_244 {dimension_numbers = #tpu.dot_dimension_numbers<[1], [1], [0], [0], [0, 0, 1, 0], [], []>} : vector<16x2048xbf16>, vector<2x2048xbf16>, vector<16x2xf32> -> vector<16x2xf32>
    %c3_245 = arith.constant 3 : index
    %c0_246 = arith.constant 0 : index
    %c0_247 = arith.constant 0 : index
    %621 = vector.load %arg13[%c3_245, %c0_246, %c0_247] : memref<4x1x2xf32, #tpu.memory_space<vmem>>, vector<1x1x2xf32>
    %622 = vector.shape_cast %621 : vector<1x1x2xf32> to vector<1x2xf32>
    %623 = vector.broadcast %622 : vector<1x2xf32> to vector<16x2xf32>
    %624 = arith.addf %620, %623 : vector<16x2xf32>
    %625 = arith.addf %582, %624 : vector<16x2xf32>
    %cst_248 = arith.constant dense<0.000000e+00> : vector<2xf32>
    %626 = vector.multi_reduction <add>, %625, %cst_248 [0] : vector<16x2xf32> to vector<2xf32>
    %627 = vector.shape_cast %626 : vector<2xf32> to vector<1x2xf32>
    %cst_249 = arith.constant 1.600000e+01 : f32
    %628 = vector.broadcast %cst_249 : f32 to vector<1x2xf32>
    %629 = arith.divf %627, %628 : vector<1x2xf32>
    %c0_250 = arith.constant 0 : index
    %c0_251 = arith.constant 0 : index
    %630 = vector.load %arg14[%c0_250, %c0_251] : memref<1x2xf32, #tpu.memory_space<vmem>>, vector<1x2xf32>
    %631 = arith.mulf %629, %630 : vector<1x2xf32>
    %cst_252 = arith.constant dense<0.000000e+00> : vector<1xf32>
    %632 = vector.multi_reduction <add>, %631, %cst_252 [1] : vector<1x2xf32> to vector<1xf32>
    %633 = vector.shape_cast %632 : vector<1xf32> to vector<1x1xf32>
    %c0_253 = arith.constant 0 : index
    %c0_254 = arith.constant 0 : index
    %634 = vector.load %arg15[%c0_253, %c0_254] : memref<1x1xf32, #tpu.memory_space<vmem>>, vector<1x1xf32>
    %635 = arith.addf %633, %634 : vector<1x1xf32>
    %c0_255 = arith.constant 0 : index
    %c0_256 = arith.constant 0 : index
    %c0_257 = arith.constant 0 : index
    %636 = vector.load %arg16[%c0_255, %c0_256, %c0_257] : memref<1x1x1xf32, #tpu.memory_space<vmem>>, vector<1x1x1xf32>
    %637 = vector.shape_cast %636 : vector<1x1x1xf32> to vector<1x1xf32>
    %638 = vector.shape_cast %635 : vector<1x1xf32> to vector<1x1x1xf32>
    tpu.vector_store %arg16[%c0_255, %c0_256, %c0_257], %638 {strides = array<i32>} : memref<1x1x1xf32, #tpu.memory_space<vmem>>, vector<1x1x1xf32>,
    return
  }
  func.func @transform_0(%arg0: i32) -> (i32, i32, i32) {
    %c0_i32 = arith.constant 0 : i32
    %c0_i32_0 = arith.constant 0 : i32
    %c0_i32_1 = arith.constant 0 : i32
    return %arg0, %c0_i32, %c0_i32_0 : i32, i32, i32
  }
  func.func @transform_1(%arg0: i32) -> (i32, i32, i32) {
    %c0_i32 = arith.constant 0 : i32
    %c0_i32_0 = arith.constant 0 : i32
    %c0_i32_1 = arith.constant 0 : i32
    %c0_i32_2 = arith.constant 0 : i32
    return %c0_i32, %c0_i32_0, %c0_i32_1 : i32, i32, i32
  }
  func.func @transform_2(%arg0: i32) -> (i32, i32, i32) {
    %c0_i32 = arith.constant 0 : i32
    %c0_i32_0 = arith.constant 0 : i32
    %c0_i32_1 = arith.constant 0 : i32
    %c0_i32_2 = arith.constant 0 : i32
    return %c0_i32, %c0_i32_0, %c0_i32_1 : i32, i32, i32
  }
  func.func @transform_3(%arg0: i32) -> (i32, i32, i32) {
    %c0_i32 = arith.constant 0 : i32
    %c0_i32_0 = arith.constant 0 : i32
    %c0_i32_1 = arith.constant 0 : i32
    %c0_i32_2 = arith.constant 0 : i32
    return %c0_i32, %c0_i32_0, %c0_i32_1 : i32, i32, i32
  }
  func.func @transform_4(%arg0: i32) -> (i32, i32, i32) {
    %c0_i32 = arith.constant 0 : i32
    %c0_i32_0 = arith.constant 0 : i32
    %c0_i32_1 = arith.constant 0 : i32
    %c0_i32_2 = arith.constant 0 : i32
    return %c0_i32, %c0_i32_0, %c0_i32_1 : i32, i32, i32
  }
  func.func @transform_5(%arg0: i32) -> (i32, i32, i32) {
    %c0_i32 = arith.constant 0 : i32
    %c0_i32_0 = arith.constant 0 : i32
    %c0_i32_1 = arith.constant 0 : i32
    %c0_i32_2 = arith.constant 0 : i32
    return %c0_i32, %c0_i32_0, %c0_i32_1 : i32, i32, i32
  }
  func.func @transform_6(%arg0: i32) -> (i32, i32, i32) {
    %c0_i32 = arith.constant 0 : i32
    %c0_i32_0 = arith.constant 0 : i32
    %c0_i32_1 = arith.constant 0 : i32
    %c0_i32_2 = arith.constant 0 : i32
    return %c0_i32, %c0_i32_0, %c0_i32_1 : i32, i32, i32
  }
  func.func @transform_7(%arg0: i32) -> (i32, i32, i32) {
    %c0_i32 = arith.constant 0 : i32
    %c0_i32_0 = arith.constant 0 : i32
    %c0_i32_1 = arith.constant 0 : i32
    %c0_i32_2 = arith.constant 0 : i32
    return %c0_i32, %c0_i32_0, %c0_i32_1 : i32, i32, i32
  }
  func.func @transform_8(%arg0: i32) -> (i32, i32, i32) {
    %c0_i32 = arith.constant 0 : i32
    %c0_i32_0 = arith.constant 0 : i32
    %c0_i32_1 = arith.constant 0 : i32
    %c0_i32_2 = arith.constant 0 : i32
    return %c0_i32, %c0_i32_0, %c0_i32_1 : i32, i32, i32
  }
  func.func @transform_9(%arg0: i32) -> (i32, i32, i32) {
    %c0_i32 = arith.constant 0 : i32
    %c0_i32_0 = arith.constant 0 : i32
    %c0_i32_1 = arith.constant 0 : i32
    %c0_i32_2 = arith.constant 0 : i32
    return %c0_i32, %c0_i32_0, %c0_i32_1 : i32, i32, i32
  }
  func.func @transform_10(%arg0: i32) -> (i32, i32, i32) {
    %c0_i32 = arith.constant 0 : i32
    %c0_i32_0 = arith.constant 0 : i32
    %c0_i32_1 = arith.constant 0 : i32
    %c0_i32_2 = arith.constant 0 : i32
    return %c0_i32, %c0_i32_0, %c0_i32_1 : i32, i32, i32
  }
  func.func @transform_11(%arg0: i32) -> (i32, i32, i32) {
    %c0_i32 = arith.constant 0 : i32
    %c0_i32_0 = arith.constant 0 : i32
    %c0_i32_1 = arith.constant 0 : i32
    %c0_i32_2 = arith.constant 0 : i32
    return %c0_i32, %c0_i32_0, %c0_i32_1 : i32, i32, i32
  }
  func.func @transform_12(%arg0: i32) -> (i32, i32, i32) {
    %c0_i32 = arith.constant 0 : i32
    %c0_i32_0 = arith.constant 0 : i32
    %c0_i32_1 = arith.constant 0 : i32
    %c0_i32_2 = arith.constant 0 : i32
    return %c0_i32, %c0_i32_0, %c0_i32_1 : i32, i32, i32
  }
  func.func @transform_13(%arg0: i32) -> (i32, i32) {
    %c0_i32 = arith.constant 0 : i32
    %c0_i32_0 = arith.constant 0 : i32
    %c0_i32_1 = arith.constant 0 : i32
    return %c0_i32, %c0_i32_0 : i32, i32
  }
  func.func @transform_14(%arg0: i32) -> (i32, i32) {
    %c0_i32 = arith.constant 0 : i32
    %c0_i32_0 = arith.constant 0 : i32
    %c0_i32_1 = arith.constant 0 : i32
    return %c0_i32, %c0_i32_0 : i32, i32
  }
  func.func @transform_15(%arg0: i32) -> (i32, i32, i32) {
    %c0_i32 = arith.constant 0 : i32
    %c0_i32_0 = arith.constant 0 : i32
    %c0_i32_1 = arith.constant 0 : i32
    return %arg0, %c0_i32, %c0_i32_0 : i32, i32, i32
  }
}

</mosaic_0001>

<bundles_post_ra>
// kernel: tpu_custom_call.1
= control target key start
LH: loop header
LB: loop body
LE: loop exit
PB: predicated region body
PF: predicated region fallthrough
CT: control target
= control target key end

     0   :  { %s8220_s0 = inlined_call_operand.vmem [shape: f32[2,2,16], index: 0, kind: input, shape index: {}]   ;;  %s8221_s1 = inlined_call_operand.vmem [shape: f32[4,2,6], index: 1, kind: input, shape index: {}]   ;;  %s8222_s2 = inlined_call_operand.vmem [shape: f32[4,1,6], index: 2, kind: input, shape index: {}]   ;;  %s8223_s3 = inlined_call_operand.vmem [shape: f32[4,2,2], index: 3, kind: input, shape index: {}]   ;;  %s8224_s4 = inlined_call_operand.vmem [shape: f32[4,1,2], index: 4, kind: input, shape index: {}]   ;;  %s8225_s5 = inlined_call_operand.vmem [shape: f32[4,1,2], index: 5, kind: input, shape index: {}]   ;;  %s8226_s6 = inlined_call_operand.vmem [shape: f32[4,1,2], index: 6, kind: input, shape index: {}]   ;;  %s8227_s7 = inlined_call_operand.vmem [shape: f32[4,1,2], index: 7, kind: input, shape index: {}]   ;;  %s8228_s8 = inlined_call_operand.vmem [shape: f32[4,1,2], index: 8, kind: input, shape index: {}]   ;;  %s8229_s9 = inlined_call_operand.vmem [shape: bf16[4,2,2048], index: 9, kind: input, shape index: {}]   ;;  %s8230_s10 = inlined_call_operand.hbm [shape: f32[4,1,2048], index: 10, kind: input, shape index: {}]   ;;  %s8231_s11 = inlined_call_operand.hbm [shape: bf16[4,2,2048], index: 11, kind: input, shape index: {}]   ;;  %s8232_s12 = inlined_call_operand.vmem [shape: f32[4,1,2], index: 12, kind: input, shape index: {}]   ;;  %s8233_s13 = inlined_call_operand.vmem [shape: f32[1,2], index: 13, kind: input, shape index: {}]   ;;  %s8234_s14 = inlined_call_operand.<no memory space> [shape: f32[1,1], index: 14, kind: input, shape index: {}]   ;;  %s8235_s15 = inlined_call_operand.vmem [shape: f32[2,1,1], index: 15, kind: output, shape index: {}]  }
   0x1   :  { %v20_v0 = vstv %s8234_s14 }
   0x2   :  { %21 = vst [vmem:[#allocation2] sm:$0x1] %v20_v0 }
   0x3   :  { %22 = vsyncpa [#allocation4], 0 }
   0x4   :  { %23 = vsyncpa [#allocation6], 0  ;;  %s7209_s20 = smov 0  }
   0x5 LB: > { %8239 = sst [smem:[#allocation9_spill]] %s7111_s20  ;;  %s7215_s21 = sadd.s32 4294967295, %s7111_s20   ;;  %s7111_s20 = sphi %s7209_s20, %s29_s20  }
   0x6   : > { %p6656_p0 = scmp.ge.s32.totalorder %s7111_s20, 1  ;;  %p380_p1 = scmp.lt.s32.totalorder %s7111_s20, 3 }
   0x7   : > { %s7113_s14 = smov [#allocation3]   ;;  %p8236_p3 = scmp.eq.s32.totalorder %s7215_s21, 0 }
   0x8   : > { %s419_s22 = sshll.u32 %s7113_s14, 4  ;;  %p7219_p2 = pnand %p6656_p0, %p380_p1  ;;  %s420_s22 = int_to_ptr.vmem [resolvable:$true] %s419_s22 }
   0x9   : > { %s7114_s24 = smov [#allocation5]   ;;  %s7041_s29 = scalar_lea.hbm %s8230_s10, 1024 }
   0xa   : > { %s8240_s23 = scalar_select %p7219_p2, 1, 0 }
   0xb   : > { %p6845_p4 = pneg %p7219_p2  ;;  %s432_s25 = sshll.u32 %s7114_s24, 4  ;;  %s7232_s25 = int_to_ptr.vmem [resolvable:$true] %s432_s25 }
   0xc   : > { %p7042_p6 = scmp.ne.s32.totalorder %s8230_s10, %s7041_s29  ;;  %p7048_p10 = scmp.lt.u32.totalorder %s7041_s29, %s8230_s10 }
   0xd   : > { %p7228_p5 = pnand %p8236_p3, %p6845_p4 }
   0xf   : > { %p7043_p7 = pneg %p7228_p5 }
  0x11   : > { %p7044_p8 = pnand %p7043_p7, %p7042_p6 }
  0x13   : > { %p7045_p9 = pneg %p7044_p8 }
  0x15   : > { %p7050_p11 = pnand %p7048_p10, %p7045_p9 }
  0x17   : > { %7053 = shalt.err (!%p7050_p11)
}
  0x18   : > { %s7054_s19 = scalar_lea.vmem %s420_s22, 1024  ;;  %p7062_p1 = scmp.lt.s32.totalorder %s420_s22, %s420_s22 }
  0x19   : > { %p7055_p12 = scmp.ne.s32.totalorder %s420_s22, %s7054_s19  ;;  %p7063_p4 = scmp.lt.s32.totalorder %s7054_s19, %s7054_s19 }
  0x1b   : > { %p7057_p13 = pnand %p7055_p12, %p7043_p7  ;;  %p7064_p3 = por %p7063_p4, %p7062_p1 }
  0x1d   : > { %p7058_p0 = pneg %p7057_p13 }
  0x1f   : > { %p7065_p2 = pnand %p7064_p3, %p7058_p0 }
  0x21   : > { %7068 = shalt.err (!%p7065_p2)
}
  0x22   : > { %s7115_s14 = smov 256   ;;  %s7116_s24 = smov 16  }
  0x23   : > { %6848 = dma.hbm_to_vmem [thread:$0]  (!%p7228_p5), %s8230_s10, 1024, %s420_s22, [#allocation4], %s7115_s14, %s7115_s14, %s7116_s24  }
  0x24   : > { %s7069_s16 = scalar_lea.hbm %s8231_s11, 1024 }
  0x25   : > { %p7070_p6 = scmp.ne.s32.totalorder %s8231_s11, %s7069_s16  ;;  %p7076_p8 = scmp.lt.u32.totalorder %s7069_s16, %s8231_s11 }
  0x27   : > { %p7072_p2 = pnand %p7070_p6, %p7043_p7 }
  0x29   : > { %p7073_p3 = pneg %p7072_p2 }
  0x2b   : > { %p7078_p9 = pnand %p7076_p8, %p7073_p3 }
  0x2d   : > { %7081 = shalt.err (!%p7078_p9)
}
  0x2e   : > { %s7082_s22 = scalar_lea.vmem %s7232_s25, 1024  ;;  %p7090_p13 = scmp.lt.s32.totalorder %s7232_s25, %s7232_s25 }
  0x2f   : > { %p7083_p10 = scmp.ne.s32.totalorder %s7232_s25, %s7082_s22  ;;  %p7091_p0 = scmp.lt.s32.totalorder %s7082_s22, %s7082_s22 }
  0x31   : > { %p7085_p11 = pnand %p7083_p10, %p7043_p7  ;;  %p7092_p1 = por %p7091_p0, %p7090_p13 }
  0x33   : > { %p7086_p12 = pneg %p7085_p11 }
  0x35   : > { %p7093_p4 = pnand %p7092_p1, %p7086_p12 }
  0x37   : > { %7096 = shalt.err (!%p7093_p4)
}
  0x38   : > { %6851 = dma.hbm_to_vmem [thread:$0]  (!%p7228_p5), %s8231_s11, 1024, %s7232_s25, [#allocation6], %s7115_s14, %s7115_s14, %s7116_s24  }
  0x39   : > { %p8242_p6 = scmp.ne.s32.totalorder %s8240_s23, 0 }
  0x3a   : > { %p8243_p2 = scmp.eq.s32.totalorder (!%p8242_p6), %s7215_s21, 0 }
  0x3b   : > { %464 = sbr.rel (%p8242_p6) target bundleno = 7311 (0x1c8f), region = 80 }
  0x42   : > { %7102 = dma.done.wait (%p8243_p2), [#allocation4], 1024   ;;  %p8244_p7 = pmov %p8243_p2 }
  0x43   : > { %p8245_p3 = pmov %p8243_p2 }
  0x44   : > { %7104 = vsyncadd (%p8244_p7), [#allocation4], 4294966272 }
  0x45   : > { %7106 = dma.done.wait (%p8245_p3), [#allocation6], 1024   ;;  %p8246_p8 = pmov %p8243_p2 }
  0x46   : > { %p513_p9 = scmp.lt.s32.totalorder %s7215_s21, 1  ;;  %v521_v1 = vlaneseq  ;;  %v7117_v7 = vmov 0.0   ;;  %vm539_vm2 = vcmask 130048   ;;  %v7118_v21 = vmov 0   ;;  %s7119_s24 = smov 127  }
  0x47   : > { %7108 = vsyncadd (%p8246_p8), [#allocation6], 4294966272  ;;  %6877 = vset.pattern.permute.xlu1 %v7118_v21  ;;  %6878 = vset.pattern.permute.xlu0 %v7118_v21  ;;  %vm558_vm3 = vcmask 7168   ;;  %v625_v44 = vld [vmem:[%s8221_s1] sm:$0x3]  ;;  %vm640_vm4 = vcmask 1041408  }
  0x48   : > { %s8249_s21 = smov (!%p513_p9, %s7215_s21), 1  ;;  %v7295_v2 = vshrl.u32 %v521_v1, 7  ;;  %v525_v3 = vand.u32 127, %v521_v1  ;;  %1240 = vmatprep.mubr.bf16.mxu1 %v7118_v21  ;;  %6817 = vmatprep.subr.msk.mxu0 %vm640_vm4, %v625_v44  ;;  %v6666_v49 = vld [vmem:[%s8225_s5] ss:$0 sm:$0xff]  ;;  %vm633_vm5 = vcmask 15360  }
  0x49   : > { %s6663_s23 = sshll.u32 %s8249_s21, 1  ;;  %6818 = vmatpush3.msk.msra.mxu0 %vm640_vm4, %v625_v44  ;;  %v6667_v54 = vld [vmem:[%s8226_s6] ss:$0 sm:$0xff]  ;;  %v7120_v59 = vmov 3   ;;  %v7121_v60 = vmov 2   ;;  %vm1159_vm6 = vcmask 1040384   ;;  %s519_s22 = scalar_lea.vmem %s8235_s15, %s8249_s21 }
  0x4a   : > { %v523_v4 = vadd.s32 8, %v7295_v2  ;;  %v7300_v5 = vsub.s32 0, %v7295_v2  ;;  %vm526_vm0 = vcmp.eq.s32.totalorder %v7295_v2, %v525_v3  ;;  %s516_s14 = scalar_lea.vmem %s8220_s0, %s6663_s23  ;;  %v7307_v6 = vsub.s32 1, %v7295_v2  ;;  %v6668_v61 = vld [vmem:[%s8222_s2] ss:$0 sm:$0xff] }
  0x4b   : > { %v532_v9 = vld [vmem:[%s516_s14] sm:$0x3]  ;;  %v7311_v10 = vsel %vm526_vm0, 1.0, %v7117_v7  ;;  %vm6577_vm7 = vcmask 8192   ;;  %vm6583_vm8 = vcmask 0  }
  0x4c   : > { %vm527_vm1 = vcmp.eq.s32.totalorder %v523_v4, %v525_v3  ;;  %v536_v11 = vrot.slane %v532_v9, %v7300_v5  ;;  %v549_v12 = vrot.slane %v532_v9, %v7307_v6  ;;  %v7122_v3 = vmov 1  }
  0x4d   : > { %v7309_v8 = vsel %vm527_vm1, 1.0, %v7117_v7  ;;  %v7123_v4 = vmov 4  }
  0x4e   : > { %v538_v13 = vmul.f32 %v7309_v8, %v536_v11  ;;  %v537_v14 = vmul.f32 %v7311_v10, %v536_v11  ;;  %v551_v15 = vmul.f32 %v7309_v8, %v549_v12  ;;  %v550_v16 = vmul.f32 %v7311_v10, %v549_v12 }
  0x50   : > { %v543_v17 = vsel %vm539_vm2, %v538_v13, 0.0  ;;  %v540_v18 = vsel %vm539_vm2, %v537_v14, 0.0  ;;  %v555_v19 = vsel %vm539_vm2, %v551_v15, 0.0  ;;  %v552_v20 = vsel %vm539_vm2, %v550_v16, 0.0 }
  0x51   : > { %544 = vadd.xlane.f32.xlu1 %v543_v17  ;;  %541 = vadd.xlane.f32.xlu0 %v540_v18 }
  0x55   : > { %556 = vadd.xlane.f32.xlu1 %v555_v19  ;;  %553 = vadd.xlane.f32.xlu0 %v552_v20 }
  0xde   : > { %v545_v22 = vpop.xlane.xlu1 %544  ;;  %v542_v23 = vpop.xlane.xlu0 %541 }
  0xe2   : > { %v557_v24 = vpop.xlane.xlu1 %556  ;;  %v554_v25 = vpop.xlane.xlu0 %553 }
  0xe3   : > { %v7326_v26 = vsel %vm558_vm3, %v545_v22, %v557_v24  ;;  %v7328_v27 = vsel %vm558_vm3, %v542_v23, %v554_v25 }
  0xe4   : > { %567 = vrot.lane.b32.xlu1 %v7326_v26, %s7119_s24  ;;  %565 = vrot.lane.b32.xlu0 %v7328_v27, %s7119_s24 }
 0x156   : > { %v568_v28 = vpop.permute.xlu1 %567  ;;  %v566_v29 = vpop.permute.xlu0 %565 }
 0x157   : > { %v576_v30 = vsub.f32 %v7326_v26, %v568_v28  ;;  %v571_v31 = vadd.f32 %v566_v29, %v7328_v27  ;;  %v575_v32 = vsub.f32 %v7328_v27, %v566_v29  ;;  %v572_v33 = vadd.f32 %v568_v28, %v7326_v26 }
 0x159   : > { %v578_v34 = vmul.f32 %v576_v30, %v576_v30  ;;  %v577_v35 = vmul.f32 %v575_v32, %v575_v32  ;;  %v573_v36 = vmul.f32 0.5, %v571_v31  ;;  %v574_v41 = vmul.f32 0.5, %v572_v33 }
 0x15b   : > { %v580_v37 = vmul.f32 0.25, %v578_v34  ;;  %v579_v38 = vmul.f32 0.25, %v577_v35  ;;  %587 = vperm.xlu1 %6877, %v573_v36  }
 0x15d   : > { %v582_v39 = vadd.f32 1e-05, %v580_v37  ;;  %v581_v40 = vadd.f32 1e-05, %v579_v38 }
 0x15f   : > { %6945 = vrsqrt.f32 %v582_v39  ;;  %592 = vperm.xlu1 %6877, %v574_v41  }
 0x160   : > { %6947 = vrsqrt.f32 %v581_v40 }
 0x169   : > { %v6946_v42 = vpop.eup %6945 }
 0x16a   : > { %v6948_v43 = vpop.eup %6947  ;;  %604 = vperm.xlu1 %6877, %v6946_v42  }
 0x16b   : > { %599 = vperm.xlu0 %6878, %v6948_v43  }
 0x16e   : > { %6880 = vset.pattern.permute.xlu1 %v7120_v59 }
 0x16f   : > { %6879 = vset.pattern.permute.xlu0 %v7121_v60 }
 0x1da   : > { %v588_v45 = vpop.permute.xlu1 %587 }
 0x1db   : > { %v595_v48 = vsub.f32 %v7328_v27, %v588_v45 }
 0x1de   : > { %v593_v46 = vpop.permute.xlu1 %592 }
 0x1df   : > { %v596_v47 = vsub.f32 %v7326_v26, %v593_v46 }
 0x1e9   : > { %v605_v50 = vpop.permute.xlu1 %604 }
 0x1ea   : > { %v608_v51 = vmul.f32 %v605_v50, %v596_v47  ;;  %v600_v52 = vpop.permute.xlu0 %599  ;;  %v7124_v47 = vmov 5  }
 0x1eb   : > { %v607_v53 = vmul.f32 %v600_v52, %v595_v48 }
 0x1ec   : > { %v616_v55 = vmul.f32 %v6666_v49, %v608_v51 }
 0x1ed   : > { %v615_v56 = vmul.f32 %v6666_v49, %v607_v53 }
 0x1ee   : > { %v624_v57 = vadd.f32 %v6667_v54, %v616_v55 }
 0x1ef   : > { %v623_v58 = vadd.f32 %v6667_v54, %v615_v56 }
 0x1f1   : > { %6819 = vmatprep.mubr.msk.f32.mxu0 %vm633_vm5, %v623_v58 }
 0x1f2   : > { %6820 = vmatmul.mubr.msk.f32.vlgmr.msra.gmra.mrb[0].mxu0 %vm633_vm5, %v624_v57 }
 0x1f3   : > { %1283 = vmatprep.mubr.bf16.mxu0 %v7118_v21 }
 0x2c5   : > { %v6821_v62 = vpop.f32.mrb[0].mxu0 }
 0x2c6   : > { %v7359_v63 = vadd.f32 %v6821_v62, %v6668_v61  ;;  %v710_v0 = vpop.f32.mrb[1].mxu0 }
 0x2c7   : > { %v711_v1 = vadd.f32 %v6668_v61, %v710_v0 }
 0x2c8   : > { %813 = vperm.xlu1 %6880, %v7359_v63   ;;  %726 = vperm.xlu0 %6879, %v7359_v63  }
 0x2cc   : > { %6881 = vset.pattern.permute.xlu1 %v7118_v21  ;;  %6884 = vset.pattern.permute.xlu0 %v7118_v21 }
 0x2cd   : > { %764 = vperm.xlu1 %6881, %v7359_v63   ;;  %760 = vperm.xlu0 %6884, %v711_v1  }
 0x2d1   : > { %6882 = vset.pattern.permute.xlu1 %v7121_v60  ;;  %6885 = vset.pattern.permute.xlu0 %v7122_v3 }
 0x2d2   : > { %851 = vperm.xlu0 %6885, %v7359_v63   ;;  %721 = vperm.xlu1 %6882, %v711_v1  }
 0x2d6   : > { %6883 = vset.pattern.permute.xlu1 %v7120_v59  ;;  %6887 = vset.pattern.permute.xlu0 %v7123_v4 }
 0x2d7   : > { %809 = vperm.xlu1 %6883, %v711_v1  }
 0x2db   : > { %6886 = vset.pattern.permute.xlu1 %v7122_v3 }
 0x2dc   : > { %847 = vperm.xlu1 %6886, %v711_v1  }
 0x2e0   : > { %6888 = vset.pattern.permute.xlu1 %v7123_v4 }
 0x347   : > { %v814_v7 = vpop.permute.xlu1 %813  ;;  %v727_v11 = vpop.permute.xlu0 %726 }
 0x348   : > { %v730_v12 = vmul.f32 %v7309_v8, %v727_v11  ;;  %v817_v17 = vmul.f32 %v7309_v8, %v814_v7 }
 0x34a   : > { %v732_v15 = vsel %vm539_vm2, %v730_v12, 0.0  ;;  %v819_v23 = vsel %vm539_vm2, %v817_v17, 0.0 }
 0x34c   : > { %v765_v9 = vpop.permute.xlu1 %764  ;;  %v761_v36 = vpop.permute.xlu0 %760 }
 0x351   : > { %v722_v13 = vpop.permute.xlu1 %721  ;;  %v852_v48 = vpop.permute.xlu0 %851 }
 0x352   : > { %v729_v14 = vmul.f32 %v7311_v10, %v722_v13 }
 0x354   : > { %v731_v16 = vsel %vm539_vm2, %v729_v14, 0.0 }
 0x355   : > { %v733_v18 = vadd.f32 %v732_v15, %v731_v16 }
 0x356   : > { %v810_v19 = vpop.permute.xlu1 %809 }
 0x357   : > { %v734_v20 = vrot.slane %v733_v18, 4  ;;  %v816_v22 = vmul.f32 %v7311_v10, %v810_v19 }
 0x359   : > { %v735_v24 = vadd.f32 %v734_v20, %v733_v18  ;;  %v818_v25 = vsel %vm539_vm2, %v816_v22, 0.0 }
 0x35a   : > { %v820_v28 = vadd.f32 %v819_v23, %v818_v25 }
 0x35b   : > { %v736_v29 = vrot.slane %v735_v24, 2  ;;  %v848_v44 = vpop.permute.xlu1 %847 }
 0x35c   : > { %v821_v30 = vrot.slane %v820_v28, 4 }
 0x35d   : > { %v737_v31 = vadd.f32 %v736_v29, %v735_v24 }
 0x35e   : > { %v822_v32 = vadd.f32 %v821_v30, %v820_v28 }
 0x35f   : > { %v738_v33 = vrot.slane %v737_v31, 1 }
 0x360   : > { %v823_v34 = vrot.slane %v822_v32, 2 }
 0x361   : > { %v739_v35 = vadd.f32 %v738_v33, %v737_v31 }
 0x362   : > { %v824_v37 = vadd.f32 %v823_v34, %v822_v32 }
 0x363   : > { %v768_v38 = vmul.f32 %v765_v9, %v739_v35  ;;  %v767_v39 = vmul.f32 %v761_v36, %v739_v35 }
 0x364   : > { %v825_v40 = vrot.slane %v824_v37, 1 }
 0x365   : > { %v772_v41 = vsel %vm539_vm2, %v768_v38, -inf  ;;  %v769_v42 = vsel %vm539_vm2, %v767_v39, -inf }
 0x366   : > { %v826_v43 = vadd.f32 %v825_v40, %v824_v37  ;;  %773 = vmax.xlane.f32.xlu0 %v772_v41  ;;  %770 = vmax.xlane.f32.xlu1 %v769_v42 }
 0x368   : > { %v854_v45 = vmul.f32 %v848_v44, %v826_v43  ;;  %v855_v49 = vmul.f32 %v852_v48, %v826_v43 }
 0x36a   : > { %v856_v46 = vsel %vm539_vm2, %v854_v45, -inf  ;;  %v859_v50 = vsel %vm539_vm2, %v855_v49, -inf }
 0x36b   : > { %857 = vmax.xlane.f32.xlu0 %v856_v46 }
 0x377   : > { %745 = vperm.xlu1 %6888, %v7359_v63  }
 0x37b   : > { %6889 = vset.pattern.permute.xlu1 %v7124_v47 }
 0x37c   : > { %828 = vperm.xlu1 %6889, %v711_v1  }
 0x381   : > { %741 = vperm.xlu0 %6887, %v711_v1  }
 0x385   : > { %6891 = vset.pattern.permute.xlu0 %v7118_v21 }
 0x3a0   : > { %860 = vmax.xlane.f32.xlu1 %v859_v50 }
 0x3b1   : > { %832 = vperm.xlu1 %6889, %v7359_v63  }
 0x3b5   : > { %6890 = vset.pattern.permute.xlu1 %v7118_v21 }
 0x3f3   : > { %v774_v51 = vpop.xlane.xlu0 %773  ;;  %v771_v52 = vpop.xlane.xlu1 %770 }
 0x3f4   : > { %v776_v53 = vsub.f32 %v768_v38, %v774_v51  ;;  %v775_v54 = vsub.f32 %v767_v39, %v771_v52 }
 0x3f6   : > { %v779_v55 = vmul.f32 1.442695, %v776_v53  ;;  %v777_v56 = vmul.f32 1.442695, %v775_v54 }
 0x3f7   : > { %v746_v12 = vpop.permute.xlu1 %745 }
 0x3f8   : > { %6949 = vpow2.f32 %v779_v55  ;;  %v858_v57 = vpop.xlane.xlu0 %857  ;;  %v749_v14 = vmul.f32 %v7309_v8, %v746_v12 }
 0x3f9   : > { %6951 = vpow2.f32 %v777_v56  ;;  %v862_v58 = vsub.f32 %v854_v45, %v858_v57 }
 0x3fa   : > { %v751_v16 = vsel %vm539_vm2, %v749_v14, 0.0 }
 0x3fb   : > { %v864_v61 = vmul.f32 1.442695, %v862_v58  ;;  %v829_v19 = vpop.permute.xlu1 %828  ;;  %v799_v58 = vld [vmem:[%s8223_s3] sm:$0x3] }
 0x3fc   : > { %v835_v25 = vmul.f32 %v7311_v10, %v829_v19 }
 0x3fd   : > { %6953 = vpow2.f32 %v864_v61 }
 0x3fe   : > { %v837_v32 = vsel %vm539_vm2, %v835_v25, 0.0 }
 0x400   : > { %v742_v11 = vpop.permute.xlu0 %741 }
 0x401   : > { %v748_v13 = vmul.f32 %v7311_v10, %v742_v11 }
 0x402   : > { %v6950_v62 = vpop.eup %6949 }
 0x403   : > { %v6952_v0 = vpop.eup %6951  ;;  %v784_v1 = vsel %vm539_vm2, %v6950_v62, 0.0  ;;  %v750_v15 = vsel %vm539_vm2, %v748_v13, 0.0 }
 0x404   : > { %785 = vadd.xlane.f32.xlu0 %v784_v1  ;;  %v781_v63 = vsel %vm539_vm2, %v6952_v0, 0.0  ;;  %v752_v17 = vadd.f32 %v751_v16, %v750_v15 }
 0x405   : > { %782 = vadd.xlane.f32.xlu1 %v781_v63  ;;  %v889_v63 = vrot.slane %v799_v58, %v7307_v6 }
 0x406   : > { %v753_v18 = vrot.slane %v752_v17, 4 }
 0x407   : > { %v6954_v7 = vpop.eup %6953 }
 0x408   : > { %v868_v9 = vsel %vm539_vm2, %v6954_v7, 0.0  ;;  %v754_v20 = vadd.f32 %v753_v18, %v752_v17 }
 0x409   : > { %869 = vadd.xlane.f32.xlu1 %v868_v9 }
 0x40a   : > { %v755_v22 = vrot.slane %v754_v20, 2 }
 0x40c   : > { %v756_v30 = vadd.f32 %v755_v22, %v754_v20  ;;  %v6672_v22 = vld [vmem:[%s8224_s4] ss:$0 sm:$0xff] }
 0x40e   : > { %v757_v35 = vrot.slane %v756_v30, 1 }
 0x410   : > { %v758_v38 = vadd.f32 %v757_v35, %v756_v30 }
 0x412   : > { %v787_v42 = vmul.f32 %v6952_v0, %v758_v38  ;;  %v788_v46 = vmul.f32 %v6950_v62, %v758_v38  ;;  %v803_v0 = vrot.slane %v799_v58, %v7300_v5 }
 0x414   : > { %v789_v45 = vsel %vm539_vm2, %v787_v42, 0.0  ;;  %v792_v50 = vsel %vm539_vm2, %v788_v46, 0.0  ;;  %v7125_v42 = vmov 1966171168  }
 0x42d   : > { %v861_v23 = vpop.xlane.xlu1 %860 }
 0x42e   : > { %v863_v24 = vsub.f32 %v855_v49, %v861_v23 }
 0x430   : > { %v866_v28 = vmul.f32 1.442695, %v863_v24 }
 0x431   : > { %v833_v29 = vpop.permute.xlu1 %832 }
 0x432   : > { %6955 = vpow2.f32 %v866_v28  ;;  %v836_v31 = vmul.f32 %v7309_v8, %v833_v29 }
 0x434   : > { %v838_v33 = vsel %vm539_vm2, %v836_v31, 0.0 }
 0x435   : > { %v839_v34 = vadd.f32 %v838_v33, %v837_v32 }
 0x437   : > { %v840_v36 = vrot.slane %v839_v34, 4 }
 0x439   : > { %v841_v37 = vadd.f32 %v840_v36, %v839_v34 }
 0x43b   : > { %v842_v39 = vrot.slane %v841_v37, 2 }
 0x43c   : > { %v6956_v40 = vpop.eup %6955 }
 0x43d   : > { %v871_v41 = vsel %vm539_vm2, %v6956_v40, 0.0  ;;  %v843_v43 = vadd.f32 %v842_v39, %v841_v37 }
 0x43e   : > { %872 = vadd.xlane.f32.xlu1 %v871_v41 }
 0x43f   : > { %v844_v44 = vrot.slane %v843_v43, 1 }
 0x441   : > { %v845_v48 = vadd.f32 %v844_v44, %v843_v43  ;;  %v1060_v43 = vunpack.c.l.s4 %v7125_v42 }
 0x442   : > { %790 = vadd.xlane.f32.xlu1 %v789_v45 }
 0x443   : > { %v874_v49 = vmul.f32 %v6954_v7, %v845_v48  ;;  %v875_v52 = vmul.f32 %v6956_v40, %v845_v48  ;;  %v1061_v46 = vunpack.c.0.s8 %v1060_v43 }
 0x445   : > { %v876_v51 = vsel %vm539_vm2, %v874_v49, 0.0  ;;  %v879_v53 = vsel %vm539_vm2, %v875_v52, 0.0  ;;  %v7429_v48 = vsub.s32 %v1061_v46, %v7295_v2 }
 0x446   : > { %793 = vadd.xlane.f32.xlu1 %v792_v50  ;;  %877 = vadd.xlane.f32.xlu0 %v876_v51  ;;  %v970_v50 = vld [vmem:[%s8229_s9] sm:$0xff] }
 0x447   : > { %v1065_v51 = vrot.slane %v970_v50, %v7429_v48 }
 0x44a   : > { %880 = vadd.xlane.f32.xlu1 %v879_v53  ;;  %v1073_v53 = vcombine.high %v1065_v51, %v1065_v51 }
 0x491   : > { %v786_v56 = vpop.xlane.xlu0 %785 }
 0x492   : > { %v783_v54 = vpop.xlane.xlu1 %782 }
 0x493   : > { %6957 = vrcp.f32 %v783_v54  ;;  %v1095_v54 = vrot.slane %v1073_v53, %v7429_v48 }
 0x495   : > { %6675 = vmatprep.subr.msk.bf16.mxu1 %vm1159_vm6, %v1095_v54 }
 0x496   : > { %v870_v55 = vpop.xlane.xlu1 %869 }
 0x497   : > { %6959 = vrcp.f32 %v870_v55  ;;  %v1081_v55 = vrot.slane %v1065_v51, %v7429_v48 }
 0x498   : > { %6961 = vrcp.f32 %v786_v56  ;;  %v1058_v56 = vcombine.high %v970_v50, %v970_v50 }
 0x499   : > { %v1103_v58 = vcombine.high %v1081_v55, %v1081_v55 }
 0x49d   : > { %v6958_v62 = vpop.eup %6957 }
 0x4a1   : > { %v6960_v7 = vpop.eup %6959 }
 0x4a2   : > { %v6962_v13 = vpop.eup %6961 }
 0x4cb   : > { %v873_v57 = vpop.xlane.xlu1 %872 }
 0x4cc   : > { %6963 = vrcp.f32 %v873_v57  ;;  %v1105_v57 = vcombine.high %v1095_v54, %v1095_v54 }
 0x4ce   : > { %6677 = vmatprep.subr.msk.bf16.mxu0 %vm1159_vm6, %v1105_v57 }
 0x4cf   : > { %v791_v61 = vpop.xlane.xlu1 %790 }
 0x4d0   : > { %v797_v1 = vmul.f32 %v6958_v62, %v791_v61  ;;  %v1072_v61 = vrot.slane %v1058_v56, %v7429_v48  ;;  %v1161_v62 = vsel %vm1159_vm6, %v1081_v55, 0 }
 0x4d1   : > { %1209 = vmatpush1.bf16.msra.mxu1 %v1161_v62 }
 0x4d2   : > { %v804_v15 = vmul.f32 %v803_v0, %v797_v1  ;;  %v1074_v1 = vcombine.high %v1072_v61, %v1072_v61 }
 0x4d3   : > { %v878_v9 = vpop.xlane.xlu0 %877  ;;  %v794_v11 = vpop.xlane.xlu1 %793 }
 0x4d4   : > { %v884_v12 = vmul.f32 %v6960_v7, %v878_v9  ;;  %v798_v17 = vmul.f32 %v6962_v13, %v794_v11  ;;  %v971_v11 = vld [vmem:[%s8229_s9 + $0x8] sm:$0xff] }
 0x4d6   : > { %v6964_v14 = vpop.eup %6963  ;;  %v890_v16 = vmul.f32 %v889_v63, %v884_v12  ;;  %v805_v24 = vmul.f32 %v803_v0, %v798_v17  ;;  %v1167_v0 = vsel %vm1159_vm6, %v1103_v58, 0  ;;  %v6673_v17 = vld [vmem:[%s8227_s7] ss:$0 sm:$0xff] }
 0x4d7   : > { %v881_v18 = vpop.xlane.xlu1 %880  ;;  %1252 = vmatpush1.bf16.msra.mxu0 %v1167_v0 }
 0x4d8   : > { %v892_v19 = vadd.f32 %v890_v16, %v804_v15  ;;  %v885_v20 = vmul.f32 %v6964_v14, %v881_v18  ;;  %v1114_v15 = vrot.slane %v971_v11, %v7429_v48 }
 0x4da   : > { %v894_v23 = vadd.f32 %v892_v19, %v7328_v27  ;;  %v891_v25 = vmul.f32 %v889_v63, %v885_v20  ;;  %v1102_v63 = vrot.slane %v1074_v1, %v7429_v48  ;;  %v1088_v19 = vrot.slane %v1072_v61, %v7429_v48 }
 0x4dc   : > { %v7415_v28 = vadd.f32 %v6672_v22, %v894_v23  ;;  %v893_v29 = vadd.f32 %v891_v25, %v805_v24  ;;  %6679 = vmatprep.subr.msk.bf16.mxu1 %vm1159_vm6, %v1102_v63  ;;  %v1106_v7 = vcombine.high %v1102_v63, %v1102_v63  ;;  %v1107_v23 = vcombine.high %v971_v11, %v971_v11  ;;  %v972_v11 = vld [vmem:[#allocation3] sm:$0xff] }
 0x4de   : > { %v895_v30 = vadd.f32 %v893_v29, %v7326_v26  ;;  %909 = vrot.lane.b32.xlu0 %v7415_v28, %s7119_s24  ;;  %6681 = vmatprep.subr.msk.bf16.mxu0 %vm1159_vm6, %v1106_v7  ;;  %v6674_v29 = vld [vmem:[%s8228_s8] ss:$0 sm:$0xff]  ;;  %v7493_v7 = vsub.s32 2, %v7295_v2 }
 0x4e0   : > { %v7420_v31 = vadd.f32 %v6672_v22, %v895_v30  ;;  %v1122_v22 = vcombine.high %v1114_v15, %v1114_v15 }
 0x4e2   : > { %911 = vrot.lane.b32.xlu1 %v7420_v31, %s7119_s24 }
 0x550   : > { %v910_v32 = vpop.permute.xlu0 %909 }
 0x551   : > { %v915_v33 = vadd.f32 %v910_v32, %v7415_v28  ;;  %v919_v27 = vsub.f32 %v7415_v28, %v910_v32  ;;  %v1104_v32 = vcombine.high %v1088_v19, %v1088_v19 }
 0x553   : > { %v917_v34 = vmul.f32 0.5, %v915_v33  ;;  %v921_v35 = vmul.f32 %v919_v27, %v919_v27  ;;  %v1144_v33 = vrot.slane %v1122_v22, %v7429_v48  ;;  %v1121_v27 = vrot.slane %v1107_v23, %v7429_v48 }
 0x554   : > { %v912_v36 = vpop.permute.xlu1 %911  ;;  %v7515_v22 = vsub.s32 7, %v7295_v2 }
 0x555   : > { %v923_v37 = vmul.f32 0.25, %v921_v35  ;;  %v916_v38 = vadd.f32 %v912_v36, %v7420_v31  ;;  %v920_v26 = vsub.f32 %v7420_v31, %v912_v36  ;;  %931 = vperm.xlu1 %6890, %v917_v34  }
 0x557   : > { %v925_v39 = vadd.f32 1e-05, %v923_v37  ;;  %v922_v40 = vmul.f32 %v920_v26, %v920_v26  ;;  %v918_v41 = vmul.f32 0.5, %v916_v38  ;;  %v1173_v37 = vsel %vm1159_vm6, %v1088_v19, 0 }
 0x558   : > { %v1179_v38 = vsel %vm1159_vm6, %v1104_v32, 0  ;;  %v1130_v26 = vrot.slane %v1114_v15, %v7429_v48  ;;  %v987_v15 = vrot.slane %v972_v11, %v7493_v7  ;;  %v7509_v19 = vsub.s32 6, %v7295_v2 }
 0x559   : > { %6965 = vrsqrt.f32 %v925_v39  ;;  %v924_v44 = vmul.f32 0.25, %v922_v40  ;;  %936 = vperm.xlu0 %6891, %v918_v41   ;;  %v1154_v39 = vcombine.high %v1144_v33, %v1144_v33  ;;  %v1123_v40 = vcombine.high %v1121_v27, %v1121_v27 }
 0x55a   : > { %v1152_v41 = vcombine.high %v1130_v26, %v1130_v26  ;;  %v1185_v43 = vsel %vm1159_vm6, %v1130_v26, 0  ;;  %v1003_v26 = vrot.slane %v972_v11, %v7509_v19 }
 0x55b   : > { %v926_v45 = vadd.f32 1e-05, %v924_v44  ;;  %v1151_v42 = vrot.slane %v1123_v40, %v7429_v48 }
 0x55c   : > { %v1191_v44 = vsel %vm1159_vm6, %v1152_v41, 0 }
 0x55d   : > { %6967 = vrsqrt.f32 %v926_v45  ;;  %v1137_v45 = vrot.slane %v1121_v27, %v7429_v48  ;;  %v1155_v46 = vcombine.high %v1151_v42, %v1151_v42 }
 0x55f   : > { %v1197_v50 = vsel %vm1159_vm6, %v1137_v45, 0 }
 0x563   : > { %v6966_v49 = vpop.eup %6965 }
 0x564   : > { %943 = vperm.xlu1 %6890, %v6966_v49   ;;  %v1153_v49 = vcombine.high %v1137_v45, %v1137_v45 }
 0x566   : > { %v1203_v51 = vsel %vm1159_vm6, %v1153_v49, 0  ;;  %v7524_v49 = vld [vmem:[#allocation3 + $0x8] sm:$0xff] }
 0x567   : > { %v6968_v52 = vpop.eup %6967 }
 0x568   : > { %948 = vperm.xlu1 %6890, %v6968_v52   ;;  %v1600_v52 = vld [vmem:[#allocation5] sm:$0xff] }
 0x569   : > { %v1618_v53 = vrot.slane %v1600_v52, %v7429_v48  ;;  %v1611_v58 = vcombine.high %v1600_v52, %v1600_v52 }
 0x56b   : > { %v1626_v54 = vcombine.high %v1618_v53, %v1618_v53  ;;  %v1634_v56 = vrot.slane %v1618_v53, %v7429_v48  ;;  %v1625_v62 = vrot.slane %v1611_v58, %v7429_v48 }
 0x56d   : > { %v1648_v55 = vrot.slane %v1626_v54, %v7429_v48  ;;  %v1656_v61 = vcombine.high %v1634_v56, %v1634_v56  ;;  %v1627_v0 = vcombine.high %v1625_v62, %v1625_v62 }
 0x56f   : > { %v1658_v57 = vcombine.high %v1648_v55, %v1648_v55  ;;  %v1655_v1 = vrot.slane %v1627_v0, %v7429_v48 }
 0x571   : > { %v1659_v63 = vcombine.high %v1655_v1, %v1655_v1 }
 0x5d4   : > { %v932_v9 = vpop.permute.xlu1 %931 }
 0x5d5   : > { %v939_v12 = vsub.f32 %v7415_v28, %v932_v9  ;;  %v1601_v9 = vld [vmem:[#allocation5 + $0x8] sm:$0xff] }
 0x5d8   : > { %v937_v13 = vpop.permute.xlu0 %936 }
 0x5d9   : > { %v940_v18 = vsub.f32 %v7420_v31, %v937_v13  ;;  %v7499_v13 = vrot.slane %v1601_v9, %v7429_v48 }
 0x5e3   : > { %v944_v14 = vpop.permute.xlu1 %943 }
 0x5e4   : > { %v951_v16 = vmul.f32 %v944_v14, %v939_v12  ;;  %v7496_v12 = vsub.s32 3, %v7295_v2  ;;  %v979_v14 = vrot.slane %v972_v11, %v7300_v5 }
 0x5e6   : > { %v959_v24 = vmul.f32 %v6673_v17, %v951_v16  ;;  %v7504_v16 = vsub.s32 4, %v7295_v2 }
 0x5e7   : > { %v949_v20 = vpop.permute.xlu1 %948 }
 0x5e8   : > { %v952_v25 = vmul.f32 %v949_v20, %v940_v18  ;;  %v967_v34 = vadd.f32 %v6674_v29, %v959_v24  ;;  %v991_v18 = vrot.slane %v972_v11, %v7496_v12  ;;  %v7512_v20 = vsub.s32 5, %v7295_v2 }
 0x5ea   : > { %v960_v30 = vmul.f32 %v6673_v17, %v952_v25  ;;  %v983_v17 = vrot.slane %v972_v11, %v7307_v6  ;;  %v1675_v25 = vcombine.high %v7499_v13, %v7499_v13  ;;  %v999_v2 = vrot.slane %v972_v11, %v7512_v20 }
 0x5ec   : > { %v968_v35 = vadd.f32 %v6674_v29, %v960_v30  ;;  %v1660_v29 = vcombine.high %v1601_v9, %v1601_v9 }
 0x5ee   : > { %v969_v36 = vpack.c.bf16 %v968_v35, %v967_v34  ;;  %v995_v34 = vrot.slane %v972_v11, %v7504_v16 }
 0x5f0   : > { %6676 = vmatmul.mubr.msk.bf16.vlgmr.msra.gmra.mrb[0].mxu1 %vm633_vm5, %v969_v36  ;;  %6678 = vmatmul.mubr.msk.bf16.vlgmr.msra.gmra.mrb[4].mxu0 %vm633_vm5, %v969_v36 }
 0x5f1   : > { %1295 = vmatpush1.bf16.msra.mxu1 %v1173_v37  ;;  %1338 = vmatpush1.bf16.msra.mxu0 %v1179_v38 }
 0x5f2   : > { %1326 = vmatprep.mubr.bf16.mxu1 %v7118_v21  ;;  %1369 = vmatprep.mubr.bf16.mxu0 %v7118_v21 }
 0x5f3   : > { %6683 = vmatprep.subr.msk.bf16.mxu1 %vm1159_vm6, %v1144_v33  ;;  %6685 = vmatprep.subr.msk.bf16.mxu0 %vm1159_vm6, %v1154_v39 }
 0x5f8   : > { %6680 = vmatmul.mubr.msk.bf16.vlgmr.msra.gmra.mrb[4].mxu1 %vm633_vm5, %v969_v36  ;;  %6682 = vmatmul.mubr.msk.bf16.vlgmr.msra.gmra.mrb[8].mxu0 %vm633_vm5, %v969_v36 }
 0x5f9   : > { %1381 = vmatpush1.bf16.msra.mxu1 %v1185_v43  ;;  %1424 = vmatpush1.bf16.msra.mxu0 %v1191_v44  ;;  %v1007_v43 = vrot.slane %v972_v11, %v7515_v22  ;;  %v1641_v44 = vrot.slane %v1625_v62, %v7429_v48 }
 0x5fa   : > { %1412 = vmatprep.mubr.bf16.mxu1 %v7118_v21  ;;  %1455 = vmatprep.mubr.bf16.mxu0 %v7118_v21 }
 0x5fb   : > { %6687 = vmatprep.subr.msk.bf16.mxu1 %vm1159_vm6, %v1151_v42  ;;  %6689 = vmatprep.subr.msk.bf16.mxu0 %vm1159_vm6, %v1155_v46  ;;  %v1657_v62 = vcombine.high %v1641_v44, %v1641_v44 }
 0x600   : > { %6684 = vmatmul.mubr.msk.bf16.vlgmr.msra.gmra.mrb[8].mxu1 %vm633_vm5, %v969_v36  ;;  %6686 = vmatmul.mubr.msk.bf16.vlgmr.msra.gmra.mrb[12].mxu0 %vm633_vm5, %v969_v36 }
 0x601   : > { %1467 = vmatpush1.bf16.msra.mxu1 %v1197_v50  ;;  %1510 = vmatpush1.bf16.msra.mxu0 %v1203_v51  ;;  %v1697_v50 = vrot.slane %v1675_v25, %v7429_v48  ;;  %v7528_v51 = vrot.slane %v1660_v29, %v7429_v48 }
 0x602   : > { %1498 = vmatprep.mubr.bf16.mxu1 %v7118_v21  ;;  %1541 = vmatprep.mubr.bf16.mxu0 %v7118_v21 }
 0x603   : > { %1725 = vmatprep.subr.bf16.mxu1 %v1648_v55  ;;  %1766 = vmatprep.subr.bf16.mxu0 %v1658_v57 }
 0x608   : > { %6688 = vmatmul.mubr.msk.bf16.vlgmr.msra.gmra.mrb[12].mxu1 %vm633_vm5, %v969_v36  ;;  %6690 = vmatmul.mubr.msk.bf16.vlgmr.msra.gmra.mrb[16].mxu0 %vm633_vm5, %v969_v36 }
 0x60a   : > { %1726 = vmatpush1.bf16.xpose.msra.mxu1 %v1634_v56  ;;  %1767 = vmatpush1.bf16.xpose.msra.mxu0 %v1656_v61 }
 0x60b   : > { %1807 = vmatprep.subr.bf16.mxu1 %v1655_v1  ;;  %1848 = vmatprep.subr.bf16.mxu0 %v1659_v63  ;;  %v7532_v63 = vrot.slane %v7524_v49, %v7300_v5 }
 0x6c3   : > { %v1242_v23 = vpop.f32.mrb[0].mxu1  ;;  %v1285_v24 = vpop.f32.mrb[4].mxu0 }
 0x6c4   : > { %v1243_v30 = vadd.f32 %v1242_v23, %v979_v14  ;;  %v1286_v32 = vadd.f32 %v1285_v24, %v987_v15  ;;  %v1244_v33 = vpop.f32.mrb[1].mxu1  ;;  %v1287_v27 = vpop.f32.mrb[5].mxu0 }
 0x6c5   : > { %v1245_v35 = vadd.f32 %v1244_v33, %v983_v17  ;;  %v1288_v36 = vadd.f32 %v1287_v27, %v991_v18  ;;  %v1246_v37 = vpop.f32.mrb[2].mxu1  ;;  %v1289_v38 = vpop.f32.mrb[6].mxu0 }
 0x6c6   : > { %v1247_v39 = vadd.f32 %v1246_v37, %v979_v14  ;;  %v1290_v40 = vadd.f32 %v1289_v38, %v987_v15  ;;  %v1248_v41 = vpop.f32.mrb[3].mxu1  ;;  %v1291_v42 = vpop.f32.mrb[7].mxu0  ;;  %v1552_v52 = vmax.f32 %v1243_v30, 0.0  ;;  %v1554_v53 = vmax.f32 %v1286_v32, 0.0 }
 0x6c7   : > { %v1249_v45 = vadd.f32 %v1248_v41, %v983_v17  ;;  %v1292_v46 = vadd.f32 %v1291_v42, %v991_v18  ;;  %v1553_v56 = vmax.f32 %v1245_v35, 0.0  ;;  %v1555_v57 = vmax.f32 %v1288_v36, 0.0 }
 0x6c8   : > { %v1568_v54 = vmax.f32 %v1247_v39, 0.0  ;;  %v1570_v55 = vmax.f32 %v1290_v40, 0.0  ;;  %v1019_v17 = vrot.slane %v7524_v49, %v7493_v7  ;;  %v1676_v18 = vcombine.high %v7528_v51, %v7528_v51 }
 0x6c9   : > { %v1569_v58 = vmax.f32 %v1249_v45, 0.0  ;;  %v1571_v61 = vmax.f32 %v1292_v46, 0.0  ;;  %v1015_v30 = vrot.slane %v7524_v49, %v7307_v6  ;;  %v1707_v32 = vcombine.high %v1697_v50, %v1697_v50 }
 0x6ca   : > { %v1584_v0 = vpack.c.bf16 %v1568_v54, %v1552_v52  ;;  %v1586_v1 = vpack.c.bf16 %v1570_v55, %v1554_v53  ;;  %v1023_v37 = vrot.slane %v7524_v49, %v7496_v12  ;;  %v1683_v42 = vrot.slane %v7499_v13, %v7429_v48 }
 0x6cb   : > { %v1585_v9 = vpack.c.bf16 %v1569_v58, %v1553_v56  ;;  %v1587_v11 = vpack.c.bf16 %v1571_v61, %v1555_v57  ;;  %v1328_v14 = vpop.f32.mrb[4].mxu1  ;;  %v1371_v15 = vpop.f32.mrb[8].mxu0  ;;  %v1704_v52 = vrot.slane %v1676_v18, %v7429_v48 }
 0x6cc   : > { %v1329_v23 = vadd.f32 %v1328_v14, %v995_v34  ;;  %v1372_v24 = vadd.f32 %v1371_v15, %v1003_v26  ;;  %v1330_v25 = vpop.f32.mrb[5].mxu1  ;;  %v1373_v29 = vpop.f32.mrb[9].mxu0  ;;  %v1035_v15 = vrot.slane %v7524_v49, %v7509_v19 }
 0x6cd   : > { %v1331_v33 = vadd.f32 %v1330_v25, %v999_v2  ;;  %v1374_v27 = vadd.f32 %v1373_v29, %v1007_v43  ;;  %v1332_v35 = vpop.f32.mrb[6].mxu1  ;;  %v1375_v36 = vpop.f32.mrb[10].mxu0  ;;  %1757 = vmatprep.mubr.bf16.mxu1 %v1585_v9  ;;  %1798 = vmatprep.mubr.bf16.mxu0 %v1587_v11  ;;  %v1708_v18 = vcombine.high %v1704_v52, %v1704_v52 }
 0x6ce   : > { %v1333_v38 = vadd.f32 %v1332_v35, %v995_v34  ;;  %v1376_v39 = vadd.f32 %v1375_v36, %v1003_v26  ;;  %v1334_v40 = vpop.f32.mrb[7].mxu1  ;;  %v1377_v41 = vpop.f32.mrb[11].mxu0  ;;  %1758 = vmatmul.mubr.bf16.vlgmr.msra.gmra.mrb[16].mxu1 %v1584_v0  ;;  %1799 = vmatmul.mubr.bf16.vlgmr.msra.gmra.mrb[20].mxu0 %v1586_v1  ;;  %v1556_v53 = vmax.f32 %v1329_v23, 0.0  ;;  %v1558_v54 = vmax.f32 %v1372_v24, 0.0 }
 0x6cf   : > { %v1335_v45 = vadd.f32 %v1334_v40, %v999_v2  ;;  %v1378_v46 = vadd.f32 %v1377_v41, %v1007_v43  ;;  %1808 = vmatpush1.bf16.xpose.msra.mxu1 %v1641_v44  ;;  %1849 = vmatpush1.bf16.xpose.msra.mxu0 %v1657_v62  ;;  %v1557_v34 = vmax.f32 %v1331_v33, 0.0  ;;  %v1559_v26 = vmax.f32 %v1374_v27, 0.0 }
 0x6d0   : > { %v1572_v55 = vmax.f32 %v1333_v38, 0.0  ;;  %v1574_v56 = vmax.f32 %v1376_v39, 0.0  ;;  %1889 = vmatprep.subr.bf16.mxu1 %v1697_v50  ;;  %1930 = vmatprep.subr.bf16.mxu0 %v1707_v32  ;;  %v1705_v44 = vcombine.high %v1683_v42, %v1683_v42  ;;  %v1027_v62 = vrot.slane %v7524_v49, %v7504_v16 }
 0x6d1   : > { %v1573_v57 = vmax.f32 %v1335_v45, 0.0  ;;  %v1575_v58 = vmax.f32 %v1378_v46, 0.0  ;;  %v1031_v32 = vrot.slane %v7524_v49, %v7512_v20  ;;  %v1039_v38 = vrot.slane %v7524_v49, %v7515_v22 }
 0x6d2   : > { %v1588_v61 = vpack.c.bf16 %v1572_v55, %v1556_v53  ;;  %v1590_v0 = vpack.c.bf16 %v1574_v56, %v1558_v54  ;;  %v1690_v41 = vrot.slane %v7528_v51, %v7429_v48 }
 0x6d3   : > { %v1589_v1 = vpack.c.bf16 %v1573_v57, %v1557_v34  ;;  %v1591_v13 = vpack.c.bf16 %v1575_v58, %v1559_v26  ;;  %v1414_v2 = vpop.f32.mrb[8].mxu1  ;;  %v1457_v43 = vpop.f32.mrb[12].mxu0 }
 0x6d4   : > { %v1415_v9 = vadd.f32 %v1414_v2, %v7532_v63  ;;  %v1458_v11 = vadd.f32 %v1457_v43, %v1019_v17  ;;  %v1416_v14 = vpop.f32.mrb[9].mxu1  ;;  %v1459_v50 = vpop.f32.mrb[13].mxu0  ;;  %v1706_v57 = vcombine.high %v1690_v41, %v1690_v41 }
 0x6d5   : > { %v1417_v23 = vadd.f32 %v1416_v14, %v1015_v30  ;;  %v1460_v24 = vadd.f32 %v1459_v50, %v1023_v37  ;;  %v1418_v25 = vpop.f32.mrb[10].mxu1  ;;  %v1461_v29 = vpop.f32.mrb[14].mxu0  ;;  %1839 = vmatprep.mubr.bf16.mxu1 %v1589_v1  ;;  %1880 = vmatprep.mubr.bf16.mxu0 %v1591_v13 }
 0x6d6   : > { %v1419_v33 = vadd.f32 %v1418_v25, %v7532_v63  ;;  %v1462_v27 = vadd.f32 %v1461_v29, %v1019_v17  ;;  %v1420_v35 = vpop.f32.mrb[11].mxu1  ;;  %v1463_v36 = vpop.f32.mrb[15].mxu0  ;;  %1840 = vmatmul.mubr.bf16.vlgmr.msra.gmra.mrb[20].mxu1 %v1588_v61  ;;  %1881 = vmatmul.mubr.bf16.vlgmr.msra.gmra.mrb[24].mxu0 %v1590_v0  ;;  %v1560_v45 = vmax.f32 %v1415_v9, 0.0  ;;  %v1562_v46 = vmax.f32 %v1458_v11, 0.0 }
 0x6d7   : > { %v1421_v39 = vadd.f32 %v1420_v35, %v1015_v30  ;;  %v1464_v40 = vadd.f32 %v1463_v36, %v1023_v37  ;;  %1890 = vmatpush1.bf16.xpose.msra.mxu1 %v1683_v42  ;;  %1931 = vmatpush1.bf16.xpose.msra.mxu0 %v1705_v44  ;;  %v1561_v63 = vmax.f32 %v1417_v23, 0.0  ;;  %v1563_v17 = vmax.f32 %v1460_v24, 0.0 }
 0x6d8   : > { %v1576_v53 = vmax.f32 %v1419_v33, 0.0  ;;  %v1578_v54 = vmax.f32 %v1462_v27, 0.0  ;;  %1971 = vmatprep.subr.bf16.mxu1 %v1704_v52  ;;  %2012 = vmatprep.subr.bf16.mxu0 %v1708_v18 }
 0x6d9   : > { %v1577_v55 = vmax.f32 %v1421_v39, 0.0  ;;  %v1579_v56 = vmax.f32 %v1464_v40, 0.0 }
 0x6da   : > { %v1592_v34 = vpack.c.bf16 %v1576_v53, %v1560_v45  ;;  %v1594_v26 = vpack.c.bf16 %v1578_v54, %v1562_v46 }
 0x6db   : > { %v1593_v49 = vpack.c.bf16 %v1577_v55, %v1561_v63  ;;  %v1595_v30 = vpack.c.bf16 %v1579_v56, %v1563_v17  ;;  %v1500_v37 = vpop.f32.mrb[12].mxu1  ;;  %v1543_v42 = vpop.f32.mrb[16].mxu0 }
 0x6dc   : > { %v1501_v58 = vadd.f32 %v1500_v37, %v1027_v62  ;;  %v1544_v61 = vadd.f32 %v1543_v42, %v1035_v15  ;;  %v1502_v51 = vpop.f32.mrb[13].mxu1  ;;  %v1545_v0 = vpop.f32.mrb[17].mxu0 }
 0x6dd   : > { %v1503_v1 = vadd.f32 %v1502_v51, %v1031_v32  ;;  %v1546_v13 = vadd.f32 %v1545_v0, %v1039_v38  ;;  %v1504_v2 = vpop.f32.mrb[14].mxu1  ;;  %v1547_v52 = vpop.f32.mrb[18].mxu0  ;;  %1921 = vmatprep.mubr.bf16.mxu1 %v1593_v49  ;;  %1962 = vmatprep.mubr.bf16.mxu0 %v1595_v30 }
 0x6de   : > { %v1505_v43 = vadd.f32 %v1504_v2, %v1027_v62  ;;  %v1548_v44 = vadd.f32 %v1547_v52, %v1035_v15  ;;  %v1506_v9 = vpop.f32.mrb[15].mxu1  ;;  %v1549_v11 = vpop.f32.mrb[19].mxu0  ;;  %1922 = vmatmul.mubr.bf16.vlgmr.msra.gmra.mrb[24].mxu1 %v1592_v34  ;;  %1963 = vmatmul.mubr.bf16.vlgmr.msra.gmra.mrb[28].mxu0 %v1594_v26  ;;  %v1564_v18 = vmax.f32 %v1501_v58, 0.0  ;;  %v1566_v23 = vmax.f32 %v1544_v61, 0.0 }
 0x6df   : > { %v1507_v14 = vadd.f32 %v1506_v9, %v1031_v32  ;;  %v1550_v50 = vadd.f32 %v1549_v11, %v1039_v38  ;;  %1972 = vmatpush1.bf16.xpose.msra.mxu1 %v1690_v41  ;;  %2013 = vmatpush1.bf16.xpose.msra.mxu0 %v1706_v57  ;;  %v1565_v29 = vmax.f32 %v1503_v1, 0.0  ;;  %v1567_v33 = vmax.f32 %v1546_v13, 0.0  ;;  %v6691_v32 = vld [vmem:[%s8232_s12] ss:$0 sm:$0xff] }
 0x6e0   : > { %v1580_v24 = vmax.f32 %v1505_v43, 0.0  ;;  %v1582_v25 = vmax.f32 %v1548_v44, 0.0 }
 0x6e1   : > { %v1581_v27 = vmax.f32 %v1507_v14, 0.0  ;;  %v1583_v35 = vmax.f32 %v1550_v50, 0.0 }
 0x6e2   : > { %v1596_v36 = vpack.c.bf16 %v1580_v24, %v1564_v18  ;;  %v1598_v39 = vpack.c.bf16 %v1582_v25, %v1566_v23 }
 0x6e3   : > { %v1597_v62 = vpack.c.bf16 %v1581_v27, %v1565_v29  ;;  %v1599_v15 = vpack.c.bf16 %v1583_v35, %v1567_v33 }
 0x6e5   : > { %2003 = vmatprep.mubr.bf16.mxu1 %v1597_v62  ;;  %2044 = vmatprep.mubr.bf16.mxu0 %v1599_v15 }
 0x6e6   : > { %2004 = vmatmul.mubr.bf16.vlgmr.msra.gmra.mrb[28].mxu1 %v1596_v36  ;;  %2045 = vmatmul.mubr.bf16.vlgmr.msra.gmra.mrb[32].mxu0 %v1598_v39 }
 0x6e7   : > { %2741 = vmatprep.mubr.bf16.mxu0 %v7118_v21 }
 0x7a1   : > { %v1759_v38 = vpop.f32.mrb[16].mxu1  ;;  %v1800_v40 = vpop.f32.mrb[20].mxu0 }
 0x7a2   : > { %v1760_v41 = vadd.f32 %v6691_v32, %v1759_v38  ;;  %v1761_v45 = vpop.f32.mrb[17].mxu1  ;;  %v1802_v46 = vpop.f32.mrb[21].mxu0 }
 0x7a3   : > { %v1762_v53 = vpop.f32.mrb[18].mxu1  ;;  %v1803_v54 = vpop.f32.mrb[22].mxu0 }
 0x7a4   : > { %v1801_v63 = vadd.f32 %v1800_v40, %v1760_v41  ;;  %v1763_v17 = vadd.f32 %v6691_v32, %v1762_v53  ;;  %v1764_v55 = vpop.f32.mrb[19].mxu1  ;;  %v1805_v56 = vpop.f32.mrb[23].mxu0 }
 0x7a6   : > { %v1804_v34 = vadd.f32 %v1803_v54, %v1763_v17 }
 0x7a9   : > { %v1841_v26 = vpop.f32.mrb[20].mxu1  ;;  %v1882_v49 = vpop.f32.mrb[24].mxu0 }
 0x7aa   : > { %v1842_v30 = vadd.f32 %v1841_v26, %v1801_v63  ;;  %v1843_v37 = vpop.f32.mrb[21].mxu1  ;;  %v1884_v42 = vpop.f32.mrb[25].mxu0 }
 0x7ab   : > { %v1844_v57 = vpop.f32.mrb[22].mxu1  ;;  %v1885_v58 = vpop.f32.mrb[26].mxu0  ;;  %v6696_v42 = vld [vmem:[%s8221_s1 + $0x2] sm:$0x3] }
 0x7ac   : > { %v1883_v61 = vadd.f32 %v1882_v49, %v1842_v30  ;;  %v1845_v51 = vadd.f32 %v1844_v57, %v1804_v34  ;;  %v1846_v0 = vpop.f32.mrb[23].mxu1  ;;  %v1887_v1 = vpop.f32.mrb[27].mxu0  ;;  %6822 = vmatprep.subr.msk.mxu1 %vm640_vm4, %v6696_v42 }
 0x7ad   : > { %6823 = vmatpush3.msk.msra.mxu1 %vm640_vm4, %v6696_v42 }
 0x7ae   : > { %v1886_v13 = vadd.f32 %v1885_v58, %v1845_v51 }
 0x7b1   : > { %v1923_v2 = vpop.f32.mrb[24].mxu1  ;;  %v1964_v52 = vpop.f32.mrb[28].mxu0 }
 0x7b2   : > { %v1924_v43 = vadd.f32 %v1923_v2, %v1883_v61  ;;  %v1925_v44 = vpop.f32.mrb[25].mxu1  ;;  %v1966_v9 = vpop.f32.mrb[29].mxu0 }
 0x7b3   : > { %v1926_v11 = vpop.f32.mrb[26].mxu1  ;;  %v1967_v14 = vpop.f32.mrb[30].mxu0  ;;  %v6695_v44 = vld [vmem:[%s8226_s6 + $0x1] ss:$0 sm:$0xff] }
 0x7b4   : > { %v1965_v50 = vadd.f32 %v1964_v52, %v1924_v43  ;;  %v1927_v18 = vadd.f32 %v1926_v11, %v1886_v13  ;;  %v1928_v23 = vpop.f32.mrb[27].mxu1  ;;  %v1969_v24 = vpop.f32.mrb[31].mxu0  ;;  %v6694_v13 = vld [vmem:[%s8225_s5 + $0x1] ss:$0 sm:$0xff] }
 0x7b5   : > { %v6698_v24 = vld [vmem:[%s8222_s2 + $0x1] ss:$0 sm:$0xff] }
 0x7b6   : > { %v1968_v25 = vadd.f32 %v1967_v14, %v1927_v18 }
 0x7b9   : > { %v2005_v29 = vpop.f32.mrb[28].mxu1  ;;  %v2046_v33 = vpop.f32.mrb[32].mxu0 }
 0x7ba   : > { %v2006_v27 = vadd.f32 %v2005_v29, %v1965_v50  ;;  %v2007_v35 = vpop.f32.mrb[29].mxu1  ;;  %v2048_v36 = vpop.f32.mrb[33].mxu0 }
 0x7bb   : > { %v2008_v39 = vpop.f32.mrb[30].mxu1  ;;  %v2049_v62 = vpop.f32.mrb[34].mxu0 }
 0x7bc   : > { %v2047_v15 = vadd.f32 %v2046_v33, %v2006_v27  ;;  %v2009_v32 = vadd.f32 %v2008_v39, %v1968_v25  ;;  %v2010_v38 = vpop.f32.mrb[31].mxu1  ;;  %v2051_v40 = vpop.f32.mrb[35].mxu0 }
 0x7be   : > { %v7562_v41 = vadd.f32 %v2047_v15, %v7415_v28  ;;  %v2050_v45 = vadd.f32 %v2049_v62, %v2009_v32 }
 0x7c0   : > { %v7565_v46 = vadd.f32 %v2050_v45, %v7420_v31  ;;  %2061 = vrot.lane.b32.xlu0 %v7562_v41, %s7119_s24 }
 0x7c2   : > { %2063 = vrot.lane.b32.xlu1 %v7565_v46, %s7119_s24 }
 0x832   : > { %v2062_v53 = vpop.permute.xlu0 %2061 }
 0x833   : > { %v2067_v54 = vadd.f32 %v2062_v53, %v7562_v41  ;;  %v2071_v63 = vsub.f32 %v7562_v41, %v2062_v53 }
 0x834   : > { %v2064_v17 = vpop.permute.xlu1 %2063 }
 0x835   : > { %v2069_v55 = vmul.f32 0.5, %v2067_v54  ;;  %v2073_v56 = vmul.f32 %v2071_v63, %v2071_v63  ;;  %v2068_v28 = vadd.f32 %v2064_v17, %v7565_v46  ;;  %v2072_v34 = vsub.f32 %v7565_v46, %v2064_v17 }
 0x837   : > { %v2075_v31 = vmul.f32 0.25, %v2073_v56  ;;  %v2074_v26 = vmul.f32 %v2072_v34, %v2072_v34  ;;  %2083 = vperm.xlu0 %6891, %v2069_v55   ;;  %v2070_v49 = vmul.f32 0.5, %v2068_v28 }
 0x839   : > { %v2077_v30 = vadd.f32 1e-05, %v2075_v31  ;;  %v2076_v37 = vmul.f32 0.25, %v2074_v26  ;;  %2088 = vperm.xlu1 %6890, %v2070_v49  }
 0x83b   : > { %6969 = vrsqrt.f32 %v2077_v30  ;;  %v2078_v57 = vadd.f32 1e-05, %v2076_v37 }
 0x83d   : > { %6971 = vrsqrt.f32 %v2078_v57 }
 0x845   : > { %v6970_v58 = vpop.eup %6969 }
 0x846   : > { %2095 = vperm.xlu0 %6891, %v6970_v58  }
 0x847   : > { %v6972_v61 = vpop.eup %6971 }
 0x848   : > { %2100 = vperm.xlu1 %6890, %v6972_v61  }
 0x84a   : > { %6893 = vset.pattern.permute.xlu0 %v7121_v60 }
 0x84c   : > { %6892 = vset.pattern.permute.xlu1 %v7121_v60 }
 0x8b6   : > { %v2084_v51 = vpop.permute.xlu0 %2083 }
 0x8b7   : > { %v2091_v1 = vsub.f32 %v7562_v41, %v2084_v51 }
 0x8b8   : > { %v2089_v0 = vpop.permute.xlu1 %2088 }
 0x8b9   : > { %v2092_v52 = vsub.f32 %v7565_v46, %v2089_v0 }
 0x8c5   : > { %v2096_v2 = vpop.permute.xlu0 %2095 }
 0x8c6   : > { %v2103_v43 = vmul.f32 %v2096_v2, %v2091_v1 }
 0x8c7   : > { %v2101_v9 = vpop.permute.xlu1 %2100 }
 0x8c8   : > { %v2111_v11 = vmul.f32 %v6694_v13, %v2103_v43  ;;  %v2104_v14 = vmul.f32 %v2101_v9, %v2092_v52 }
 0x8ca   : > { %v2119_v50 = vadd.f32 %v6695_v44, %v2111_v11  ;;  %v2112_v18 = vmul.f32 %v6694_v13, %v2104_v14 }
 0x8cc   : > { %v2120_v23 = vadd.f32 %v6695_v44, %v2112_v18  ;;  %6824 = vmatprep.mubr.msk.f32.mxu1 %vm633_vm5, %v2119_v50 }
 0x8ce   : > { %6825 = vmatmul.mubr.msk.f32.vlgmr.msra.gmra.mrb[32].mxu1 %vm633_vm5, %v2120_v23 }
 0x8cf   : > { %2784 = vmatprep.mubr.bf16.mxu1 %v7118_v21 }
 0x9a1   : > { %v6826_v25 = vpop.f32.mrb[32].mxu1 }
 0x9a2   : > { %v7596_v29 = vadd.f32 %v6826_v25, %v6698_v24  ;;  %v2206_v33 = vpop.f32.mrb[33].mxu1 }
 0x9a3   : > { %v2207_v27 = vadd.f32 %v6698_v24, %v2206_v33 }
 0x9a4   : > { %2222 = vperm.xlu1 %6892, %v7596_v29  }
 0x9a5   : > { %2217 = vperm.xlu0 %6893, %v2207_v27  }
 0x9a8   : > { %6895 = vset.pattern.permute.xlu1 %v7118_v21 }
 0x9a9   : > { %2260 = vperm.xlu1 %6895, %v7596_v29   ;;  %6894 = vset.pattern.permute.xlu0 %v7120_v59 }
 0x9aa   : > { %2310 = vperm.xlu0 %6894, %v7596_v29  }
 0x9ad   : > { %6896 = vset.pattern.permute.xlu1 %v7120_v59 }
 0x9ae   : > { %2306 = vperm.xlu1 %6896, %v2207_v27   ;;  %6898 = vset.pattern.permute.xlu0 %v7122_v3 }
 0x9af   : > { %2344 = vperm.xlu0 %6898, %v2207_v27  }
 0x9b2   : > { %6897 = vset.pattern.permute.xlu1 %v7118_v21 }
 0x9b3   : > { %2256 = vperm.xlu1 %6897, %v2207_v27   ;;  %6900 = vset.pattern.permute.xlu0 %v7123_v4 }
 0x9b7   : > { %6899 = vset.pattern.permute.xlu1 %v7122_v3 }
 0x9b8   : > { %2348 = vperm.xlu1 %6899, %v7596_v29  }
 0x9bc   : > { %6901 = vset.pattern.permute.xlu1 %v7123_v4 }
 0xa23   : > { %v2223_v35 = vpop.permute.xlu1 %2222 }
 0xa24   : > { %v2226_v36 = vmul.f32 %v7309_v8, %v2223_v35  ;;  %v2218_v39 = vpop.permute.xlu0 %2217 }
 0xa25   : > { %v2225_v62 = vmul.f32 %v7311_v10, %v2218_v39 }
 0xa26   : > { %v2228_v15 = vsel %vm539_vm2, %v2226_v36, 0.0 }
 0xa27   : > { %v2227_v32 = vsel %vm539_vm2, %v2225_v62, 0.0 }
 0xa28   : > { %v2229_v38 = vadd.f32 %v2228_v15, %v2227_v32  ;;  %v2261_v40 = vpop.permute.xlu1 %2260 }
 0xa29   : > { %v2311_v45 = vpop.permute.xlu0 %2310 }
 0xa2a   : > { %v2230_v53 = vrot.slane %v2229_v38, 4  ;;  %v2314_v63 = vmul.f32 %v7309_v8, %v2311_v45 }
 0xa2c   : > { %v2231_v54 = vadd.f32 %v2230_v53, %v2229_v38  ;;  %v2316_v34 = vsel %vm539_vm2, %v2314_v63, 0.0 }
 0xa2d   : > { %v2307_v17 = vpop.permute.xlu1 %2306 }
 0xa2e   : > { %v2232_v55 = vrot.slane %v2231_v54, 2  ;;  %v2313_v56 = vmul.f32 %v7311_v10, %v2307_v17  ;;  %v2345_v43 = vpop.permute.xlu0 %2344 }
 0xa30   : > { %v2233_v28 = vadd.f32 %v2232_v55, %v2231_v54  ;;  %v2315_v31 = vsel %vm539_vm2, %v2313_v56, 0.0 }
 0xa31   : > { %v2317_v26 = vadd.f32 %v2316_v34, %v2315_v31 }
 0xa32   : > { %v2234_v49 = vrot.slane %v2233_v28, 1  ;;  %v2257_v57 = vpop.permute.xlu1 %2256 }
 0xa33   : > { %v2318_v30 = vrot.slane %v2317_v26, 4 }
 0xa34   : > { %v2235_v37 = vadd.f32 %v2234_v49, %v2233_v28 }
 0xa35   : > { %v2319_v42 = vadd.f32 %v2318_v30, %v2317_v26 }
 0xa36   : > { %v2264_v58 = vmul.f32 %v2261_v40, %v2235_v37  ;;  %v2263_v61 = vmul.f32 %v2257_v57, %v2235_v37 }
 0xa37   : > { %v2320_v51 = vrot.slane %v2319_v42, 2  ;;  %v2349_v11 = vpop.permute.xlu1 %2348 }
 0xa38   : > { %v2268_v0 = vsel %vm539_vm2, %v2264_v58, -inf  ;;  %v2265_v1 = vsel %vm539_vm2, %v2263_v61, -inf }
 0xa39   : > { %v2321_v13 = vadd.f32 %v2320_v51, %v2319_v42  ;;  %2269 = vmax.xlane.f32.xlu0 %v2268_v0  ;;  %2266 = vmax.xlane.f32.xlu1 %v2265_v1 }
 0xa3b   : > { %v2322_v2 = vrot.slane %v2321_v13, 1 }
 0xa3d   : > { %v2323_v52 = vadd.f32 %v2322_v2, %v2321_v13 }
 0xa3f   : > { %v2351_v44 = vmul.f32 %v2345_v43, %v2323_v52  ;;  %v2352_v14 = vmul.f32 %v2349_v11, %v2323_v52 }
 0xa41   : > { %v2353_v9 = vsel %vm539_vm2, %v2351_v44, -inf  ;;  %v2356_v50 = vsel %vm539_vm2, %v2352_v14, -inf }
 0xa42   : > { %2354 = vmax.xlane.f32.xlu0 %v2353_v9 }
 0xa4a   : > { %2241 = vperm.xlu1 %6901, %v7596_v29  }
 0xa4e   : > { %6902 = vset.pattern.permute.xlu1 %v7124_v47 }
 0xa4f   : > { %2325 = vperm.xlu1 %6902, %v2207_v27  }
 0xa58   : > { %2237 = vperm.xlu0 %6900, %v2207_v27  }
 0xa5c   : > { %6904 = vset.pattern.permute.xlu0 %v7118_v21 }
 0xa73   : > { %2357 = vmax.xlane.f32.xlu1 %v2356_v50 }
 0xa84   : > { %2329 = vperm.xlu1 %6902, %v7596_v29  }
 0xa88   : > { %6903 = vset.pattern.permute.xlu1 %v7118_v21 }
 0xac6   : > { %v2267_v18 = vpop.xlane.xlu1 %2266  ;;  %v2270_v23 = vpop.xlane.xlu0 %2269 }
 0xac7   : > { %v2271_v24 = vsub.f32 %v2263_v61, %v2267_v18  ;;  %v2272_v25 = vsub.f32 %v2264_v58, %v2270_v23 }
 0xac9   : > { %v2273_v33 = vmul.f32 1.442695, %v2271_v24  ;;  %v2275_v35 = vmul.f32 1.442695, %v2272_v25 }
 0xaca   : > { %v2242_v62 = vpop.permute.xlu1 %2241 }
 0xacb   : > { %6973 = vpow2.f32 %v2273_v33  ;;  %v2245_v38 = vmul.f32 %v7309_v8, %v2242_v62 }
 0xacc   : > { %6975 = vpow2.f32 %v2275_v35 }
 0xacd   : > { %v2247_v54 = vsel %vm539_vm2, %v2245_v38, 0.0 }
 0xace   : > { %v2326_v57 = vpop.permute.xlu1 %2325 }
 0xacf   : > { %v2355_v27 = vpop.xlane.xlu0 %2354  ;;  %v2332_v51 = vmul.f32 %v7311_v10, %v2326_v57 }
 0xad0   : > { %v2359_v36 = vsub.f32 %v2351_v44, %v2355_v27 }
 0xad1   : > { %v2334_v2 = vsel %vm539_vm2, %v2332_v51, 0.0 }
 0xad2   : > { %v2361_v39 = vmul.f32 1.442695, %v2359_v36 }
 0xad4   : > { %6977 = vpow2.f32 %v2361_v39 }
 0xad5   : > { %v6974_v15 = vpop.eup %6973 }
 0xad6   : > { %v6976_v32 = vpop.eup %6975  ;;  %v2277_v29 = vsel %vm539_vm2, %v6974_v15, 0.0 }
 0xad7   : > { %2278 = vadd.xlane.f32.xlu1 %v2277_v29  ;;  %v2280_v40 = vsel %vm539_vm2, %v6976_v32, 0.0  ;;  %v2238_v45 = vpop.permute.xlu0 %2237 }
 0xad8   : > { %2281 = vadd.xlane.f32.xlu0 %v2280_v40  ;;  %v2244_v53 = vmul.f32 %v7311_v10, %v2238_v45  ;;  %v6702_v45 = vld [vmem:[%s8223_s3 + $0x2] sm:$0x3] }
 0xada   : > { %v2246_v63 = vsel %vm539_vm2, %v2244_v53, 0.0 }
 0xadb   : > { %v2248_v17 = vadd.f32 %v2247_v54, %v2246_v63  ;;  %v2386_v63 = vrot.slane %v6702_v45, %v7307_v6 }
 0xadd   : > { %v2249_v55 = vrot.slane %v2248_v17, 4 }
 0xade   : > { %v6978_v56 = vpop.eup %6977 }
 0xadf   : > { %v2250_v28 = vadd.f32 %v2249_v55, %v2248_v17  ;;  %v2365_v34 = vsel %vm539_vm2, %v6978_v56, 0.0 }
 0xae0   : > { %2366 = vadd.xlane.f32.xlu1 %v2365_v34 }
 0xae1   : > { %v2251_v31 = vrot.slane %v2250_v28, 2 }
 0xae3   : > { %v2252_v26 = vadd.f32 %v2251_v31, %v2250_v28  ;;  %v2300_v28 = vrot.slane %v6702_v45, %v7300_v5 }
 0xae5   : > { %v2253_v49 = vrot.slane %v2252_v26, 1 }
 0xae7   : > { %v2254_v30 = vadd.f32 %v2253_v49, %v2252_v26 }
 0xae9   : > { %v2284_v37 = vmul.f32 %v6976_v32, %v2254_v30  ;;  %v2283_v23 = vmul.f32 %v6974_v15, %v2254_v30 }
 0xaeb   : > { %v2288_v42 = vsel %vm539_vm2, %v2284_v37, 0.0  ;;  %v2285_v25 = vsel %vm539_vm2, %v2283_v23, 0.0 }
 0xaec   : > { %2289 = vadd.xlane.f32.xlu0 %v2288_v42 }
 0xb00   : > { %v2358_v58 = vpop.xlane.xlu1 %2357 }
 0xb01   : > { %v2360_v61 = vsub.f32 %v2352_v14, %v2358_v58 }
 0xb03   : > { %v2363_v0 = vmul.f32 1.442695, %v2360_v61  ;;  %v6704_v61 = vld [vmem:[%s8224_s4 + $0x1] ss:$0 sm:$0xff] }
 0xb04   : > { %v2330_v1 = vpop.permute.xlu1 %2329 }
 0xb05   : > { %6979 = vpow2.f32 %v2363_v0  ;;  %v2333_v13 = vmul.f32 %v7309_v8, %v2330_v1 }
 0xb07   : > { %v2335_v52 = vsel %vm539_vm2, %v2333_v13, 0.0 }
 0xb08   : > { %v2336_v43 = vadd.f32 %v2335_v52, %v2334_v2 }
 0xb0a   : > { %v2337_v44 = vrot.slane %v2336_v43, 4 }
 0xb0c   : > { %v2338_v9 = vadd.f32 %v2337_v44, %v2336_v43 }
 0xb0e   : > { %v2339_v11 = vrot.slane %v2338_v9, 2 }
 0xb0f   : > { %v6980_v50 = vpop.eup %6979 }
 0xb10   : > { %v2368_v18 = vsel %vm539_vm2, %v6980_v50, 0.0  ;;  %v2340_v14 = vadd.f32 %v2339_v11, %v2338_v9 }
 0xb11   : > { %2369 = vadd.xlane.f32.xlu1 %v2368_v18 }
 0xb12   : > { %v2341_v24 = vrot.slane %v2340_v14, 1 }
 0xb14   : > { %v2342_v33 = vadd.f32 %v2341_v24, %v2340_v14 }
 0xb15   : > { %2286 = vadd.xlane.f32.xlu1 %v2285_v25 }
 0xb16   : > { %v2372_v35 = vmul.f32 %v6980_v50, %v2342_v33  ;;  %v2371_v27 = vmul.f32 %v6978_v56, %v2342_v33 }
 0xb18   : > { %v2376_v36 = vsel %vm539_vm2, %v2372_v35, 0.0  ;;  %v2373_v39 = vsel %vm539_vm2, %v2371_v27, 0.0 }
 0xb19   : > { %2377 = vadd.xlane.f32.xlu0 %v2376_v36  ;;  %2374 = vadd.xlane.f32.xlu1 %v2373_v39  ;;  %v6709_v36 = vld [vmem:[%s8229_s9 + $0x10] sm:$0xff] }
 0xb1a   : > { %v2567_v39 = vrot.slane %v6709_v36, %v7429_v48  ;;  %v2560_v45 = vcombine.high %v6709_v36, %v6709_v36 }
 0xb64   : > { %v2279_v62 = vpop.xlane.xlu1 %2278 }
 0xb65   : > { %6981 = vrcp.f32 %v2279_v62  ;;  %v2282_v38 = vpop.xlane.xlu0 %2281 }
 0xb6d   : > { %v2367_v32 = vpop.xlane.xlu1 %2366 }
 0xb6e   : > { %6983 = vrcp.f32 %v2367_v32  ;;  %v2575_v32 = vcombine.high %v2567_v39, %v2567_v39 }
 0xb6f   : > { %6985 = vrcp.f32 %v2282_v38  ;;  %v6982_v40 = vpop.eup %6981 }
 0xb70   : > { %v2597_v38 = vrot.slane %v2575_v32, %v7429_v48 }
 0xb72   : > { %6711 = vmatprep.subr.msk.bf16.mxu0 %vm1159_vm6, %v2597_v38 }
 0xb78   : > { %v6984_v17 = vpop.eup %6983 }
 0xb79   : > { %v2290_v53 = vpop.xlane.xlu0 %2289  ;;  %v6986_v56 = vpop.eup %6985 }
 0xb7a   : > { %v2294_v31 = vmul.f32 %v6986_v56, %v2290_v53 }
 0xb7c   : > { %v2302_v58 = vmul.f32 %v2300_v28, %v2294_v31  ;;  %v6710_v31 = vld [vmem:[%s8229_s9 + $0x18] sm:$0xff] }
 0xb9e   : > { %v2370_v15 = vpop.xlane.xlu1 %2369 }
 0xb9f   : > { %6987 = vrcp.f32 %v2370_v15  ;;  %v2583_v15 = vrot.slane %v2567_v39, %v7429_v48 }
 0xba1   : > { %v2662_v53 = vsel %vm1159_vm6, %v2583_v15, 0 }
 0xba2   : > { %v2287_v29 = vpop.xlane.xlu1 %2286  ;;  %2710 = vmatpush1.bf16.msra.mxu0 %v2662_v53 }
 0xba3   : > { %v2293_v54 = vmul.f32 %v6982_v40, %v2287_v29  ;;  %v2607_v29 = vcombine.high %v2597_v38, %v2597_v38  ;;  %v2605_v40 = vcombine.high %v2583_v15, %v2583_v15 }
 0xba5   : > { %v2301_v49 = vmul.f32 %v2300_v28, %v2293_v54  ;;  %6713 = vmatprep.subr.msk.bf16.mxu1 %vm1159_vm6, %v2607_v29  ;;  %v2668_v54 = vsel %vm1159_vm6, %v2605_v40, 0  ;;  %v3102_v40 = vld [vmem:[#allocation5 + $0x10] sm:$0xff] }
 0xba6   : > { %v2375_v55 = vpop.xlane.xlu1 %2374  ;;  %v2378_v37 = vpop.xlane.xlu0 %2377  ;;  %2753 = vmatpush1.bf16.msra.mxu1 %v2668_v54 }
 0xba7   : > { %v2381_v34 = vmul.f32 %v6984_v17, %v2375_v55 }
 0xba9   : > { %v6988_v26 = vpop.eup %6987  ;;  %v2387_v30 = vmul.f32 %v2386_v63, %v2381_v34 }
 0xbaa   : > { %v2382_v42 = vmul.f32 %v6988_v26, %v2378_v37  ;;  %v6707_v37 = vld [vmem:[%s8227_s7 + $0x1] ss:$0 sm:$0xff] }
 0xbab   : > { %v2389_v57 = vadd.f32 %v2387_v30, %v2301_v49  ;;  %v2616_v49 = vrot.slane %v6710_v31, %v7429_v48 }
 0xbac   : > { %v2388_v51 = vmul.f32 %v2386_v63, %v2382_v42  ;;  %v2574_v63 = vrot.slane %v2560_v45, %v7429_v48  ;;  %v3121_v45 = vrot.slane %v3102_v40, %v7429_v48 }
 0xbad   : > { %v2391_v0 = vadd.f32 %v2389_v57, %v7562_v41 }
 0xbae   : > { %v2390_v1 = vadd.f32 %v2388_v51, %v2302_v58  ;;  %v2576_v17 = vcombine.high %v2574_v63, %v2574_v63  ;;  %v2590_v58 = vrot.slane %v2574_v63, %v7429_v48  ;;  %v2624_v51 = vcombine.high %v2616_v49, %v2616_v49 }
 0xbaf   : > { %v7652_v13 = vadd.f32 %v6704_v61, %v2391_v0  ;;  %v2609_v0 = vcombine.high %v6710_v31, %v6710_v31  ;;  %v3129_v53 = vcombine.high %v3121_v45, %v3121_v45  ;;  %v3137_v63 = vrot.slane %v3121_v45, %v7429_v48 }
 0xbb0   : > { %v2392_v2 = vadd.f32 %v2390_v1, %v7565_v46  ;;  %v2604_v55 = vrot.slane %v2576_v17, %v7429_v48 }
 0xbb1   : > { %2409 = vrot.lane.b32.xlu1 %v7652_v13, %s7119_s24  ;;  %v3151_v54 = vrot.slane %v3129_v53, %v7429_v48 }
 0xbb2   : > { %v7657_v52 = vadd.f32 %v6704_v61, %v2392_v2  ;;  %6715 = vmatprep.subr.msk.bf16.mxu0 %vm1159_vm6, %v2604_v55  ;;  %v2608_v56 = vcombine.high %v2604_v55, %v2604_v55  ;;  %v3114_v55 = vcombine.high %v3102_v40, %v3102_v40 }
 0xbb3   : > { %v3161_v17 = vcombine.high %v3151_v54, %v3151_v54 }
 0xbb4   : > { %2411 = vrot.lane.b32.xlu0 %v7657_v52, %s7119_s24  ;;  %6717 = vmatprep.subr.msk.bf16.mxu1 %vm1159_vm6, %v2608_v56  ;;  %v3159_v56 = vcombine.high %v3137_v63, %v3137_v63 }
 0xc23   : > { %v2410_v43 = vpop.permute.xlu1 %2409 }
 0xc24   : > { %v2415_v44 = vadd.f32 %v2410_v43, %v7652_v13  ;;  %v2419_v9 = vsub.f32 %v7652_v13, %v2410_v43  ;;  %v6708_v43 = vld [vmem:[%s8228_s8 + $0x1] ss:$0 sm:$0xff] }
 0xc26   : > { %v2421_v11 = vmul.f32 %v2419_v9, %v2419_v9  ;;  %v2412_v41 = vpop.permute.xlu0 %2411  ;;  %v2417_v50 = vmul.f32 0.5, %v2415_v44  ;;  %v2606_v9 = vcombine.high %v2590_v58, %v2590_v58 }
 0xc27   : > { %v2416_v18 = vadd.f32 %v2412_v41, %v7657_v52  ;;  %v2420_v46 = vsub.f32 %v7657_v52, %v2412_v41  ;;  %v2623_v41 = vrot.slane %v2609_v0, %v7429_v48 }
 0xc28   : > { %v2423_v23 = vmul.f32 0.25, %v2421_v11  ;;  %2431 = vperm.xlu1 %6903, %v2417_v50   ;;  %v2646_v11 = vrot.slane %v2624_v51, %v7429_v48 }
 0xc29   : > { %v2418_v14 = vmul.f32 0.5, %v2416_v18  ;;  %v2422_v24 = vmul.f32 %v2420_v46, %v2420_v46 }
 0xc2a   : > { %v2425_v25 = vadd.f32 1e-05, %v2423_v23  ;;  %v2674_v23 = vsel %vm1159_vm6, %v2590_v58, 0 }
 0xc2b   : > { %v2424_v33 = vmul.f32 0.25, %v2422_v24  ;;  %v2632_v24 = vrot.slane %v2616_v49, %v7429_v48  ;;  %v3103_v49 = vld [vmem:[#allocation5 + $0x18] sm:$0xff] }
 0xc2c   : > { %6989 = vrsqrt.f32 %v2425_v25  ;;  %2436 = vperm.xlu1 %6903, %v2418_v14   ;;  %v2680_v14 = vsel %vm1159_vm6, %v2606_v9, 0  ;;  %v2656_v25 = vcombine.high %v2646_v11, %v2646_v11 }
 0xc2d   : > { %v2426_v35 = vadd.f32 1e-05, %v2424_v33  ;;  %v2625_v33 = vcombine.high %v2623_v41, %v2623_v41  ;;  %v2686_v36 = vsel %vm1159_vm6, %v2632_v24, 0 }
 0xc2f   : > { %6991 = vrsqrt.f32 %v2426_v35  ;;  %v2654_v35 = vcombine.high %v2632_v24, %v2632_v24 }
 0xc31   : > { %v2692_v39 = vsel %vm1159_vm6, %v2654_v35, 0 }
 0xc36   : > { %v6990_v27 = vpop.eup %6989 }
 0xc37   : > { %2443 = vperm.xlu1 %6903, %v6990_v27   ;;  %v2653_v27 = vrot.slane %v2625_v33, %v7429_v48 }
 0xc39   : > { %v6992_v62 = vpop.eup %6991  ;;  %v2657_v32 = vcombine.high %v2653_v27, %v2653_v27 }
 0xc3a   : > { %2448 = vperm.xlu0 %6904, %v6992_v62   ;;  %v2639_v62 = vrot.slane %v2623_v41, %v7429_v48 }
 0xc3c   : > { %v2655_v38 = vcombine.high %v2639_v62, %v2639_v62  ;;  %v2698_v15 = vsel %vm1159_vm6, %v2639_v62, 0 }
 0xc3e   : > { %v2704_v29 = vsel %vm1159_vm6, %v2655_v38, 0  ;;  %v7740_v38 = vld [vmem:[#allocation3 + $0x18] sm:$0xff] }
 0xca7   : > { %v2432_v28 = vpop.permute.xlu1 %2431 }
 0xca8   : > { %v2439_v26 = vsub.f32 %v7652_v13, %v2432_v28  ;;  %v3128_v28 = vrot.slane %v3114_v55, %v7429_v48 }
 0xcab   : > { %v2437_v34 = vpop.permute.xlu1 %2436 }
 0xcac   : > { %v2440_v57 = vsub.f32 %v7657_v52, %v2437_v34  ;;  %v3130_v34 = vcombine.high %v3128_v28, %v3128_v28 }
 0xcae   : > { %v3158_v31 = vrot.slane %v3130_v34, %v7429_v48 }
 0xcb6   : > { %v2444_v30 = vpop.permute.xlu1 %2443 }
 0xcb7   : > { %v2451_v42 = vmul.f32 %v2444_v30, %v2439_v26  ;;  %v3162_v26 = vcombine.high %v3158_v31, %v3158_v31  ;;  %v2474_v30 = vld [vmem:[#allocation3 + $0x10] sm:$0xff] }
 0xcb8   : > { %v2485_v58 = vrot.slane %v2474_v30, %v7307_v6  ;;  %v2497_v41 = vrot.slane %v2474_v30, %v7504_v16  ;;  %v2501_v24 = vrot.slane %v2474_v30, %v7512_v20 }
 0xcb9   : > { %v2449_v61 = vpop.permute.xlu0 %2448  ;;  %v2459_v1 = vmul.f32 %v6707_v37, %v2451_v42  ;;  %v2481_v42 = vrot.slane %v2474_v30, %v7300_v5 }
 0xcba   : > { %v2452_v2 = vmul.f32 %v2449_v61, %v2440_v57  ;;  %v2489_v57 = vrot.slane %v2474_v30, %v7493_v7  ;;  %v2493_v61 = vrot.slane %v2474_v30, %v7496_v12 }
 0xcbb   : > { %v2467_v50 = vadd.f32 %v6708_v43, %v2459_v1 }
 0xcbc   : > { %v2460_v44 = vmul.f32 %v6707_v37, %v2452_v2  ;;  %v7727_v37 = vrot.slane %v3103_v49, %v7429_v48  ;;  %v3163_v2 = vcombine.high %v3103_v49, %v3103_v49 }
 0xcbe   : > { %v2468_v18 = vadd.f32 %v6708_v43, %v2460_v44  ;;  %v3178_v1 = vcombine.high %v7727_v37, %v7727_v37 }
 0xcc0   : > { %v2469_v46 = vpack.c.bf16 %v2468_v18, %v2467_v50 }
 0xcc2   : > { %6712 = vmatmul.mubr.msk.bf16.vlgmr.msra.gmra.mrb[36].mxu0 %vm633_vm5, %v2469_v46  ;;  %6714 = vmatmul.mubr.msk.bf16.vlgmr.msra.gmra.mrb[36].mxu1 %vm633_vm5, %v2469_v46 }
 0xcc3   : > { %2796 = vmatpush1.bf16.msra.mxu0 %v2674_v23  ;;  %2839 = vmatpush1.bf16.msra.mxu1 %v2680_v14  ;;  %v2505_v14 = vrot.slane %v2474_v30, %v7509_v19 }
 0xcc4   : > { %2827 = vmatprep.mubr.bf16.mxu0 %v7118_v21  ;;  %2870 = vmatprep.mubr.bf16.mxu1 %v7118_v21 }
 0xcc5   : > { %6719 = vmatprep.subr.msk.bf16.mxu0 %vm1159_vm6, %v2646_v11  ;;  %6721 = vmatprep.subr.msk.bf16.mxu1 %vm1159_vm6, %v2656_v25 }
 0xcca   : > { %6716 = vmatmul.mubr.msk.bf16.vlgmr.msra.gmra.mrb[40].mxu0 %vm633_vm5, %v2469_v46  ;;  %6718 = vmatmul.mubr.msk.bf16.vlgmr.msra.gmra.mrb[40].mxu1 %vm633_vm5, %v2469_v46 }
 0xccb   : > { %2882 = vmatpush1.bf16.msra.mxu0 %v2686_v36  ;;  %2925 = vmatpush1.bf16.msra.mxu1 %v2692_v39  ;;  %v2509_v36 = vrot.slane %v2474_v30, %v7515_v22  ;;  %v3144_v39 = vrot.slane %v3128_v28, %v7429_v48 }
 0xccc   : > { %2913 = vmatprep.mubr.bf16.mxu0 %v7118_v21  ;;  %2956 = vmatprep.mubr.bf16.mxu1 %v7118_v21 }
 0xccd   : > { %6723 = vmatprep.subr.msk.bf16.mxu0 %vm1159_vm6, %v2653_v27  ;;  %6725 = vmatprep.subr.msk.bf16.mxu1 %vm1159_vm6, %v2657_v32  ;;  %v3160_v28 = vcombine.high %v3144_v39, %v3144_v39 }
 0xcd2   : > { %6720 = vmatmul.mubr.msk.bf16.vlgmr.msra.gmra.mrb[44].mxu0 %vm633_vm5, %v2469_v46  ;;  %6722 = vmatmul.mubr.msk.bf16.vlgmr.msra.gmra.mrb[44].mxu1 %vm633_vm5, %v2469_v46 }
 0xcd3   : > { %2968 = vmatpush1.bf16.msra.mxu0 %v2698_v15  ;;  %3011 = vmatpush1.bf16.msra.mxu1 %v2704_v29  ;;  %v3200_v15 = vrot.slane %v3178_v1, %v7429_v48  ;;  %v7744_v29 = vrot.slane %v3163_v2, %v7429_v48 }
 0xcd4   : > { %2999 = vmatprep.mubr.bf16.mxu0 %v7118_v21  ;;  %3042 = vmatprep.mubr.bf16.mxu1 %v7118_v21 }
 0xcd5   : > { %3228 = vmatprep.subr.bf16.mxu0 %v3151_v54  ;;  %3269 = vmatprep.subr.bf16.mxu1 %v3161_v17 }
 0xcda   : > { %6724 = vmatmul.mubr.msk.bf16.vlgmr.msra.gmra.mrb[48].mxu0 %vm633_vm5, %v2469_v46  ;;  %6726 = vmatmul.mubr.msk.bf16.vlgmr.msra.gmra.mrb[48].mxu1 %vm633_vm5, %v2469_v46 }
 0xcdc   : > { %3229 = vmatpush1.bf16.xpose.msra.mxu0 %v3137_v63  ;;  %3270 = vmatpush1.bf16.xpose.msra.mxu1 %v3159_v56 }
 0xcdd   : > { %3310 = vmatprep.subr.bf16.mxu0 %v3158_v31  ;;  %3351 = vmatprep.subr.bf16.mxu1 %v3162_v26  ;;  %v7748_v26 = vrot.slane %v7740_v38, %v7300_v5 }
 0xd95   : > { %v2743_v51 = vpop.f32.mrb[36].mxu0  ;;  %v2786_v0 = vpop.f32.mrb[36].mxu1 }
 0xd96   : > { %v2744_v43 = vadd.f32 %v2743_v51, %v2481_v42  ;;  %v2787_v44 = vadd.f32 %v2786_v0, %v2489_v57  ;;  %v2745_v9 = vpop.f32.mrb[37].mxu0  ;;  %v2788_v11 = vpop.f32.mrb[37].mxu1 }
 0xd97   : > { %v2746_v50 = vadd.f32 %v2745_v9, %v2485_v58  ;;  %v2789_v18 = vadd.f32 %v2788_v11, %v2493_v61  ;;  %v2747_v46 = vpop.f32.mrb[38].mxu0  ;;  %v2790_v23 = vpop.f32.mrb[38].mxu1 }
 0xd98   : > { %v2748_v25 = vadd.f32 %v2747_v46, %v2481_v42  ;;  %v2791_v33 = vadd.f32 %v2790_v23, %v2489_v57  ;;  %v2749_v35 = vpop.f32.mrb[39].mxu0  ;;  %v2792_v27 = vpop.f32.mrb[39].mxu1  ;;  %v3053_v40 = vmax.f32 %v2744_v43, 0.0  ;;  %v3055_v45 = vmax.f32 %v2787_v44, 0.0 }
 0xd99   : > { %v2750_v62 = vadd.f32 %v2749_v35, %v2485_v58  ;;  %v2793_v32 = vadd.f32 %v2792_v27, %v2493_v61  ;;  %v3054_v63 = vmax.f32 %v2746_v50, 0.0  ;;  %v3056_v17 = vmax.f32 %v2789_v18, 0.0 }
 0xd9a   : > { %v3069_v53 = vmax.f32 %v2748_v25, 0.0  ;;  %v3071_v54 = vmax.f32 %v2791_v33, 0.0  ;;  %v2521_v58 = vrot.slane %v7740_v38, %v7493_v7  ;;  %v3179_v61 = vcombine.high %v7744_v29, %v7744_v29 }
 0xd9b   : > { %v3070_v55 = vmax.f32 %v2750_v62, 0.0  ;;  %v3072_v56 = vmax.f32 %v2793_v32, 0.0  ;;  %v2517_v43 = vrot.slane %v7740_v38, %v7307_v6  ;;  %v3210_v44 = vcombine.high %v3200_v15, %v3200_v15 }
 0xd9c   : > { %v3085_v34 = vpack.c.bf16 %v3069_v53, %v3053_v40  ;;  %v3087_v31 = vpack.c.bf16 %v3071_v54, %v3055_v45  ;;  %v2525_v46 = vrot.slane %v7740_v38, %v7496_v12  ;;  %v3186_v27 = vrot.slane %v7727_v37, %v7429_v48 }
 0xd9d   : > { %v3086_v49 = vpack.c.bf16 %v3070_v55, %v3054_v63  ;;  %v3088_v30 = vpack.c.bf16 %v3072_v56, %v3056_v17  ;;  %v2829_v42 = vpop.f32.mrb[40].mxu0  ;;  %v2872_v57 = vpop.f32.mrb[40].mxu1  ;;  %v3207_v40 = vrot.slane %v3179_v61, %v7429_v48 }
 0xd9e   : > { %v2830_v51 = vadd.f32 %v2829_v42, %v2497_v41  ;;  %v2873_v0 = vadd.f32 %v2872_v57, %v2505_v14  ;;  %v2831_v1 = vpop.f32.mrb[41].mxu0  ;;  %v2874_v2 = vpop.f32.mrb[41].mxu1  ;;  %v2537_v57 = vrot.slane %v7740_v38, %v7509_v19 }
 0xd9f   : > { %v2832_v9 = vadd.f32 %v2831_v1, %v2501_v24  ;;  %v2875_v11 = vadd.f32 %v2874_v2, %v2509_v36  ;;  %v2833_v50 = vpop.f32.mrb[42].mxu0  ;;  %v2876_v18 = vpop.f32.mrb[42].mxu1  ;;  %3260 = vmatprep.mubr.bf16.mxu0 %v3086_v49  ;;  %3301 = vmatprep.mubr.bf16.mxu1 %v3088_v30  ;;  %v3211_v61 = vcombine.high %v3207_v40, %v3207_v40 }
 0xda0   : > { %v2834_v23 = vadd.f32 %v2833_v50, %v2497_v41  ;;  %v2877_v25 = vadd.f32 %v2876_v18, %v2505_v14  ;;  %v2835_v33 = vpop.f32.mrb[43].mxu0  ;;  %v2878_v35 = vpop.f32.mrb[43].mxu1  ;;  %3261 = vmatmul.mubr.bf16.vlgmr.msra.gmra.mrb[52].mxu0 %v3085_v34  ;;  %3302 = vmatmul.mubr.bf16.vlgmr.msra.gmra.mrb[52].mxu1 %v3087_v31  ;;  %v3057_v45 = vmax.f32 %v2830_v51, 0.0  ;;  %v3059_v53 = vmax.f32 %v2873_v0, 0.0 }
 0xda1   : > { %v2836_v62 = vadd.f32 %v2835_v33, %v2501_v24  ;;  %v2879_v32 = vadd.f32 %v2878_v35, %v2509_v36  ;;  %3311 = vmatpush1.bf16.xpose.msra.mxu0 %v3144_v39  ;;  %3352 = vmatpush1.bf16.xpose.msra.mxu1 %v3160_v28  ;;  %v3058_v41 = vmax.f32 %v2832_v9, 0.0  ;;  %v3060_v14 = vmax.f32 %v2875_v11, 0.0 }
 0xda2   : > { %v3073_v54 = vmax.f32 %v2834_v23, 0.0  ;;  %v3075_v63 = vmax.f32 %v2877_v25, 0.0  ;;  %3392 = vmatprep.subr.bf16.mxu0 %v3200_v15  ;;  %3433 = vmatprep.subr.bf16.mxu1 %v3210_v44  ;;  %v3208_v39 = vcombine.high %v3186_v27, %v3186_v27  ;;  %v2529_v28 = vrot.slane %v7740_v38, %v7504_v16 }
 0xda3   : > { %v3074_v17 = vmax.f32 %v2836_v62, 0.0  ;;  %v3076_v55 = vmax.f32 %v2879_v32, 0.0  ;;  %v2533_v44 = vrot.slane %v7740_v38, %v7512_v20  ;;  %v2541_v23 = vrot.slane %v7740_v38, %v7515_v22 }
 0xda4   : > { %v3089_v56 = vpack.c.bf16 %v3073_v54, %v3057_v45  ;;  %v3091_v34 = vpack.c.bf16 %v3075_v63, %v3059_v53  ;;  %v3193_v35 = vrot.slane %v7744_v29, %v7429_v48 }
 0xda5   : > { %v3090_v31 = vpack.c.bf16 %v3074_v17, %v3058_v41  ;;  %v3092_v37 = vpack.c.bf16 %v3076_v55, %v3060_v14  ;;  %v2915_v24 = vpop.f32.mrb[44].mxu0  ;;  %v2958_v36 = vpop.f32.mrb[44].mxu1 }
 0xda6   : > { %v2916_v49 = vadd.f32 %v2915_v24, %v7748_v26  ;;  %v2959_v30 = vadd.f32 %v2958_v36, %v2521_v58  ;;  %v2917_v42 = vpop.f32.mrb[45].mxu0  ;;  %v2960_v15 = vpop.f32.mrb[45].mxu1  ;;  %v3209_v17 = vcombine.high %v3193_v35, %v3193_v35 }
 0xda7   : > { %v2918_v51 = vadd.f32 %v2917_v42, %v2517_v43  ;;  %v2961_v0 = vadd.f32 %v2960_v15, %v2525_v46  ;;  %v2919_v1 = vpop.f32.mrb[46].mxu0  ;;  %v2962_v2 = vpop.f32.mrb[46].mxu1  ;;  %3342 = vmatprep.mubr.bf16.mxu0 %v3090_v31  ;;  %3383 = vmatprep.mubr.bf16.mxu1 %v3092_v37 }
 0xda8   : > { %v2920_v9 = vadd.f32 %v2919_v1, %v7748_v26  ;;  %v2963_v11 = vadd.f32 %v2962_v2, %v2521_v58  ;;  %v2921_v50 = vpop.f32.mrb[47].mxu0  ;;  %v2964_v18 = vpop.f32.mrb[47].mxu1  ;;  %3343 = vmatmul.mubr.bf16.vlgmr.msra.gmra.mrb[56].mxu0 %v3089_v56  ;;  %3384 = vmatmul.mubr.bf16.vlgmr.msra.gmra.mrb[56].mxu1 %v3091_v34  ;;  %v3061_v62 = vmax.f32 %v2916_v49, 0.0  ;;  %v3063_v32 = vmax.f32 %v2959_v30, 0.0 }
 0xda9   : > { %v2922_v25 = vadd.f32 %v2921_v50, %v2517_v43  ;;  %v2965_v33 = vadd.f32 %v2964_v18, %v2525_v46  ;;  %3393 = vmatpush1.bf16.xpose.msra.mxu0 %v3186_v27  ;;  %3434 = vmatpush1.bf16.xpose.msra.mxu1 %v3208_v39  ;;  %v3062_v26 = vmax.f32 %v2918_v51, 0.0  ;;  %v3064_v58 = vmax.f32 %v2961_v0, 0.0 }
 0xdaa   : > { %v3077_v45 = vmax.f32 %v2920_v9, 0.0  ;;  %v3079_v53 = vmax.f32 %v2963_v11, 0.0  ;;  %3474 = vmatprep.subr.bf16.mxu0 %v3207_v40  ;;  %3515 = vmatprep.subr.bf16.mxu1 %v3211_v61 }
 0xdab   : > { %v3078_v54 = vmax.f32 %v2922_v25, 0.0  ;;  %v3080_v63 = vmax.f32 %v2965_v33, 0.0 }
 0xdac   : > { %v3093_v41 = vpack.c.bf16 %v3077_v45, %v3061_v62  ;;  %v3095_v14 = vpack.c.bf16 %v3079_v53, %v3063_v32 }
 0xdad   : > { %v3094_v38 = vpack.c.bf16 %v3078_v54, %v3062_v26  ;;  %v3096_v43 = vpack.c.bf16 %v3080_v63, %v3064_v58  ;;  %v3001_v46 = vpop.f32.mrb[48].mxu0  ;;  %v3044_v27 = vpop.f32.mrb[48].mxu1 }
 0xdae   : > { %v3002_v55 = vadd.f32 %v3001_v46, %v2529_v28  ;;  %v3045_v56 = vadd.f32 %v3044_v27, %v2537_v57  ;;  %v3003_v29 = vpop.f32.mrb[49].mxu0  ;;  %v3046_v34 = vpop.f32.mrb[49].mxu1 }
 0xdaf   : > { %v3004_v31 = vadd.f32 %v3003_v29, %v2533_v44  ;;  %v3047_v37 = vadd.f32 %v3046_v34, %v2541_v23  ;;  %v3005_v24 = vpop.f32.mrb[50].mxu0  ;;  %v3048_v40 = vpop.f32.mrb[50].mxu1  ;;  %3424 = vmatprep.mubr.bf16.mxu0 %v3094_v38  ;;  %3465 = vmatprep.mubr.bf16.mxu1 %v3096_v43 }
 0xdb0   : > { %v3006_v36 = vadd.f32 %v3005_v24, %v2529_v28  ;;  %v3049_v39 = vadd.f32 %v3048_v40, %v2537_v57  ;;  %v3007_v49 = vpop.f32.mrb[51].mxu0  ;;  %v3050_v30 = vpop.f32.mrb[51].mxu1  ;;  %3425 = vmatmul.mubr.bf16.vlgmr.msra.gmra.mrb[60].mxu0 %v3093_v41  ;;  %3466 = vmatmul.mubr.bf16.vlgmr.msra.gmra.mrb[60].mxu1 %v3095_v14  ;;  %v3065_v61 = vmax.f32 %v3002_v55, 0.0  ;;  %v3067_v51 = vmax.f32 %v3045_v56, 0.0 }
 0xdb1   : > { %v3008_v42 = vadd.f32 %v3007_v49, %v2533_v44  ;;  %v3051_v15 = vadd.f32 %v3050_v30, %v2541_v23  ;;  %3475 = vmatpush1.bf16.xpose.msra.mxu0 %v3193_v35  ;;  %3516 = vmatpush1.bf16.xpose.msra.mxu1 %v3209_v17  ;;  %v3066_v2 = vmax.f32 %v3004_v31, 0.0  ;;  %v3068_v9 = vmax.f32 %v3047_v37, 0.0  ;;  %v6728_v44 = vld [vmem:[%s8232_s12 + $0x1] ss:$0 sm:$0xff] }
 0xdb2   : > { %v3081_v0 = vmax.f32 %v3006_v36, 0.0  ;;  %v3083_v1 = vmax.f32 %v3049_v39, 0.0 }
 0xdb3   : > { %v3082_v11 = vmax.f32 %v3008_v42, 0.0  ;;  %v3084_v50 = vmax.f32 %v3051_v15, 0.0 }
 0xdb4   : > { %v3097_v18 = vpack.c.bf16 %v3081_v0, %v3065_v61  ;;  %v3099_v25 = vpack.c.bf16 %v3083_v1, %v3067_v51 }
 0xdb5   : > { %v3098_v28 = vpack.c.bf16 %v3082_v11, %v3066_v2  ;;  %v3100_v57 = vpack.c.bf16 %v3084_v50, %v3068_v9 }
 0xdb7   : > { %3506 = vmatprep.mubr.bf16.mxu0 %v3098_v28  ;;  %3547 = vmatprep.mubr.bf16.mxu1 %v3100_v57 }
 0xdb8   : > { %3507 = vmatmul.mubr.bf16.vlgmr.msra.gmra.mrb[64].mxu0 %v3097_v18  ;;  %3548 = vmatmul.mubr.bf16.vlgmr.msra.gmra.mrb[64].mxu1 %v3099_v25 }
 0xdb9   : > { %4244 = vmatprep.mubr.bf16.mxu1 %v7118_v21 }
 0xe73   : > { %v3262_v23 = vpop.f32.mrb[52].mxu0  ;;  %v3303_v33 = vpop.f32.mrb[52].mxu1 }
 0xe74   : > { %v3263_v35 = vadd.f32 %v6728_v44, %v3262_v23  ;;  %v3264_v62 = vpop.f32.mrb[53].mxu0  ;;  %v3305_v32 = vpop.f32.mrb[53].mxu1 }
 0xe75   : > { %v3265_v45 = vpop.f32.mrb[54].mxu0  ;;  %v3306_v53 = vpop.f32.mrb[54].mxu1 }
 0xe76   : > { %v3304_v26 = vadd.f32 %v3303_v33, %v3263_v35  ;;  %v3266_v58 = vadd.f32 %v6728_v44, %v3265_v45  ;;  %v3267_v54 = vpop.f32.mrb[55].mxu0  ;;  %v3308_v63 = vpop.f32.mrb[55].mxu1 }
 0xe78   : > { %v3307_v41 = vadd.f32 %v3306_v53, %v3266_v58 }
 0xe7b   : > { %v3344_v14 = vpop.f32.mrb[56].mxu0  ;;  %v3385_v38 = vpop.f32.mrb[56].mxu1 }
 0xe7c   : > { %v3345_v43 = vadd.f32 %v3344_v14, %v3304_v26  ;;  %v3346_v46 = vpop.f32.mrb[57].mxu0  ;;  %v3387_v27 = vpop.f32.mrb[57].mxu1 }
 0xe7d   : > { %v3347_v17 = vpop.f32.mrb[58].mxu0  ;;  %v3388_v55 = vpop.f32.mrb[58].mxu1 }
 0xe7e   : > { %v3386_v56 = vadd.f32 %v3385_v38, %v3345_v43  ;;  %v3348_v29 = vadd.f32 %v3347_v17, %v3307_v41  ;;  %v3349_v34 = vpop.f32.mrb[59].mxu0  ;;  %v3390_v31 = vpop.f32.mrb[59].mxu1 }
 0xe80   : > { %v3389_v37 = vadd.f32 %v3388_v55, %v3348_v29 }
 0xe83   : > { %v3426_v24 = vpop.f32.mrb[60].mxu0  ;;  %v3467_v40 = vpop.f32.mrb[60].mxu1 }
 0xe84   : > { %v3427_v36 = vadd.f32 %v3426_v24, %v3386_v56  ;;  %v3428_v39 = vpop.f32.mrb[61].mxu0  ;;  %v3469_v49 = vpop.f32.mrb[61].mxu1  ;;  %v6733_v56 = vld [vmem:[%s8221_s1 + $0x4] sm:$0x3] }
 0xe85   : > { %v3429_v30 = vpop.f32.mrb[62].mxu0  ;;  %v3470_v42 = vpop.f32.mrb[62].mxu1  ;;  %6827 = vmatprep.subr.msk.mxu0 %vm640_vm4, %v6733_v56 }
 0xe86   : > { %v3468_v15 = vadd.f32 %v3467_v40, %v3427_v36  ;;  %v3430_v61 = vadd.f32 %v3429_v30, %v3389_v37  ;;  %v3431_v51 = vpop.f32.mrb[63].mxu0  ;;  %v3472_v0 = vpop.f32.mrb[63].mxu1  ;;  %6828 = vmatpush3.msk.msra.mxu0 %vm640_vm4, %v6733_v56  ;;  %v6731_v37 = vld [vmem:[%s8225_s5 + $0x2] ss:$0 sm:$0xff] }
 0xe87   : > { %v6732_v36 = vld [vmem:[%s8226_s6 + $0x2] ss:$0 sm:$0xff] }
 0xe88   : > { %v3471_v1 = vadd.f32 %v3470_v42, %v3430_v61  ;;  %v6735_v0 = vld [vmem:[%s8222_s2 + $0x2] ss:$0 sm:$0xff] }
 0xe8b   : > { %v3508_v2 = vpop.f32.mrb[64].mxu0  ;;  %v3549_v9 = vpop.f32.mrb[64].mxu1 }
 0xe8c   : > { %v3509_v11 = vadd.f32 %v3508_v2, %v3468_v15  ;;  %v3510_v50 = vpop.f32.mrb[65].mxu0  ;;  %v3551_v18 = vpop.f32.mrb[65].mxu1 }
 0xe8d   : > { %v3511_v25 = vpop.f32.mrb[66].mxu0  ;;  %v3552_v28 = vpop.f32.mrb[66].mxu1 }
 0xe8e   : > { %v3550_v57 = vadd.f32 %v3549_v9, %v3509_v11  ;;  %v3512_v44 = vadd.f32 %v3511_v25, %v3471_v1  ;;  %v3513_v23 = vpop.f32.mrb[67].mxu0  ;;  %v3554_v33 = vpop.f32.mrb[67].mxu1 }
 0xe90   : > { %v7778_v35 = vadd.f32 %v3550_v57, %v7652_v13  ;;  %v3553_v62 = vadd.f32 %v3552_v28, %v3512_v44 }
 0xe92   : > { %3564 = vrot.lane.b32.xlu1 %v7778_v35, %s7119_s24  ;;  %v7783_v32 = vadd.f32 %v3553_v62, %v7657_v52 }
 0xe96   : > { %3566 = vrot.lane.b32.xlu1 %v7783_v32, %s7119_s24 }
 0xf04   : > { %v3565_v45 = vpop.permute.xlu1 %3564 }
 0xf05   : > { %v3570_v53 = vadd.f32 %v3565_v45, %v7778_v35  ;;  %v3574_v26 = vsub.f32 %v7778_v35, %v3565_v45 }
 0xf07   : > { %v3572_v58 = vmul.f32 0.5, %v3570_v53  ;;  %v3576_v54 = vmul.f32 %v3574_v26, %v3574_v26 }
 0xf08   : > { %v3567_v63 = vpop.permute.xlu1 %3566 }
 0xf09   : > { %v3578_v13 = vmul.f32 0.25, %v3576_v54  ;;  %v3571_v41 = vadd.f32 %v3567_v63, %v7783_v32  ;;  %v3575_v14 = vsub.f32 %v7783_v32, %v3567_v63  ;;  %3586 = vperm.xlu0 %6904, %v3572_v58  }
 0xf0b   : > { %v3580_v38 = vadd.f32 1e-05, %v3578_v13  ;;  %v3573_v52 = vmul.f32 0.5, %v3571_v41  ;;  %v3577_v43 = vmul.f32 %v3575_v14, %v3575_v14 }
 0xf0d   : > { %6993 = vrsqrt.f32 %v3580_v38  ;;  %v3579_v46 = vmul.f32 0.25, %v3577_v43  ;;  %3591 = vperm.xlu1 %6903, %v3573_v52  }
 0xf0f   : > { %v3581_v27 = vadd.f32 1e-05, %v3579_v46 }
 0xf11   : > { %6995 = vrsqrt.f32 %v3581_v27 }
 0xf17   : > { %v6994_v17 = vpop.eup %6993 }
 0xf18   : > { %3598 = vperm.xlu0 %6904, %v6994_v17  }
 0xf1b   : > { %v6996_v55 = vpop.eup %6995 }
 0xf1c   : > { %3603 = vperm.xlu1 %6903, %v6996_v55   ;;  %6906 = vset.pattern.permute.xlu0 %v7121_v60 }
 0xf20   : > { %6905 = vset.pattern.permute.xlu1 %v7121_v60 }
 0xf88   : > { %v3587_v29 = vpop.permute.xlu0 %3586 }
 0xf89   : > { %v3594_v34 = vsub.f32 %v7778_v35, %v3587_v29 }
 0xf8c   : > { %v3592_v31 = vpop.permute.xlu1 %3591 }
 0xf8d   : > { %v3595_v39 = vsub.f32 %v7783_v32, %v3592_v31 }
 0xf97   : > { %v3599_v24 = vpop.permute.xlu0 %3598 }
 0xf98   : > { %v3606_v40 = vmul.f32 %v3599_v24, %v3594_v34 }
 0xf9a   : > { %v3614_v49 = vmul.f32 %v6731_v37, %v3606_v40 }
 0xf9b   : > { %v3604_v30 = vpop.permute.xlu1 %3603 }
 0xf9c   : > { %v3622_v42 = vadd.f32 %v6732_v36, %v3614_v49  ;;  %v3607_v15 = vmul.f32 %v3604_v30, %v3595_v39 }
 0xf9e   : > { %v3615_v61 = vmul.f32 %v6731_v37, %v3607_v15  ;;  %6829 = vmatprep.mubr.msk.f32.mxu0 %vm633_vm5, %v3622_v42 }
 0xfa0   : > { %v3623_v51 = vadd.f32 %v6732_v36, %v3615_v61 }
 0xfa2   : > { %6830 = vmatmul.mubr.msk.f32.vlgmr.msra.gmra.mrb[2].mxu0 %vm633_vm5, %v3623_v51 }
 0xfa3   : > { %4287 = vmatprep.mubr.bf16.mxu0 %v7118_v21 }
0x1075   : > { %v6831_v1 = vpop.f32.mrb[2].mxu0 }
0x1076   : > { %v7812_v2 = vadd.f32 %v6831_v1, %v6735_v0  ;;  %v3709_v9 = vpop.f32.mrb[3].mxu0 }
0x1077   : > { %v3710_v11 = vadd.f32 %v6735_v0, %v3709_v9 }
0x1078   : > { %3725 = vperm.xlu1 %6905, %v7812_v2  }
0x1079   : > { %3720 = vperm.xlu0 %6906, %v3710_v11  }
0x107c   : > { %6907 = vset.pattern.permute.xlu1 %v7120_v59 }
0x107d   : > { %3809 = vperm.xlu1 %6907, %v3710_v11   ;;  %6908 = vset.pattern.permute.xlu0 %v7120_v59 }
0x107e   : > { %3813 = vperm.xlu0 %6908, %v7812_v2  }
0x1081   : > { %6909 = vset.pattern.permute.xlu1 %v7118_v21 }
0x1082   : > { %3763 = vperm.xlu1 %6909, %v7812_v2   ;;  %6911 = vset.pattern.permute.xlu0 %v7122_v3 }
0x1083   : > { %3847 = vperm.xlu0 %6911, %v3710_v11  }
0x1086   : > { %3759 = vperm.xlu1 %6909, %v3710_v11  }
0x1087   : > { %6913 = vset.pattern.permute.xlu0 %v7123_v4 }
0x108a   : > { %6910 = vset.pattern.permute.xlu1 %v7122_v3 }
0x108b   : > { %3851 = vperm.xlu1 %6910, %v7812_v2  }
0x108f   : > { %6912 = vset.pattern.permute.xlu1 %v7123_v4 }
0x1090   : > { %3740 = vperm.xlu1 %6912, %v3710_v11  }
0x1094   : > { %6914 = vset.pattern.permute.xlu1 %v7124_v47 }
0x10f7   : > { %v3726_v50 = vpop.permute.xlu1 %3725 }
0x10f8   : > { %v3729_v18 = vmul.f32 %v7309_v8, %v3726_v50  ;;  %v3721_v25 = vpop.permute.xlu0 %3720 }
0x10f9   : > { %v3728_v28 = vmul.f32 %v7311_v10, %v3721_v25 }
0x10fa   : > { %v3731_v57 = vsel %vm539_vm2, %v3729_v18, 0.0 }
0x10fb   : > { %v3730_v44 = vsel %vm539_vm2, %v3728_v28, 0.0 }
0x10fc   : > { %v3732_v23 = vadd.f32 %v3731_v57, %v3730_v44  ;;  %v3810_v33 = vpop.permute.xlu1 %3809 }
0x10fd   : > { %v3816_v62 = vmul.f32 %v7311_v10, %v3810_v33  ;;  %v3814_v45 = vpop.permute.xlu0 %3813 }
0x10fe   : > { %v3733_v53 = vrot.slane %v3732_v23, 4  ;;  %v3817_v26 = vmul.f32 %v7309_v8, %v3814_v45 }
0x10ff   : > { %v3818_v58 = vsel %vm539_vm2, %v3816_v62, 0.0 }
0x1100   : > { %v3734_v54 = vadd.f32 %v3733_v53, %v3732_v23  ;;  %v3819_v63 = vsel %vm539_vm2, %v3817_v26, 0.0 }
0x1101   : > { %v3820_v13 = vadd.f32 %v3819_v63, %v3818_v58  ;;  %v3764_v38 = vpop.permute.xlu1 %3763 }
0x1102   : > { %v3735_v41 = vrot.slane %v3734_v54, 2  ;;  %v3848_v36 = vpop.permute.xlu0 %3847 }
0x1103   : > { %v3821_v14 = vrot.slane %v3820_v13, 4 }
0x1104   : > { %v3736_v52 = vadd.f32 %v3735_v41, %v3734_v54 }
0x1105   : > { %v3822_v43 = vadd.f32 %v3821_v14, %v3820_v13  ;;  %v3760_v56 = vpop.permute.xlu1 %3759 }
0x1106   : > { %v3737_v46 = vrot.slane %v3736_v52, 1 }
0x1107   : > { %v3823_v27 = vrot.slane %v3822_v43, 2 }
0x1108   : > { %v3738_v17 = vadd.f32 %v3737_v46, %v3736_v52 }
0x1109   : > { %v3824_v55 = vadd.f32 %v3823_v27, %v3822_v43 }
0x110a   : > { %v3767_v29 = vmul.f32 %v3764_v38, %v3738_v17  ;;  %v3766_v34 = vmul.f32 %v3760_v56, %v3738_v17  ;;  %v3852_v49 = vpop.permute.xlu1 %3851 }
0x110b   : > { %v3825_v31 = vrot.slane %v3824_v55, 1 }
0x110c   : > { %v3771_v37 = vsel %vm539_vm2, %v3767_v29, -inf  ;;  %v3768_v24 = vsel %vm539_vm2, %v3766_v34, -inf }
0x110d   : > { %v3826_v40 = vadd.f32 %v3825_v31, %v3824_v55  ;;  %3772 = vmax.xlane.f32.xlu0 %v3771_v37  ;;  %3769 = vmax.xlane.f32.xlu1 %v3768_v24 }
0x110f   : > { %v3854_v39 = vmul.f32 %v3848_v36, %v3826_v40  ;;  %v3855_v30 = vmul.f32 %v3852_v49, %v3826_v40  ;;  %v3741_v61 = vpop.permute.xlu1 %3740 }
0x1110   : > { %v3747_v41 = vmul.f32 %v7311_v10, %v3741_v61 }
0x1111   : > { %v3856_v42 = vsel %vm539_vm2, %v3854_v39, -inf  ;;  %v3859_v15 = vsel %vm539_vm2, %v3855_v30, -inf }
0x1112   : > { %3857 = vmax.xlane.f32.xlu0 %v3856_v42  ;;  %v3749_v55 = vsel %vm539_vm2, %v3747_v41, 0.0 }
0x1116   : > { %3860 = vmax.xlane.f32.xlu0 %v3859_v15 }
0x111e   : > { %3828 = vperm.xlu1 %6914, %v3710_v11  }
0x1122   : > { %3832 = vperm.xlu1 %6914, %v7812_v2  }
0x1126   : > { %6915 = vset.pattern.permute.xlu1 %v7118_v21 }
0x112c   : > { %3744 = vperm.xlu0 %6913, %v7812_v2  }
0x1130   : > { %6916 = vset.pattern.permute.xlu0 %v7118_v21 }
0x119a   : > { %v3770_v51 = vpop.xlane.xlu1 %3769  ;;  %v3773_v0 = vpop.xlane.xlu0 %3772 }
0x119b   : > { %v3774_v1 = vsub.f32 %v3766_v34, %v3770_v51  ;;  %v3775_v9 = vsub.f32 %v3767_v29, %v3773_v0 }
0x119d   : > { %v3776_v50 = vmul.f32 1.442695, %v3774_v1  ;;  %v3778_v18 = vmul.f32 1.442695, %v3775_v9 }
0x119e   : > { %v3829_v25 = vpop.permute.xlu1 %3828 }
0x119f   : > { %6997 = vpow2.f32 %v3776_v50  ;;  %v3858_v28 = vpop.xlane.xlu0 %3857  ;;  %v3835_v57 = vmul.f32 %v7311_v10, %v3829_v25 }
0x11a0   : > { %6999 = vpow2.f32 %v3778_v18  ;;  %v3862_v11 = vsub.f32 %v3854_v39, %v3858_v28 }
0x11a1   : > { %v3837_v45 = vsel %vm539_vm2, %v3835_v57, 0.0 }
0x11a2   : > { %v3864_v44 = vmul.f32 1.442695, %v3862_v11  ;;  %v3833_v23 = vpop.permute.xlu1 %3832 }
0x11a3   : > { %v3836_v2 = vmul.f32 %v7309_v8, %v3833_v23  ;;  %v3861_v33 = vpop.xlane.xlu0 %3860 }
0x11a4   : > { %7001 = vpow2.f32 %v3864_v44  ;;  %v3863_v62 = vsub.f32 %v3855_v30, %v3861_v33  ;;  %v6739_v33 = vld [vmem:[%s8223_s3 + $0x4] sm:$0x3] }
0x11a5   : > { %v3838_v53 = vsel %vm539_vm2, %v3836_v2, 0.0 }
0x11a6   : > { %v3839_v26 = vadd.f32 %v3838_v53, %v3837_v45  ;;  %v3866_v58 = vmul.f32 1.442695, %v3863_v62  ;;  %v3889_v53 = vrot.slane %v6739_v33, %v7307_v6 }
0x11a8   : > { %v3840_v54 = vrot.slane %v3839_v26, 4  ;;  %7003 = vpow2.f32 %v3866_v58 }
0x11a9   : > { %v6998_v63 = vpop.eup %6997 }
0x11aa   : > { %v7000_v13 = vpop.eup %6999  ;;  %v3841_v14 = vadd.f32 %v3840_v54, %v3839_v26  ;;  %v3780_v38 = vsel %vm539_vm2, %v6998_v63, 0.0 }
0x11ab   : > { %3781 = vadd.xlane.f32.xlu1 %v3780_v38  ;;  %v3783_v52 = vsel %vm539_vm2, %v7000_v13, 0.0  ;;  %v3745_v43 = vpop.permute.xlu0 %3744 }
0x11ac   : > { %v3842_v46 = vrot.slane %v3841_v14, 2  ;;  %3784 = vadd.xlane.f32.xlu0 %v3783_v52  ;;  %v3748_v27 = vmul.f32 %v7309_v8, %v3745_v43 }
0x11ae   : > { %v7002_v17 = vpop.eup %7001  ;;  %v3750_v56 = vsel %vm539_vm2, %v3748_v27, 0.0  ;;  %v3843_v29 = vadd.f32 %v3842_v46, %v3841_v14 }
0x11af   : > { %v3751_v34 = vadd.f32 %v3750_v56, %v3749_v55  ;;  %v3868_v31 = vsel %vm539_vm2, %v7002_v17, 0.0  ;;  %v6741_v55 = vld [vmem:[%s8224_s4 + $0x2] ss:$0 sm:$0xff] }
0x11b0   : > { %3869 = vadd.xlane.f32.xlu1 %v3868_v31  ;;  %v3844_v37 = vrot.slane %v3843_v29, 1 }
0x11b1   : > { %v3752_v24 = vrot.slane %v3751_v34, 4 }
0x11b2   : > { %v7004_v40 = vpop.eup %7003  ;;  %v3845_v36 = vadd.f32 %v3844_v37, %v3843_v29 }
0x11b3   : > { %v3753_v39 = vadd.f32 %v3752_v24, %v3751_v34  ;;  %v3871_v49 = vsel %vm539_vm2, %v7004_v40, 0.0 }
0x11b4   : > { %3872 = vadd.xlane.f32.xlu1 %v3871_v49  ;;  %v3875_v30 = vmul.f32 %v7004_v40, %v3845_v36  ;;  %v3874_v25 = vmul.f32 %v7002_v17, %v3845_v36 }
0x11b5   : > { %v3754_v42 = vrot.slane %v3753_v39, 2 }
0x11b6   : > { %v3879_v15 = vsel %vm539_vm2, %v3875_v30, 0.0  ;;  %v3876_v28 = vsel %vm539_vm2, %v3874_v25, 0.0  ;;  %v6746_v25 = vld [vmem:[%s8229_s9 + $0x20] sm:$0xff] }
0x11b7   : > { %v3755_v61 = vadd.f32 %v3754_v42, %v3753_v39  ;;  %3880 = vadd.xlane.f32.xlu0 %v3879_v15 }
0x11b9   : > { %v3756_v51 = vrot.slane %v3755_v61, 1 }
0x11bb   : > { %v3757_v0 = vadd.f32 %v3756_v51, %v3755_v61 }
0x11bd   : > { %v3786_v1 = vmul.f32 %v6998_v63, %v3757_v0  ;;  %v3787_v50 = vmul.f32 %v7000_v13, %v3757_v0  ;;  %v3803_v63 = vrot.slane %v6739_v33, %v7300_v5 }
0x11bf   : > { %v3788_v9 = vsel %vm539_vm2, %v3786_v1, 0.0  ;;  %v3791_v18 = vsel %vm539_vm2, %v3787_v50, 0.0 }
0x11c0   : > { %3789 = vadd.xlane.f32.xlu1 %v3788_v9 }
0x11c4   : > { %3792 = vadd.xlane.f32.xlu1 %v3791_v18 }
0x11c8   : > { %3877 = vadd.xlane.f32.xlu1 %v3876_v28  ;;  %v4070_v28 = vrot.slane %v6746_v25, %v7429_v48 }
0x1238   : > { %v3782_v11 = vpop.xlane.xlu1 %3781 }
0x1239   : > { %v3785_v23 = vpop.xlane.xlu0 %3784 }
0x123d   : > { %v3870_v57 = vpop.xlane.xlu1 %3869 }
0x1241   : > { %v3873_v44 = vpop.xlane.xlu1 %3872 }
0x1242   : > { %7005 = vrcp.f32 %v3873_v44 }
0x1243   : > { %7007 = vrcp.f32 %v3785_v23  ;;  %v4086_v23 = vrot.slane %v4070_v28, %v7429_v48 }
0x1244   : > { %7009 = vrcp.f32 %v3782_v11  ;;  %v3881_v45 = vpop.xlane.xlu0 %3880 }
0x1245   : > { %7011 = vrcp.f32 %v3870_v57  ;;  %v4078_v57 = vcombine.high %v4070_v28, %v4070_v28  ;;  %v4108_v33 = vcombine.high %v4086_v23, %v4086_v23 }
0x1247   : > { %v4100_v44 = vrot.slane %v4078_v57, %v7429_v48 }
0x1249   : > { %6748 = vmatprep.subr.msk.bf16.mxu1 %vm1159_vm6, %v4100_v44 }
0x124c   : > { %v7006_v2 = vpop.eup %7005 }
0x124d   : > { %v3790_v62 = vpop.xlane.xlu1 %3789  ;;  %v3885_v26 = vmul.f32 %v7006_v2, %v3881_v45  ;;  %v7008_v58 = vpop.eup %7007  ;;  %v4110_v2 = vcombine.high %v4100_v44, %v4100_v44  ;;  %v4165_v45 = vsel %vm1159_vm6, %v4086_v23, 0 }
0x124e   : > { %v7010_v41 = vpop.eup %7009  ;;  %4213 = vmatpush1.bf16.msra.mxu1 %v4165_v45 }
0x124f   : > { %v3891_v14 = vmul.f32 %v3889_v53, %v3885_v26  ;;  %v3796_v38 = vmul.f32 %v7010_v41, %v3790_v62  ;;  %v7012_v43 = vpop.eup %7011  ;;  %v4063_v62 = vcombine.high %v6746_v25, %v6746_v25  ;;  %6750 = vmatprep.subr.msk.bf16.mxu0 %vm1159_vm6, %v4110_v2 }
0x1251   : > { %v3793_v54 = vpop.xlane.xlu1 %3792  ;;  %v3804_v56 = vmul.f32 %v3803_v63, %v3796_v38  ;;  %v4077_v26 = vrot.slane %v4063_v62, %v7429_v48 }
0x1252   : > { %v3797_v13 = vmul.f32 %v7008_v58, %v3793_v54 }
0x1253   : > { %v4079_v58 = vcombine.high %v4077_v26, %v4077_v26 }
0x1254   : > { %v3805_v52 = vmul.f32 %v3803_v63, %v3797_v13 }
0x1255   : > { %v3878_v46 = vpop.xlane.xlu1 %3877  ;;  %v4107_v54 = vrot.slane %v4079_v58, %v7429_v48 }
0x1256   : > { %v3893_v27 = vadd.f32 %v3891_v14, %v3805_v52  ;;  %v3884_v17 = vmul.f32 %v7012_v43, %v3878_v46  ;;  %v6747_v14 = vld [vmem:[%s8229_s9 + $0x28] sm:$0xff] }
0x1257   : > { %6752 = vmatprep.subr.msk.bf16.mxu1 %vm1159_vm6, %v4107_v54  ;;  %v4111_v63 = vcombine.high %v4107_v54, %v4107_v54  ;;  %v4119_v43 = vrot.slane %v6747_v14, %v7429_v48 }
0x1258   : > { %v3895_v29 = vadd.f32 %v3893_v27, %v7783_v32  ;;  %v3890_v34 = vmul.f32 %v3889_v53, %v3884_v17  ;;  %v4171_v53 = vsel %vm1159_vm6, %v4108_v33, 0  ;;  %v6744_v27 = vld [vmem:[%s8227_s7 + $0x2] ss:$0 sm:$0xff] }
0x1259   : > { %4256 = vmatpush1.bf16.msra.mxu0 %v4171_v53  ;;  %v4605_v33 = vld [vmem:[#allocation5 + $0x20] sm:$0xff] }
0x125a   : > { %v7867_v31 = vadd.f32 %v6741_v55, %v3895_v29  ;;  %v3892_v37 = vadd.f32 %v3890_v34, %v3804_v56  ;;  %6754 = vmatprep.subr.msk.bf16.mxu0 %vm1159_vm6, %v4111_v63  ;;  %v4127_v29 = vcombine.high %v4119_v43, %v4119_v43  ;;  %v4112_v34 = vcombine.high %v6747_v14, %v6747_v14 }
0x125b   : > { %v4624_v62 = vrot.slane %v4605_v33, %v7429_v48  ;;  %v4617_v54 = vcombine.high %v4605_v33, %v4605_v33 }
0x125c   : > { %v3894_v24 = vadd.f32 %v3892_v37, %v7778_v35  ;;  %3914 = vrot.lane.b32.xlu0 %v7867_v31, %s7119_s24 }
0x125d   : > { %v4632_v45 = vcombine.high %v4624_v62, %v4624_v62 }
0x125e   : > { %v7872_v40 = vadd.f32 %v6741_v55, %v3894_v24  ;;  %v4093_v55 = vrot.slane %v4077_v26, %v7429_v48  ;;  %v4640_v26 = vrot.slane %v4624_v62, %v7429_v48 }
0x125f   : > { %v4654_v53 = vrot.slane %v4632_v45, %v7429_v48 }
0x1260   : > { %3912 = vrot.lane.b32.xlu1 %v7872_v40, %s7119_s24  ;;  %v4662_v63 = vcombine.high %v4640_v26, %v4640_v26 }
0x1261   : > { %v4664_v58 = vcombine.high %v4654_v53, %v4654_v53 }
0x12ce   : > { %v3915_v36 = vpop.permute.xlu0 %3914 }
0x12cf   : > { %v3923_v39 = vsub.f32 %v7867_v31, %v3915_v36  ;;  %v3919_v35 = vadd.f32 %v3915_v36, %v7867_v31  ;;  %v6745_v36 = vld [vmem:[%s8228_s8 + $0x2] ss:$0 sm:$0xff] }
0x12d1   : > { %v3925_v49 = vmul.f32 %v3923_v39, %v3923_v39  ;;  %v3921_v9 = vmul.f32 0.5, %v3919_v35 }
0x12d2   : > { %v3913_v30 = vpop.permute.xlu1 %3912 }
0x12d3   : > { %v3927_v32 = vmul.f32 0.25, %v3925_v49  ;;  %v3918_v42 = vadd.f32 %v3913_v30, %v7872_v40  ;;  %v3922_v15 = vsub.f32 %v7872_v40, %v3913_v30  ;;  %v4109_v49 = vcombine.high %v4093_v55, %v4093_v55 }
0x12d4   : > { %v4149_v30 = vrot.slane %v4127_v29, %v7429_v48 }
0x12d5   : > { %v3929_v61 = vadd.f32 1e-05, %v3927_v32  ;;  %v3920_v51 = vmul.f32 0.5, %v3918_v42  ;;  %v3924_v0 = vmul.f32 %v3922_v15, %v3922_v15  ;;  %v4126_v32 = vrot.slane %v4112_v34, %v7429_v48 }
0x12d7   : > { %7013 = vrsqrt.f32 %v3929_v61  ;;  %v3926_v1 = vmul.f32 0.25, %v3924_v0  ;;  %3934 = vperm.xlu1 %6915, %v3920_v51   ;;  %v4177_v61 = vsel %vm1159_vm6, %v4093_v55, 0  ;;  %v4183_v51 = vsel %vm1159_vm6, %v4109_v49, 0 }
0x12d8   : > { %v4135_v0 = vrot.slane %v4119_v43, %v7429_v48  ;;  %v3977_v43 = vld [vmem:[#allocation3 + $0x20] sm:$0xff] }
0x12d9   : > { %v3928_v50 = vadd.f32 1e-05, %v3926_v1  ;;  %v4159_v1 = vcombine.high %v4149_v30, %v4149_v30  ;;  %v3988_v55 = vrot.slane %v3977_v43, %v7307_v6 }
0x12da   : > { %v4189_v25 = vsel %vm1159_vm6, %v4135_v0, 0 }
0x12db   : > { %7015 = vrsqrt.f32 %v3928_v50  ;;  %3939 = vperm.xlu1 %6915, %v3921_v9   ;;  %v4128_v9 = vcombine.high %v4126_v32, %v4126_v32  ;;  %v4157_v50 = vcombine.high %v4135_v0, %v4135_v0  ;;  %v4004_v0 = vrot.slane %v3977_v43, %v7512_v20 }
0x12dd   : > { %v4195_v28 = vsel %vm1159_vm6, %v4157_v50, 0 }
0x12e1   : > { %v7014_v18 = vpop.eup %7013 }
0x12e2   : > { %3951 = vperm.xlu1 %6915, %v7014_v18   ;;  %v4156_v18 = vrot.slane %v4128_v9, %v7429_v48 }
0x12e4   : > { %v4160_v57 = vcombine.high %v4156_v18, %v4156_v18 }
0x12e5   : > { %v7016_v11 = vpop.eup %7015 }
0x12e6   : > { %3946 = vperm.xlu0 %6916, %v7016_v11   ;;  %v4142_v11 = vrot.slane %v4126_v32, %v7429_v48  ;;  %v4000_v32 = vrot.slane %v3977_v43, %v7504_v16 }
0x12e8   : > { %v4158_v44 = vcombine.high %v4142_v11, %v4142_v11  ;;  %v4201_v23 = vsel %vm1159_vm6, %v4142_v11, 0 }
0x12ea   : > { %v4207_v2 = vsel %vm1159_vm6, %v4158_v44, 0  ;;  %v7955_v44 = vld [vmem:[#allocation3 + $0x28] sm:$0xff] }
0x1356   : > { %v3935_v13 = vpop.permute.xlu1 %3934 }
0x1357   : > { %v3942_v17 = vsub.f32 %v7872_v40, %v3935_v13  ;;  %v4631_v13 = vrot.slane %v4617_v54, %v7429_v48 }
0x135a   : > { %v3940_v41 = vpop.permute.xlu1 %3939 }
0x135b   : > { %v3943_v38 = vsub.f32 %v7867_v31, %v3940_v41  ;;  %v4633_v41 = vcombine.high %v4631_v13, %v4631_v13 }
0x135d   : > { %v4661_v14 = vrot.slane %v4633_v41, %v7429_v48 }
0x1361   : > { %v3952_v52 = vpop.permute.xlu1 %3951 }
0x1362   : > { %v3955_v46 = vmul.f32 %v3952_v52, %v3943_v38  ;;  %v4665_v38 = vcombine.high %v4661_v14, %v4661_v14  ;;  %v4606_v52 = vld [vmem:[#allocation5 + $0x28] sm:$0xff] }
0x1364   : > { %v3963_v37 = vmul.f32 %v6744_v27, %v3955_v46  ;;  %v7942_v46 = vrot.slane %v4606_v52, %v7429_v48 }
0x1365   : > { %v3947_v56 = vpop.permute.xlu0 %3946 }
0x1366   : > { %v3954_v24 = vmul.f32 %v3947_v56, %v3942_v17  ;;  %v3971_v42 = vadd.f32 %v6745_v36, %v3963_v37  ;;  %v3992_v17 = vrot.slane %v3977_v43, %v7493_v7  ;;  %v3996_v56 = vrot.slane %v3977_v43, %v7496_v12 }
0x1367   : > { %v4681_v37 = vcombine.high %v7942_v46, %v7942_v46 }
0x1368   : > { %v3962_v39 = vmul.f32 %v6744_v27, %v3954_v24  ;;  %v3984_v27 = vrot.slane %v3977_v43, %v7300_v5  ;;  %v4666_v24 = vcombine.high %v4606_v52, %v4606_v52 }
0x136a   : > { %v3970_v15 = vadd.f32 %v6745_v36, %v3962_v39 }
0x136c   : > { %v3972_v35 = vpack.c.bf16 %v3971_v42, %v3970_v15 }
0x136e   : > { %6749 = vmatmul.mubr.msk.bf16.vlgmr.msra.gmra.mrb[68].mxu1 %vm633_vm5, %v3972_v35  ;;  %6751 = vmatmul.mubr.msk.bf16.vlgmr.msra.gmra.mrb[68].mxu0 %vm633_vm5, %v3972_v35 }
0x136f   : > { %4299 = vmatpush1.bf16.msra.mxu1 %v4177_v61  ;;  %4342 = vmatpush1.bf16.msra.mxu0 %v4183_v51  ;;  %v4008_v51 = vrot.slane %v3977_v43, %v7509_v19 }
0x1370   : > { %4330 = vmatprep.mubr.bf16.mxu1 %v7118_v21  ;;  %4373 = vmatprep.mubr.bf16.mxu0 %v7118_v21 }
0x1371   : > { %6756 = vmatprep.subr.msk.bf16.mxu1 %vm1159_vm6, %v4149_v30  ;;  %6758 = vmatprep.subr.msk.bf16.mxu0 %vm1159_vm6, %v4159_v1 }
0x1376   : > { %6753 = vmatmul.mubr.msk.bf16.vlgmr.msra.gmra.mrb[72].mxu1 %vm633_vm5, %v3972_v35  ;;  %6755 = vmatmul.mubr.msk.bf16.vlgmr.msra.gmra.mrb[72].mxu0 %vm633_vm5, %v3972_v35 }
0x1377   : > { %4385 = vmatpush1.bf16.msra.mxu1 %v4189_v25  ;;  %4428 = vmatpush1.bf16.msra.mxu0 %v4195_v28  ;;  %v4012_v25 = vrot.slane %v3977_v43, %v7515_v22  ;;  %v4647_v28 = vrot.slane %v4631_v13, %v7429_v48 }
0x1378   : > { %4416 = vmatprep.mubr.bf16.mxu1 %v7118_v21  ;;  %4459 = vmatprep.mubr.bf16.mxu0 %v7118_v21 }
0x1379   : > { %6760 = vmatprep.subr.msk.bf16.mxu1 %vm1159_vm6, %v4156_v18  ;;  %6762 = vmatprep.subr.msk.bf16.mxu0 %vm1159_vm6, %v4160_v57  ;;  %v4663_v13 = vcombine.high %v4647_v28, %v4647_v28 }
0x137e   : > { %6757 = vmatmul.mubr.msk.bf16.vlgmr.msra.gmra.mrb[76].mxu1 %vm633_vm5, %v3972_v35  ;;  %6759 = vmatmul.mubr.msk.bf16.vlgmr.msra.gmra.mrb[76].mxu0 %vm633_vm5, %v3972_v35 }
0x137f   : > { %4471 = vmatpush1.bf16.msra.mxu1 %v4201_v23  ;;  %4514 = vmatpush1.bf16.msra.mxu0 %v4207_v2  ;;  %v4703_v23 = vrot.slane %v4681_v37, %v7429_v48  ;;  %v7959_v2 = vrot.slane %v4666_v24, %v7429_v48 }
0x1380   : > { %4502 = vmatprep.mubr.bf16.mxu1 %v7118_v21  ;;  %4545 = vmatprep.mubr.bf16.mxu0 %v7118_v21 }
0x1381   : > { %4731 = vmatprep.subr.bf16.mxu1 %v4654_v53  ;;  %4772 = vmatprep.subr.bf16.mxu0 %v4664_v58 }
0x1386   : > { %6761 = vmatmul.mubr.msk.bf16.vlgmr.msra.gmra.mrb[80].mxu1 %vm633_vm5, %v3972_v35  ;;  %6763 = vmatmul.mubr.msk.bf16.vlgmr.msra.gmra.mrb[80].mxu0 %vm633_vm5, %v3972_v35 }
0x1388   : > { %4732 = vmatpush1.bf16.xpose.msra.mxu1 %v4640_v26  ;;  %4773 = vmatpush1.bf16.xpose.msra.mxu0 %v4662_v63 }
0x1389   : > { %4813 = vmatprep.subr.bf16.mxu1 %v4661_v14  ;;  %4854 = vmatprep.subr.bf16.mxu0 %v4665_v38  ;;  %v7963_v38 = vrot.slane %v7955_v44, %v7300_v5 }
0x1441   : > { %v4246_v29 = vpop.f32.mrb[68].mxu1  ;;  %v4289_v34 = vpop.f32.mrb[68].mxu0 }
0x1442   : > { %v4247_v36 = vadd.f32 %v4246_v29, %v3984_v27  ;;  %v4290_v39 = vadd.f32 %v4289_v34, %v3992_v17  ;;  %v4248_v49 = vpop.f32.mrb[69].mxu1  ;;  %v4291_v30 = vpop.f32.mrb[69].mxu0 }
0x1443   : > { %v4249_v42 = vadd.f32 %v4248_v49, %v3988_v55  ;;  %v4292_v15 = vadd.f32 %v4291_v30, %v3996_v56  ;;  %v4250_v35 = vpop.f32.mrb[70].mxu1  ;;  %v4293_v61 = vpop.f32.mrb[70].mxu0 }
0x1444   : > { %v4251_v1 = vadd.f32 %v4250_v35, %v3984_v27  ;;  %v4294_v9 = vadd.f32 %v4293_v61, %v3992_v17  ;;  %v4252_v50 = vpop.f32.mrb[71].mxu1  ;;  %v4295_v18 = vpop.f32.mrb[71].mxu0  ;;  %v4556_v33 = vmax.f32 %v4247_v36, 0.0  ;;  %v4558_v62 = vmax.f32 %v4290_v39, 0.0 }
0x1445   : > { %v4253_v11 = vadd.f32 %v4252_v50, %v3988_v55  ;;  %v4296_v57 = vadd.f32 %v4295_v18, %v3996_v56  ;;  %v4557_v26 = vmax.f32 %v4249_v42, 0.0  ;;  %v4559_v58 = vmax.f32 %v4292_v15, 0.0 }
0x1446   : > { %v4572_v45 = vmax.f32 %v4251_v1, 0.0  ;;  %v4574_v53 = vmax.f32 %v4294_v9, 0.0  ;;  %v4024_v55 = vrot.slane %v7955_v44, %v7493_v7  ;;  %v4682_v56 = vcombine.high %v7959_v2, %v7959_v2 }
0x1447   : > { %v4573_v54 = vmax.f32 %v4253_v11, 0.0  ;;  %v4575_v63 = vmax.f32 %v4296_v57, 0.0  ;;  %v4020_v36 = vrot.slane %v7955_v44, %v7307_v6  ;;  %v4713_v39 = vcombine.high %v4703_v23, %v4703_v23 }
0x1448   : > { %v4588_v41 = vpack.c.bf16 %v4572_v45, %v4556_v33  ;;  %v4590_v14 = vpack.c.bf16 %v4574_v53, %v4558_v62  ;;  %v4028_v35 = vrot.slane %v7955_v44, %v7496_v12  ;;  %v4689_v18 = vrot.slane %v7942_v46, %v7429_v48 }
0x1449   : > { %v4589_v52 = vpack.c.bf16 %v4573_v54, %v4557_v26  ;;  %v4591_v43 = vpack.c.bf16 %v4575_v63, %v4559_v58  ;;  %v4332_v27 = vpop.f32.mrb[72].mxu1  ;;  %v4375_v17 = vpop.f32.mrb[72].mxu0  ;;  %v4710_v33 = vrot.slane %v4682_v56, %v7429_v48 }
0x144a   : > { %v4333_v29 = vadd.f32 %v4332_v27, %v4000_v32  ;;  %v4376_v34 = vadd.f32 %v4375_v17, %v4008_v51  ;;  %v4334_v37 = vpop.f32.mrb[73].mxu1  ;;  %v4377_v24 = vpop.f32.mrb[73].mxu0  ;;  %v4040_v17 = vrot.slane %v7955_v44, %v7509_v19 }
0x144b   : > { %v4335_v49 = vadd.f32 %v4334_v37, %v4004_v0  ;;  %v4378_v30 = vadd.f32 %v4377_v24, %v4012_v25  ;;  %v4336_v42 = vpop.f32.mrb[74].mxu1  ;;  %v4379_v15 = vpop.f32.mrb[74].mxu0  ;;  %4763 = vmatprep.mubr.bf16.mxu1 %v4589_v52  ;;  %4804 = vmatprep.mubr.bf16.mxu0 %v4591_v43  ;;  %v4714_v56 = vcombine.high %v4710_v33, %v4710_v33 }
0x144c   : > { %v4337_v61 = vadd.f32 %v4336_v42, %v4000_v32  ;;  %v4380_v1 = vadd.f32 %v4379_v15, %v4008_v51  ;;  %v4338_v9 = vpop.f32.mrb[75].mxu1  ;;  %v4381_v50 = vpop.f32.mrb[75].mxu0  ;;  %4764 = vmatmul.mubr.bf16.vlgmr.msra.gmra.mrb[84].mxu1 %v4588_v41  ;;  %4805 = vmatmul.mubr.bf16.vlgmr.msra.gmra.mrb[84].mxu0 %v4590_v14  ;;  %v4560_v62 = vmax.f32 %v4333_v29, 0.0  ;;  %v4562_v45 = vmax.f32 %v4376_v34, 0.0 }
0x144d   : > { %v4339_v11 = vadd.f32 %v4338_v9, %v4004_v0  ;;  %v4382_v57 = vadd.f32 %v4381_v50, %v4012_v25  ;;  %4814 = vmatpush1.bf16.xpose.msra.mxu1 %v4647_v28  ;;  %4855 = vmatpush1.bf16.xpose.msra.mxu0 %v4663_v13  ;;  %v4561_v32 = vmax.f32 %v4335_v49, 0.0  ;;  %v4563_v51 = vmax.f32 %v4378_v30, 0.0 }
0x144e   : > { %v4576_v53 = vmax.f32 %v4337_v61, 0.0  ;;  %v4578_v26 = vmax.f32 %v4380_v1, 0.0  ;;  %4895 = vmatprep.subr.bf16.mxu1 %v4703_v23  ;;  %4936 = vmatprep.subr.bf16.mxu0 %v4713_v39  ;;  %v4711_v28 = vcombine.high %v4689_v18, %v4689_v18  ;;  %v4032_v13 = vrot.slane %v7955_v44, %v7504_v16 }
0x144f   : > { %v4577_v58 = vmax.f32 %v4339_v11, 0.0  ;;  %v4579_v54 = vmax.f32 %v4382_v57, 0.0  ;;  %v4036_v39 = vrot.slane %v7955_v44, %v7512_v20  ;;  %v4044_v61 = vrot.slane %v7955_v44, %v7515_v22 }
0x1450   : > { %v4592_v63 = vpack.c.bf16 %v4576_v53, %v4560_v62  ;;  %v4594_v41 = vpack.c.bf16 %v4578_v26, %v4562_v45  ;;  %v4696_v50 = vrot.slane %v7959_v2, %v7429_v48 }
0x1451   : > { %v4593_v14 = vpack.c.bf16 %v4577_v58, %v4561_v32  ;;  %v4595_v46 = vpack.c.bf16 %v4579_v54, %v4563_v51  ;;  %v4418_v0 = vpop.f32.mrb[76].mxu1  ;;  %v4461_v25 = vpop.f32.mrb[76].mxu0 }
0x1452   : > { %v4419_v52 = vadd.f32 %v4418_v0, %v7963_v38  ;;  %v4462_v43 = vadd.f32 %v4461_v25, %v4024_v55  ;;  %v4420_v27 = vpop.f32.mrb[77].mxu1  ;;  %v4463_v23 = vpop.f32.mrb[77].mxu0  ;;  %v4712_v58 = vcombine.high %v4696_v50, %v4696_v50 }
0x1453   : > { %v4421_v29 = vadd.f32 %v4420_v27, %v4020_v36  ;;  %v4464_v34 = vadd.f32 %v4463_v23, %v4028_v35  ;;  %v4422_v37 = vpop.f32.mrb[78].mxu1  ;;  %v4465_v24 = vpop.f32.mrb[78].mxu0  ;;  %4845 = vmatprep.mubr.bf16.mxu1 %v4593_v14  ;;  %4886 = vmatprep.mubr.bf16.mxu0 %v4595_v46 }
0x1454   : > { %v4423_v49 = vadd.f32 %v4422_v37, %v7963_v38  ;;  %v4466_v30 = vadd.f32 %v4465_v24, %v4024_v55  ;;  %v4424_v42 = vpop.f32.mrb[79].mxu1  ;;  %v4467_v15 = vpop.f32.mrb[79].mxu0  ;;  %4846 = vmatmul.mubr.bf16.vlgmr.msra.gmra.mrb[88].mxu1 %v4592_v63  ;;  %4887 = vmatmul.mubr.bf16.vlgmr.msra.gmra.mrb[88].mxu0 %v4594_v41  ;;  %v4564_v11 = vmax.f32 %v4419_v52, 0.0  ;;  %v4566_v57 = vmax.f32 %v4462_v43, 0.0 }
0x1455   : > { %v4425_v1 = vadd.f32 %v4424_v42, %v4020_v36  ;;  %v4468_v9 = vadd.f32 %v4467_v15, %v4028_v35  ;;  %4896 = vmatpush1.bf16.xpose.msra.mxu1 %v4689_v18  ;;  %4937 = vmatpush1.bf16.xpose.msra.mxu0 %v4711_v28  ;;  %v4565_v38 = vmax.f32 %v4421_v29, 0.0  ;;  %v4567_v55 = vmax.f32 %v4464_v34, 0.0 }
0x1456   : > { %v4580_v62 = vmax.f32 %v4423_v49, 0.0  ;;  %v4582_v45 = vmax.f32 %v4466_v30, 0.0  ;;  %4977 = vmatprep.subr.bf16.mxu1 %v4710_v33  ;;  %5018 = vmatprep.subr.bf16.mxu0 %v4714_v56 }
0x1457   : > { %v4581_v53 = vmax.f32 %v4425_v1, 0.0  ;;  %v4583_v26 = vmax.f32 %v4468_v9, 0.0 }
0x1458   : > { %v4596_v32 = vpack.c.bf16 %v4580_v62, %v4564_v11  ;;  %v4598_v51 = vpack.c.bf16 %v4582_v45, %v4566_v57 }
0x1459   : > { %v4597_v44 = vpack.c.bf16 %v4581_v53, %v4565_v38  ;;  %v4599_v36 = vpack.c.bf16 %v4583_v26, %v4567_v55  ;;  %v4504_v35 = vpop.f32.mrb[80].mxu1  ;;  %v4547_v18 = vpop.f32.mrb[80].mxu0 }
0x145a   : > { %v4505_v54 = vadd.f32 %v4504_v35, %v4032_v13  ;;  %v4548_v63 = vadd.f32 %v4547_v18, %v4040_v17  ;;  %v4506_v2 = vpop.f32.mrb[81].mxu1  ;;  %v4549_v41 = vpop.f32.mrb[81].mxu0 }
0x145b   : > { %v4507_v14 = vadd.f32 %v4506_v2, %v4036_v39  ;;  %v4550_v46 = vadd.f32 %v4549_v41, %v4044_v61  ;;  %v4508_v0 = vpop.f32.mrb[82].mxu1  ;;  %v4551_v33 = vpop.f32.mrb[82].mxu0  ;;  %4927 = vmatprep.mubr.bf16.mxu1 %v4597_v44  ;;  %4968 = vmatprep.mubr.bf16.mxu0 %v4599_v36 }
0x145c   : > { %v4509_v25 = vadd.f32 %v4508_v0, %v4032_v13  ;;  %v4552_v28 = vadd.f32 %v4551_v33, %v4040_v17  ;;  %v4510_v52 = vpop.f32.mrb[83].mxu1  ;;  %v4553_v43 = vpop.f32.mrb[83].mxu0  ;;  %4928 = vmatmul.mubr.bf16.vlgmr.msra.gmra.mrb[92].mxu1 %v4596_v32  ;;  %4969 = vmatmul.mubr.bf16.vlgmr.msra.gmra.mrb[92].mxu0 %v4598_v51  ;;  %v4568_v56 = vmax.f32 %v4505_v54, 0.0  ;;  %v4570_v29 = vmax.f32 %v4548_v63, 0.0 }
0x145d   : > { %v4511_v27 = vadd.f32 %v4510_v52, %v4036_v39  ;;  %v4554_v23 = vadd.f32 %v4553_v43, %v4044_v61  ;;  %4978 = vmatpush1.bf16.xpose.msra.mxu1 %v4696_v50  ;;  %5019 = vmatpush1.bf16.xpose.msra.mxu0 %v4712_v58  ;;  %v4569_v24 = vmax.f32 %v4507_v14, 0.0  ;;  %v4571_v49 = vmax.f32 %v4550_v46, 0.0  ;;  %v6765_v39 = vld [vmem:[%s8232_s12 + $0x2] ss:$0 sm:$0xff] }
0x145e   : > { %v4584_v34 = vmax.f32 %v4509_v25, 0.0  ;;  %v4586_v37 = vmax.f32 %v4552_v28, 0.0 }
0x145f   : > { %v4585_v30 = vmax.f32 %v4511_v27, 0.0  ;;  %v4587_v42 = vmax.f32 %v4554_v23, 0.0 }
0x1460   : > { %v4600_v15 = vpack.c.bf16 %v4584_v34, %v4568_v56  ;;  %v4602_v1 = vpack.c.bf16 %v4586_v37, %v4570_v29 }
0x1461   : > { %v4601_v13 = vpack.c.bf16 %v4585_v30, %v4569_v24  ;;  %v4603_v17 = vpack.c.bf16 %v4587_v42, %v4571_v49 }
0x1463   : > { %5009 = vmatprep.mubr.bf16.mxu1 %v4601_v13  ;;  %5050 = vmatprep.mubr.bf16.mxu0 %v4603_v17 }
0x1464   : > { %5010 = vmatmul.mubr.bf16.vlgmr.msra.gmra.mrb[96].mxu1 %v4600_v15  ;;  %5051 = vmatmul.mubr.bf16.vlgmr.msra.gmra.mrb[96].mxu0 %v4602_v1 }
0x1465   : > { %5747 = vmatprep.mubr.bf16.mxu0 %v7118_v21 }
0x151f   : > { %v4765_v61 = vpop.f32.mrb[84].mxu1  ;;  %v4806_v9 = vpop.f32.mrb[84].mxu0 }
0x1520   : > { %v4766_v50 = vadd.f32 %v6765_v39, %v4765_v61  ;;  %v4767_v11 = vpop.f32.mrb[85].mxu1  ;;  %v4808_v57 = vpop.f32.mrb[85].mxu0 }
0x1521   : > { %v4768_v62 = vpop.f32.mrb[86].mxu1  ;;  %v4809_v45 = vpop.f32.mrb[86].mxu0 }
0x1522   : > { %v4807_v38 = vadd.f32 %v4806_v9, %v4766_v50  ;;  %v4769_v55 = vadd.f32 %v6765_v39, %v4768_v62  ;;  %v4770_v53 = vpop.f32.mrb[87].mxu1  ;;  %v4811_v26 = vpop.f32.mrb[87].mxu0 }
0x1524   : > { %v4810_v32 = vadd.f32 %v4809_v45, %v4769_v55 }
0x1527   : > { %v4847_v51 = vpop.f32.mrb[88].mxu1  ;;  %v4888_v44 = vpop.f32.mrb[88].mxu0 }
0x1528   : > { %v4848_v36 = vadd.f32 %v4847_v51, %v4807_v38  ;;  %v4849_v35 = vpop.f32.mrb[89].mxu1  ;;  %v4890_v18 = vpop.f32.mrb[89].mxu0 }
0x1529   : > { %v4850_v58 = vpop.f32.mrb[90].mxu1  ;;  %v4891_v54 = vpop.f32.mrb[90].mxu0  ;;  %v6770_v18 = vld [vmem:[%s8221_s1 + $0x6] sm:$0x3] }
0x152a   : > { %v4889_v63 = vadd.f32 %v4888_v44, %v4848_v36  ;;  %v4851_v2 = vadd.f32 %v4850_v58, %v4810_v32  ;;  %v4852_v41 = vpop.f32.mrb[91].mxu1  ;;  %v4893_v14 = vpop.f32.mrb[91].mxu0  ;;  %6832 = vmatprep.subr.msk.mxu1 %vm640_vm4, %v6770_v18 }
0x152b   : > { %6833 = vmatpush3.msk.msra.mxu1 %vm640_vm4, %v6770_v18 }
0x152c   : > { %v4892_v46 = vadd.f32 %v4891_v54, %v4851_v2 }
0x152f   : > { %v4929_v0 = vpop.f32.mrb[92].mxu1  ;;  %v4970_v33 = vpop.f32.mrb[92].mxu0 }
0x1530   : > { %v4930_v25 = vadd.f32 %v4929_v0, %v4889_v63  ;;  %v4931_v28 = vpop.f32.mrb[93].mxu1  ;;  %v4972_v52 = vpop.f32.mrb[93].mxu0 }
0x1531   : > { %v4932_v43 = vpop.f32.mrb[94].mxu1  ;;  %v4973_v27 = vpop.f32.mrb[94].mxu0  ;;  %v6769_v28 = vld [vmem:[%s8226_s6 + $0x3] ss:$0 sm:$0xff] }
0x1532   : > { %v4971_v23 = vadd.f32 %v4970_v33, %v4930_v25  ;;  %v4933_v56 = vadd.f32 %v4932_v43, %v4892_v46  ;;  %v4934_v29 = vpop.f32.mrb[95].mxu1  ;;  %v4975_v34 = vpop.f32.mrb[95].mxu0  ;;  %v6768_v46 = vld [vmem:[%s8225_s5 + $0x3] ss:$0 sm:$0xff] }
0x1533   : > { %v6772_v29 = vld [vmem:[%s8222_s2 + $0x3] ss:$0 sm:$0xff] }
0x1534   : > { %v4974_v37 = vadd.f32 %v4973_v27, %v4933_v56 }
0x1537   : > { %v5011_v24 = vpop.f32.mrb[96].mxu1  ;;  %v5052_v49 = vpop.f32.mrb[96].mxu0 }
0x1538   : > { %v5012_v30 = vadd.f32 %v5011_v24, %v4971_v23  ;;  %v5013_v42 = vpop.f32.mrb[97].mxu1  ;;  %v5054_v15 = vpop.f32.mrb[97].mxu0 }
0x1539   : > { %v5014_v1 = vpop.f32.mrb[98].mxu1  ;;  %v5055_v13 = vpop.f32.mrb[98].mxu0 }
0x153a   : > { %v5053_v17 = vadd.f32 %v5052_v49, %v5012_v30  ;;  %v5015_v39 = vadd.f32 %v5014_v1, %v4974_v37  ;;  %v5016_v61 = vpop.f32.mrb[99].mxu1  ;;  %v5057_v9 = vpop.f32.mrb[99].mxu0 }
0x153c   : > { %v7993_v50 = vadd.f32 %v5053_v17, %v7872_v40  ;;  %v5056_v11 = vadd.f32 %v5055_v13, %v5015_v39 }
0x153e   : > { %v7996_v57 = vadd.f32 %v5056_v11, %v7867_v31  ;;  %5067 = vrot.lane.b32.xlu1 %v7993_v50, %s7119_s24 }
0x1540   : > { %5069 = vrot.lane.b32.xlu0 %v7996_v57, %s7119_s24 }
0x15b0   : > { %v5068_v62 = vpop.permute.xlu1 %5067 }
0x15b1   : > { %v5073_v45 = vadd.f32 %v5068_v62, %v7993_v50  ;;  %v5077_v38 = vsub.f32 %v7993_v50, %v5068_v62 }
0x15b2   : > { %v5070_v55 = vpop.permute.xlu0 %5069 }
0x15b3   : > { %v5075_v53 = vmul.f32 0.5, %v5073_v45  ;;  %v5079_v26 = vmul.f32 %v5077_v38, %v5077_v38  ;;  %v5074_v40 = vadd.f32 %v5070_v55, %v7996_v57  ;;  %v5078_v32 = vsub.f32 %v7996_v57, %v5070_v55 }
0x15b5   : > { %v5081_v31 = vmul.f32 0.25, %v5079_v26  ;;  %v5076_v51 = vmul.f32 0.5, %v5074_v40  ;;  %v5080_v44 = vmul.f32 %v5078_v32, %v5078_v32  ;;  %5089 = vperm.xlu1 %6915, %v5075_v53  }
0x15b7   : > { %v5083_v36 = vadd.f32 1e-05, %v5081_v31  ;;  %v5082_v35 = vmul.f32 0.25, %v5080_v44  ;;  %5094 = vperm.xlu0 %6916, %v5076_v51  }
0x15b9   : > { %7017 = vrsqrt.f32 %v5083_v36  ;;  %v5084_v58 = vadd.f32 1e-05, %v5082_v35 }
0x15bb   : > { %7019 = vrsqrt.f32 %v5084_v58 }
0x15c3   : > { %v7018_v54 = vpop.eup %7017 }
0x15c4   : > { %5101 = vperm.xlu1 %6915, %v7018_v54  }
0x15c5   : > { %v7020_v63 = vpop.eup %7019 }
0x15c6   : > { %5106 = vperm.xlu0 %6916, %v7020_v63  }
0x15c8   : > { %6918 = vset.pattern.permute.xlu1 %v7121_v60 }
0x15ca   : > { %6917 = vset.pattern.permute.xlu0 %v7121_v60 }
0x1634   : > { %v5090_v2 = vpop.permute.xlu1 %5089 }
0x1635   : > { %v5097_v14 = vsub.f32 %v7993_v50, %v5090_v2 }
0x1636   : > { %v5095_v41 = vpop.permute.xlu0 %5094 }
0x1637   : > { %v5098_v33 = vsub.f32 %v7996_v57, %v5095_v41 }
0x1643   : > { %v5102_v0 = vpop.permute.xlu1 %5101 }
0x1644   : > { %v5109_v25 = vmul.f32 %v5102_v0, %v5097_v14 }
0x1645   : > { %v5107_v52 = vpop.permute.xlu0 %5106 }
0x1646   : > { %v5117_v43 = vmul.f32 %v6768_v46, %v5109_v25  ;;  %v5110_v27 = vmul.f32 %v5107_v52, %v5098_v33 }
0x1648   : > { %v5125_v60 = vadd.f32 %v6769_v28, %v5117_v43  ;;  %v5118_v23 = vmul.f32 %v6768_v46, %v5110_v27 }
0x164a   : > { %v5126_v56 = vadd.f32 %v6769_v28, %v5118_v23  ;;  %6834 = vmatprep.mubr.msk.f32.mxu1 %vm633_vm5, %v5125_v60 }
0x164c   : > { %6835 = vmatmul.mubr.msk.f32.vlgmr.msra.gmra.mrb[34].mxu1 %vm633_vm5, %v5126_v56 }
0x164d   : > { %5790 = vmatprep.mubr.bf16.mxu1 %v7118_v21 }
0x171f   : > { %v6836_v34 = vpop.f32.mrb[34].mxu1 }
0x1720   : > { %v8027_v37 = vadd.f32 %v6836_v34, %v6772_v29  ;;  %v5212_v24 = vpop.f32.mrb[35].mxu1 }
0x1721   : > { %v5213_v49 = vadd.f32 %v6772_v29, %v5212_v24 }
0x1722   : > { %5228 = vperm.xlu0 %6917, %v8027_v37  }
0x1723   : > { %5223 = vperm.xlu1 %6918, %v5213_v49  }
0x1726   : > { %6921 = vset.pattern.permute.xlu0 %v7118_v21 }
0x1727   : > { %5262 = vperm.xlu0 %6921, %v5213_v49   ;;  %6919 = vset.pattern.permute.xlu1 %v7120_v59 }
0x1728   : > { %5312 = vperm.xlu1 %6919, %v5213_v49  }
0x172b   : > { %6923 = vset.pattern.permute.xlu0 %v7122_v3 }
0x172c   : > { %5354 = vperm.xlu0 %6923, %v8027_v37   ;;  %5316 = vperm.xlu1 %6919, %v8027_v37  }
0x1730   : > { %6920 = vset.pattern.permute.xlu1 %v7118_v21  ;;  %6925 = vset.pattern.permute.xlu0 %v7123_v4 }
0x1731   : > { %5266 = vperm.xlu1 %6920, %v8027_v37  }
0x1735   : > { %6922 = vset.pattern.permute.xlu1 %v7122_v3 }
0x1736   : > { %5350 = vperm.xlu1 %6922, %v5213_v49  }
0x173a   : > { %6924 = vset.pattern.permute.xlu1 %v7123_v4 }
0x173b   : > { %5243 = vperm.xlu1 %6924, %v5213_v49  }
0x173f   : > { %6926 = vset.pattern.permute.xlu1 %v7124_v47 }
0x17a1   : > { %v5229_v59 = vpop.permute.xlu0 %5228 }
0x17a2   : > { %v5232_v30 = vmul.f32 %v7309_v8, %v5229_v59  ;;  %v5224_v42 = vpop.permute.xlu1 %5223 }
0x17a3   : > { %v5231_v15 = vmul.f32 %v7311_v10, %v5224_v42 }
0x17a4   : > { %v5234_v1 = vsel %vm539_vm2, %v5232_v30, 0.0 }
0x17a5   : > { %v5233_v13 = vsel %vm539_vm2, %v5231_v15, 0.0 }
0x17a6   : > { %v5235_v17 = vadd.f32 %v5234_v1, %v5233_v13  ;;  %v5263_v32 = vpop.permute.xlu0 %5262 }
0x17a7   : > { %v5313_v39 = vpop.permute.xlu1 %5312 }
0x17a8   : > { %v5236_v61 = vrot.slane %v5235_v17, 4  ;;  %v5319_v9 = vmul.f32 %v7311_v10, %v5313_v39 }
0x17aa   : > { %v5237_v3 = vadd.f32 %v5236_v61, %v5235_v17  ;;  %v5321_v45 = vsel %vm539_vm2, %v5319_v9, 0.0 }
0x17ab   : > { %v5317_v4 = vpop.permute.xlu1 %5316  ;;  %v5355_v41 = vpop.permute.xlu0 %5354 }
0x17ac   : > { %v5238_v11 = vrot.slane %v5237_v3, 2  ;;  %v5320_v47 = vmul.f32 %v7309_v8, %v5317_v4 }
0x17ae   : > { %v5239_v62 = vadd.f32 %v5238_v11, %v5237_v3  ;;  %v5322_v38 = vsel %vm539_vm2, %v5320_v47, 0.0 }
0x17af   : > { %v5323_v55 = vadd.f32 %v5322_v38, %v5321_v45 }
0x17b0   : > { %v5240_v53 = vrot.slane %v5239_v62, 1  ;;  %v5267_v51 = vpop.permute.xlu1 %5266 }
0x17b1   : > { %v5324_v26 = vrot.slane %v5323_v55, 4 }
0x17b2   : > { %v5241_v40 = vadd.f32 %v5240_v53, %v5239_v62 }
0x17b3   : > { %v5325_v31 = vadd.f32 %v5324_v26, %v5323_v55 }
0x17b4   : > { %v5269_v44 = vmul.f32 %v5263_v32, %v5241_v40  ;;  %v5270_v36 = vmul.f32 %v5267_v51, %v5241_v40 }
0x17b5   : > { %v5326_v35 = vrot.slane %v5325_v31, 2  ;;  %v5351_v14 = vpop.permute.xlu1 %5350 }
0x17b6   : > { %v5271_v18 = vsel %vm539_vm2, %v5269_v44, -inf  ;;  %v5274_v58 = vsel %vm539_vm2, %v5270_v36, -inf }
0x17b7   : > { %v5327_v54 = vadd.f32 %v5326_v35, %v5325_v31  ;;  %5272 = vmax.xlane.f32.xlu1 %v5271_v18  ;;  %5275 = vmax.xlane.f32.xlu0 %v5274_v58 }
0x17b9   : > { %v5328_v63 = vrot.slane %v5327_v54, 1 }
0x17ba   : > { %v5244_v28 = vpop.permute.xlu1 %5243 }
0x17bb   : > { %v5329_v2 = vadd.f32 %v5328_v63, %v5327_v54  ;;  %v5250_v1 = vmul.f32 %v7311_v10, %v5244_v28 }
0x17bd   : > { %v5357_v46 = vmul.f32 %v5351_v14, %v5329_v2  ;;  %v5358_v0 = vmul.f32 %v5355_v41, %v5329_v2  ;;  %v5252_v11 = vsel %vm539_vm2, %v5250_v1, 0.0 }
0x17bf   : > { %v5362_v33 = vsel %vm539_vm2, %v5358_v0, -inf  ;;  %v5359_v25 = vsel %vm539_vm2, %v5357_v46, -inf }
0x17c0   : > { %5363 = vmax.xlane.f32.xlu0 %v5362_v33  ;;  %5360 = vmax.xlane.f32.xlu1 %v5359_v25 }
0x17d1   : > { %5331 = vperm.xlu1 %6926, %v5213_v49  }
0x17d5   : > { %5335 = vperm.xlu1 %6926, %v8027_v37  }
0x17d6   : > { %5247 = vperm.xlu0 %6925, %v8027_v37  }
0x17d9   : > { %6927 = vset.pattern.permute.xlu1 %v7118_v21 }
0x17da   : > { %6928 = vset.pattern.permute.xlu0 %v7118_v21 }
0x1844   : > { %v5276_v52 = vpop.xlane.xlu0 %5275  ;;  %v5273_v43 = vpop.xlane.xlu1 %5272 }
0x1845   : > { %v5278_v27 = vsub.f32 %v5270_v36, %v5276_v52  ;;  %v5277_v60 = vsub.f32 %v5269_v44, %v5273_v43 }
0x1847   : > { %v5281_v23 = vmul.f32 1.442695, %v5278_v27  ;;  %v5279_v56 = vmul.f32 1.442695, %v5277_v60 }
0x1849   : > { %7021 = vpow2.f32 %v5281_v23 }
0x184a   : > { %7023 = vpow2.f32 %v5279_v56  ;;  %v6776_v56 = vld [vmem:[%s8223_s3 + $0x6] sm:$0x3] }
0x184d   : > { %v5364_v29 = vpop.xlane.xlu0 %5363  ;;  %v5361_v34 = vpop.xlane.xlu1 %5360 }
0x184e   : > { %v5366_v24 = vsub.f32 %v5358_v0, %v5364_v29  ;;  %v5365_v49 = vsub.f32 %v5357_v46, %v5361_v34  ;;  %v5392_v34 = vrot.slane %v6776_v56, %v7307_v6 }
0x1850   : > { %v5367_v59 = vmul.f32 1.442695, %v5365_v49  ;;  %v5369_v30 = vmul.f32 1.442695, %v5366_v24  ;;  %v5306_v24 = vrot.slane %v6776_v56, %v7300_v5 }
0x1851   : > { %v5332_v37 = vpop.permute.xlu1 %5331 }
0x1852   : > { %7025 = vpow2.f32 %v5367_v59  ;;  %v5338_v13 = vmul.f32 %v7311_v10, %v5332_v37 }
0x1853   : > { %v7022_v42 = vpop.eup %7021  ;;  %7027 = vpow2.f32 %v5369_v30 }
0x1854   : > { %v7024_v15 = vpop.eup %7023  ;;  %v5286_v17 = vsel %vm539_vm2, %v7022_v42, 0.0  ;;  %v5340_v47 = vsel %vm539_vm2, %v5338_v13, 0.0 }
0x1855   : > { %5287 = vadd.xlane.f32.xlu0 %v5286_v17  ;;  %v5248_v39 = vpop.permute.xlu0 %5247  ;;  %v5283_v61 = vsel %vm539_vm2, %v7024_v15, 0.0  ;;  %v5336_v3 = vpop.permute.xlu1 %5335 }
0x1856   : > { %v5251_v9 = vmul.f32 %v7309_v8, %v5248_v39  ;;  %5284 = vadd.xlane.f32.xlu1 %v5283_v61  ;;  %v5339_v4 = vmul.f32 %v7309_v8, %v5336_v3  ;;  %v6778_v61 = vld [vmem:[%s8224_s4 + $0x3] ss:$0 sm:$0xff] }
0x1858   : > { %v5253_v62 = vsel %vm539_vm2, %v5251_v9, 0.0  ;;  %v5341_v10 = vsel %vm539_vm2, %v5339_v4, 0.0 }
0x1859   : > { %v5254_v45 = vadd.f32 %v5253_v62, %v5252_v11  ;;  %v5342_v38 = vadd.f32 %v5341_v10, %v5340_v47 }
0x185b   : > { %v5255_v55 = vrot.slane %v5254_v45, 4  ;;  %v5343_v53 = vrot.slane %v5342_v38, 4 }
0x185c   : > { %v7026_v26 = vpop.eup %7025 }
0x185d   : > { %v5256_v40 = vadd.f32 %v5255_v55, %v5254_v45  ;;  %v5344_v32 = vadd.f32 %v5343_v53, %v5342_v38  ;;  %v5371_v31 = vsel %vm539_vm2, %v7026_v26, 0.0  ;;  %v7028_v51 = vpop.eup %7027 }
0x185e   : > { %5372 = vadd.xlane.f32.xlu1 %v5371_v31  ;;  %v5374_v18 = vsel %vm539_vm2, %v7028_v51, 0.0 }
0x185f   : > { %v5257_v44 = vrot.slane %v5256_v40, 2  ;;  %v5345_v8 = vrot.slane %v5344_v32, 2 }
0x1861   : > { %v5258_v36 = vadd.f32 %v5257_v44, %v5256_v40  ;;  %v5346_v35 = vadd.f32 %v5345_v8, %v5344_v32 }
0x1862   : > { %5375 = vadd.xlane.f32.xlu1 %v5374_v18 }
0x1863   : > { %v5259_v58 = vrot.slane %v5258_v36, 1  ;;  %v5347_v54 = vrot.slane %v5346_v35, 1 }
0x1865   : > { %v5260_v63 = vadd.f32 %v5259_v58, %v5258_v36  ;;  %v5348_v2 = vadd.f32 %v5347_v54, %v5346_v35 }
0x1867   : > { %v5289_v41 = vmul.f32 %v7024_v15, %v5260_v63  ;;  %v5377_v14 = vmul.f32 %v7026_v26, %v5348_v2  ;;  %v5290_v33 = vmul.f32 %v7022_v42, %v5260_v63  ;;  %v5378_v28 = vmul.f32 %v7028_v51, %v5348_v2  ;;  %v6783_v2 = vld [vmem:[%s8229_s9 + $0x30] sm:$0xff] }
0x1869   : > { %v5291_v46 = vsel %vm539_vm2, %v5289_v41, 0.0  ;;  %v5379_v0 = vsel %vm539_vm2, %v5377_v14, 0.0  ;;  %v5294_v25 = vsel %vm539_vm2, %v5290_v33, 0.0  ;;  %v5382_v52 = vsel %vm539_vm2, %v5378_v28, 0.0 }
0x186a   : > { %5292 = vadd.xlane.f32.xlu1 %v5291_v46  ;;  %5380 = vadd.xlane.f32.xlu0 %v5379_v0  ;;  %v5573_v41 = vrot.slane %v6783_v2, %v7429_v48 }
0x186c   : > { %v5581_v46 = vcombine.high %v5573_v41, %v5573_v41  ;;  %v5589_v33 = vrot.slane %v5573_v41, %v7429_v48 }
0x186e   : > { %5295 = vadd.xlane.f32.xlu1 %v5294_v25  ;;  %v5603_v0 = vrot.slane %v5581_v46, %v7429_v48  ;;  %v5611_v28 = vcombine.high %v5589_v33, %v5589_v33 }
0x1870   : > { %6785 = vmatprep.subr.msk.bf16.mxu0 %vm1159_vm6, %v5603_v0  ;;  %v5613_v25 = vcombine.high %v5603_v0, %v5603_v0 }
0x1872   : > { %5383 = vadd.xlane.f32.xlu1 %v5382_v52  ;;  %v5566_v52 = vcombine.high %v6783_v2, %v6783_v2  ;;  %6787 = vmatprep.subr.msk.bf16.mxu1 %vm1159_vm6, %v5613_v25  ;;  %v6108_v2 = vld [vmem:[#allocation5 + $0x30] sm:$0xff] }
0x1873   : > { %v6127_v41 = vrot.slane %v6108_v2, %v7429_v48  ;;  %v6120_v25 = vcombine.high %v6108_v2, %v6108_v2 }
0x1875   : > { %v6143_v0 = vrot.slane %v6127_v41, %v7429_v48 }
0x18e2   : > { %v5288_v60 = vpop.xlane.xlu0 %5287 }
0x18e3   : > { %v5285_v43 = vpop.xlane.xlu1 %5284 }
0x18e4   : > { %7029 = vrcp.f32 %v5285_v43  ;;  %v5668_v43 = vsel %vm1159_vm6, %v5589_v33, 0 }
0x18e5   : > { %5716 = vmatpush1.bf16.msra.mxu0 %v5668_v43 }
0x18eb   : > { %v5373_v27 = vpop.xlane.xlu1 %5372 }
0x18ec   : > { %7031 = vrcp.f32 %v5373_v27  ;;  %v5674_v27 = vsel %vm1159_vm6, %v5611_v28, 0  ;;  %v6165_v28 = vcombine.high %v6143_v0, %v6143_v0 }
0x18ed   : > { %7033 = vrcp.f32 %v5288_v60  ;;  %v5580_v60 = vrot.slane %v5566_v52, %v7429_v48  ;;  %5759 = vmatpush1.bf16.msra.mxu1 %v5674_v27 }
0x18ee   : > { %v7030_v29 = vpop.eup %7029 }
0x18ef   : > { %v5376_v23 = vpop.xlane.xlu1 %5375 }
0x18f0   : > { %7035 = vrcp.f32 %v5376_v23  ;;  %v5582_v23 = vcombine.high %v5580_v60, %v5580_v60 }
0x18f2   : > { %v5610_v56 = vrot.slane %v5582_v23, %v7429_v48  ;;  %v5480_v23 = vld [vmem:[#allocation3 + $0x30] sm:$0xff] }
0x18f4   : > { %6789 = vmatprep.subr.msk.bf16.mxu0 %vm1159_vm6, %v5610_v56 }
0x18f6   : > { %v7032_v49 = vpop.eup %7031 }
0x18f7   : > { %v5381_v59 = vpop.xlane.xlu0 %5380  ;;  %v5293_v30 = vpop.xlane.xlu1 %5292 }
0x18f8   : > { %v5387_v37 = vmul.f32 %v7032_v49, %v5381_v59  ;;  %v5299_v42 = vmul.f32 %v7030_v29, %v5293_v30  ;;  %v7034_v39 = vpop.eup %7033  ;;  %v5614_v29 = vcombine.high %v5610_v56, %v5610_v56 }
0x18fa   : > { %v5393_v15 = vmul.f32 %v5392_v34, %v5387_v37  ;;  %v5307_v1 = vmul.f32 %v5306_v24, %v5299_v42  ;;  %v7036_v4 = vpop.eup %7035  ;;  %6791 = vmatprep.subr.msk.bf16.mxu1 %vm1159_vm6, %v5614_v29  ;;  %v5487_v29 = vrot.slane %v5480_v23, %v7300_v5 }
0x18fb   : > { %v5296_v13 = vpop.xlane.xlu1 %5295 }
0x18fc   : > { %v5395_v17 = vadd.f32 %v5393_v15, %v5307_v1  ;;  %v5300_v9 = vmul.f32 %v7034_v39, %v5296_v13  ;;  %v6781_v15 = vld [vmem:[%s8227_s7 + $0x3] ss:$0 sm:$0xff]  ;;  %v5596_v13 = vrot.slane %v5580_v60, %v7429_v48  ;;  %v6109_v60 = vld [vmem:[#allocation5 + $0x38] sm:$0xff] }
0x18fd   : > { %v8157_v56 = vrot.slane %v6109_v60, %v7429_v48 }
0x18fe   : > { %v5397_v3 = vadd.f32 %v5395_v17, %v7993_v50  ;;  %v5308_v10 = vmul.f32 %v5306_v24, %v5300_v9  ;;  %v6784_v24 = vld [vmem:[%s8229_s9 + $0x38] sm:$0xff] }
0x18ff   : > { %v5384_v11 = vpop.xlane.xlu1 %5383  ;;  %v5622_v37 = vrot.slane %v6784_v24, %v7429_v48 }
0x1900   : > { %v8082_v47 = vadd.f32 %v6778_v61, %v5397_v3  ;;  %v5388_v62 = vmul.f32 %v7036_v4, %v5384_v11  ;;  %v6782_v4 = vld [vmem:[%s8228_s8 + $0x3] ss:$0 sm:$0xff] }
0x1901   : > { %v5630_v39 = vcombine.high %v5622_v37, %v5622_v37 }
0x1902   : > { %v5394_v45 = vmul.f32 %v5392_v34, %v5388_v62  ;;  %5415 = vrot.lane.b32.xlu0 %v8082_v47, %s7119_s24  ;;  %v5612_v62 = vcombine.high %v5596_v13, %v5596_v13 }
0x1904   : > { %v5396_v38 = vadd.f32 %v5394_v45, %v5308_v10  ;;  %v5652_v10 = vrot.slane %v5630_v39, %v7429_v48  ;;  %v5503_v39 = vrot.slane %v5480_v23, %v7504_v16 }
0x1906   : > { %v5398_v55 = vadd.f32 %v5396_v38, %v7996_v57 }
0x1908   : > { %v8087_v53 = vadd.f32 %v6778_v61, %v5398_v55  ;;  %v5615_v61 = vcombine.high %v6784_v24, %v6784_v24  ;;  %v5491_v24 = vrot.slane %v5480_v23, %v7307_v6 }
0x190a   : > { %5417 = vrot.lane.b32.xlu1 %v8087_v53, %s7119_s24  ;;  %v5629_v45 = vrot.slane %v5615_v61, %v7429_v48 }
0x1974   : > { %v5416_v50 = vpop.permute.xlu0 %5415 }
0x1975   : > { %v5421_v26 = vadd.f32 %v5416_v50, %v8082_v47  ;;  %v5425_v40 = vsub.f32 %v8082_v47, %v5416_v50 }
0x1977   : > { %v5423_v32 = vmul.f32 0.5, %v5421_v26  ;;  %v5427_v31 = vmul.f32 %v5425_v40, %v5425_v40  ;;  %v5680_v26 = vsel %vm1159_vm6, %v5596_v13, 0  ;;  %v5686_v40 = vsel %vm1159_vm6, %v5612_v62, 0 }
0x1978   : > { %v5507_v62 = vrot.slane %v5480_v23, %v7512_v20 }
0x1979   : > { %v5429_v51 = vmul.f32 0.25, %v5427_v31  ;;  %5437 = vperm.xlu1 %6927, %v5423_v32   ;;  %v5638_v32 = vrot.slane %v5622_v37, %v7429_v48  ;;  %v5662_v31 = vcombine.high %v5652_v10, %v5652_v10  ;;  %v6184_v37 = vcombine.high %v8157_v56, %v8157_v56 }
0x197b   : > { %v5431_v44 = vadd.f32 1e-05, %v5429_v51  ;;  %v5631_v51 = vcombine.high %v5629_v45, %v5629_v45 }
0x197c   : > { %v5418_v8 = vpop.permute.xlu1 %5417 }
0x197d   : > { %7037 = vrsqrt.f32 %v5431_v44  ;;  %v5422_v36 = vadd.f32 %v5418_v8, %v8087_v53  ;;  %v5426_v57 = vsub.f32 %v8087_v53, %v5418_v8  ;;  %v5660_v44 = vcombine.high %v5638_v32, %v5638_v32 }
0x197e   : > { %v5659_v8 = vrot.slane %v5631_v51, %v7429_v48  ;;  %v6206_v51 = vrot.slane %v6184_v37, %v7429_v48 }
0x197f   : > { %v5424_v35 = vmul.f32 0.5, %v5422_v36  ;;  %v5428_v18 = vmul.f32 %v5426_v57, %v5426_v57  ;;  %v5692_v36 = vsel %vm1159_vm6, %v5638_v32, 0  ;;  %v5698_v57 = vsel %vm1159_vm6, %v5660_v44, 0 }
0x1981   : > { %v5430_v58 = vmul.f32 0.25, %v5428_v18  ;;  %5442 = vperm.xlu1 %6927, %v5424_v35   ;;  %v5645_v35 = vrot.slane %v5629_v45, %v7429_v48  ;;  %v5663_v18 = vcombine.high %v5659_v8, %v5659_v8 }
0x1983   : > { %v5432_v54 = vadd.f32 1e-05, %v5430_v58  ;;  %v5661_v58 = vcombine.high %v5645_v35, %v5645_v35 }
0x1985   : > { %7039 = vrsqrt.f32 %v5432_v54  ;;  %v5704_v54 = vsel %vm1159_vm6, %v5645_v35, 0 }
0x1987   : > { %v7038_v63 = vpop.eup %7037 }
0x1988   : > { %5449 = vperm.xlu0 %6928, %v7038_v63   ;;  %v5710_v63 = vsel %vm1159_vm6, %v5661_v58, 0 }
0x198f   : > { %v7040_v14 = vpop.eup %7039 }
0x1990   : > { %5454 = vperm.xlu1 %6927, %v7040_v14   ;;  %v6135_v14 = vcombine.high %v6127_v41, %v6127_v41 }
0x1992   : > { %v6157_v46 = vrot.slane %v6135_v14, %v7429_v48 }
0x1994   : > { %v6167_v33 = vcombine.high %v6157_v46, %v6157_v46 }
0x19f8   : > { %v5438_v34 = vpop.permute.xlu1 %5437 }
0x19f9   : > { %v5445_v59 = vsub.f32 %v8082_v47, %v5438_v34  ;;  %v5495_v34 = vrot.slane %v5480_v23, %v7493_v7 }
0x1a00   : > { %v5443_v30 = vpop.permute.xlu1 %5442 }
0x1a01   : > { %v5446_v1 = vsub.f32 %v8087_v53, %v5443_v30 }
0x1a07   : > { %v5450_v49 = vpop.permute.xlu0 %5449 }
0x1a08   : > { %v5457_v42 = vmul.f32 %v5450_v49, %v5445_v59  ;;  %v5499_v49 = vrot.slane %v5480_v23, %v7496_v12 }
0x1a0a   : > { %v5465_v3 = vmul.f32 %v6781_v15, %v5457_v42  ;;  %v6169_v42 = vcombine.high %v6109_v60, %v6109_v60 }
0x1a0c   : > { %v5473_v38 = vadd.f32 %v6782_v4, %v5465_v3  ;;  %v8174_v44 = vrot.slane %v6169_v42, %v7429_v48 }
0x1a0f   : > { %v5455_v17 = vpop.permute.xlu1 %5454 }
0x1a10   : > { %v5458_v9 = vmul.f32 %v5455_v17, %v5446_v1 }
0x1a12   : > { %v5466_v11 = vmul.f32 %v6781_v15, %v5458_v9 }
0x1a14   : > { %v5474_v55 = vadd.f32 %v6782_v4, %v5466_v11  ;;  %v5511_v11 = vrot.slane %v5480_v23, %v7509_v19 }
0x1a16   : > { %v5475_v50 = vpack.c.bf16 %v5474_v55, %v5473_v38 }
0x1a18   : > { %6786 = vmatmul.mubr.msk.bf16.vlgmr.msra.gmra.mrb[100].mxu0 %vm633_vm5, %v5475_v50  ;;  %6788 = vmatmul.mubr.msk.bf16.vlgmr.msra.gmra.mrb[100].mxu1 %vm633_vm5, %v5475_v50 }
0x1a19   : > { %5802 = vmatpush1.bf16.msra.mxu0 %v5680_v26  ;;  %5845 = vmatpush1.bf16.msra.mxu1 %v5686_v40 }
0x1a1a   : > { %5833 = vmatprep.mubr.bf16.mxu0 %v7118_v21  ;;  %5876 = vmatprep.mubr.bf16.mxu1 %v7118_v21 }
0x1a1b   : > { %6793 = vmatprep.subr.msk.bf16.mxu0 %vm1159_vm6, %v5652_v10  ;;  %6795 = vmatprep.subr.msk.bf16.mxu1 %vm1159_vm6, %v5662_v31  ;;  %v8170_v31 = vld [vmem:[#allocation3 + $0x38] sm:$0xff] }
0x1a20   : > { %6790 = vmatmul.mubr.msk.bf16.vlgmr.msra.gmra.mrb[104].mxu0 %vm633_vm5, %v5475_v50  ;;  %6792 = vmatmul.mubr.msk.bf16.vlgmr.msra.gmra.mrb[104].mxu1 %vm633_vm5, %v5475_v50 }
0x1a21   : > { %5888 = vmatpush1.bf16.msra.mxu0 %v5692_v36  ;;  %5931 = vmatpush1.bf16.msra.mxu1 %v5698_v57 }
0x1a22   : > { %5919 = vmatprep.mubr.bf16.mxu0 %v7118_v21  ;;  %5962 = vmatprep.mubr.bf16.mxu1 %v7118_v21 }
0x1a23   : > { %6797 = vmatprep.subr.msk.bf16.mxu0 %vm1159_vm6, %v5659_v8  ;;  %6799 = vmatprep.subr.msk.bf16.mxu1 %vm1159_vm6, %v5663_v18 }
0x1a28   : > { %6794 = vmatmul.mubr.msk.bf16.vlgmr.msra.gmra.mrb[108].mxu0 %vm633_vm5, %v5475_v50  ;;  %6796 = vmatmul.mubr.msk.bf16.vlgmr.msra.gmra.mrb[108].mxu1 %vm633_vm5, %v5475_v50 }
0x1a29   : > { %5974 = vmatpush1.bf16.msra.mxu0 %v5704_v54  ;;  %6017 = vmatpush1.bf16.msra.mxu1 %v5710_v63 }
0x1a2a   : > { %6005 = vmatprep.mubr.bf16.mxu0 %v7118_v21  ;;  %6048 = vmatprep.mubr.bf16.mxu1 %v7118_v21  ;;  %v6134_v21 = vrot.slane %v6120_v25, %v7429_v48 }
0x1a2b   : > { %6234 = vmatprep.subr.bf16.mxu0 %v6157_v46  ;;  %6275 = vmatprep.subr.bf16.mxu1 %v6167_v33  ;;  %v8178_v46 = vrot.slane %v8170_v31, %v7300_v5 }
0x1a2c   : > { %v6136_v52 = vcombine.high %v6134_v21, %v6134_v21  ;;  %v6150_v26 = vrot.slane %v6134_v21, %v7429_v48  ;;  %v5527_v21 = vrot.slane %v8170_v31, %v7493_v7  ;;  %v5531_v7 = vrot.slane %v8170_v31, %v7496_v12 }
0x1a2e   : > { %v6164_v43 = vrot.slane %v6136_v52, %v7429_v48  ;;  %v6166_v14 = vcombine.high %v6150_v26, %v6150_v26  ;;  %v6185_v52 = vcombine.high %v8174_v44, %v8174_v44 }
0x1a30   : > { %6798 = vmatmul.mubr.msk.bf16.vlgmr.msra.gmra.mrb[112].mxu0 %vm633_vm5, %v5475_v50  ;;  %6800 = vmatmul.mubr.msk.bf16.vlgmr.msra.gmra.mrb[112].mxu1 %vm633_vm5, %v5475_v50  ;;  %v6168_v27 = vcombine.high %v6164_v43, %v6164_v43  ;;  %v5515_v50 = vrot.slane %v5480_v23, %v7515_v22 }
0x1a32   : > { %6235 = vmatpush1.bf16.xpose.msra.mxu0 %v6143_v0  ;;  %6276 = vmatpush1.bf16.xpose.msra.mxu1 %v6165_v28 }
0x1a33   : > { %6316 = vmatprep.subr.bf16.mxu0 %v6164_v43  ;;  %6357 = vmatprep.subr.bf16.mxu1 %v6168_v27 }
0x1aeb   : > { %v5749_v59 = vpop.f32.mrb[100].mxu0  ;;  %v5792_v30 = vpop.f32.mrb[100].mxu1 }
0x1aec   : > { %v5750_v15 = vadd.f32 %v5749_v59, %v5487_v29  ;;  %v5793_v1 = vadd.f32 %v5792_v30, %v5495_v34  ;;  %v5751_v13 = vpop.f32.mrb[101].mxu0  ;;  %v5794_v17 = vpop.f32.mrb[101].mxu1 }
0x1aed   : > { %v5752_v61 = vadd.f32 %v5751_v13, %v5491_v24  ;;  %v5795_v3 = vadd.f32 %v5794_v17, %v5499_v49  ;;  %v5753_v9 = vpop.f32.mrb[102].mxu0  ;;  %v5796_v4 = vpop.f32.mrb[102].mxu1  ;;  %v6213_v17 = vrot.slane %v6185_v52, %v7429_v48 }
0x1aee   : > { %v5754_v10 = vadd.f32 %v5753_v9, %v5487_v29  ;;  %v5797_v45 = vadd.f32 %v5796_v4, %v5495_v34  ;;  %v5755_v38 = vpop.f32.mrb[103].mxu0  ;;  %v5798_v55 = vpop.f32.mrb[103].mxu1  ;;  %v6059_v8 = vmax.f32 %v5750_v15, 0.0  ;;  %v6061_v36 = vmax.f32 %v5793_v1, 0.0 }
0x1aef   : > { %v5756_v40 = vadd.f32 %v5755_v38, %v5491_v24  ;;  %v5799_v32 = vadd.f32 %v5798_v55, %v5499_v49  ;;  %v6060_v18 = vmax.f32 %v5752_v61, 0.0  ;;  %v6062_v58 = vmax.f32 %v5795_v3, 0.0 }
0x1af0   : > { %v6075_v57 = vmax.f32 %v5754_v10, 0.0  ;;  %v6077_v35 = vmax.f32 %v5797_v45, 0.0  ;;  %v5523_v29 = vrot.slane %v8170_v31, %v7307_v6  ;;  %v6216_v34 = vcombine.high %v6206_v51, %v6206_v51 }
0x1af1   : > { %v6076_v54 = vmax.f32 %v5756_v40, 0.0  ;;  %v6078_v63 = vmax.f32 %v5799_v32, 0.0  ;;  %v6192_v1 = vrot.slane %v8157_v56, %v7429_v48  ;;  %v5535_v40 = vrot.slane %v8170_v31, %v7504_v16 }
0x1af2   : > { %v6091_v2 = vpack.c.bf16 %v6075_v57, %v6059_v8  ;;  %v6093_v41 = vpack.c.bf16 %v6077_v35, %v6061_v36  ;;  %v5543_v57 = vrot.slane %v8170_v31, %v7509_v19  ;;  %v6217_v35 = vcombine.high %v6213_v17, %v6213_v17 }
0x1af3   : > { %v6092_v0 = vpack.c.bf16 %v6076_v54, %v6060_v18  ;;  %v6094_v33 = vpack.c.bf16 %v6078_v63, %v6062_v58  ;;  %v5835_v25 = vpop.f32.mrb[104].mxu0  ;;  %v5878_v28 = vpop.f32.mrb[104].mxu1  ;;  %v5547_v19 = vrot.slane %v8170_v31, %v7515_v22 }
0x1af4   : > { %v5836_v43 = vadd.f32 %v5835_v25, %v5503_v39  ;;  %v5879_v27 = vadd.f32 %v5878_v28, %v5511_v11  ;;  %v5837_v60 = vpop.f32.mrb[105].mxu0  ;;  %v5880_v23 = vpop.f32.mrb[105].mxu1  ;;  %v6199_v28 = vrot.slane %v8174_v44, %v7429_v48 }
0x1af5   : > { %v5838_v5 = vadd.f32 %v5837_v60, %v5507_v62  ;;  %v5881_v24 = vadd.f32 %v5880_v23, %v5515_v50  ;;  %v5839_v49 = vpop.f32.mrb[106].mxu0  ;;  %v5882_v59 = vpop.f32.mrb[106].mxu1  ;;  %6266 = vmatprep.mubr.bf16.mxu0 %v6092_v0  ;;  %6307 = vmatprep.mubr.bf16.mxu1 %v6094_v33 }
0x1af6   : > { %v5840_v30 = vadd.f32 %v5839_v49, %v5503_v39  ;;  %v5883_v37 = vadd.f32 %v5882_v59, %v5511_v11  ;;  %v5841_v42 = vpop.f32.mrb[107].mxu0  ;;  %v5884_v15 = vpop.f32.mrb[107].mxu1  ;;  %6267 = vmatmul.mubr.bf16.vlgmr.msra.gmra.mrb[116].mxu0 %v6091_v2  ;;  %6308 = vmatmul.mubr.bf16.vlgmr.msra.gmra.mrb[116].mxu1 %v6093_v41  ;;  %v6063_v61 = vmax.f32 %v5836_v43, 0.0  ;;  %v6065_v3 = vmax.f32 %v5879_v27, 0.0 }
0x1af7   : > { %v5842_v6 = vadd.f32 %v5841_v42, %v5507_v62  ;;  %v5885_v13 = vadd.f32 %v5884_v15, %v5515_v50  ;;  %6317 = vmatpush1.bf16.xpose.msra.mxu0 %v6150_v26  ;;  %6358 = vmatpush1.bf16.xpose.msra.mxu1 %v6166_v14  ;;  %v6064_v12 = vmax.f32 %v5838_v5, 0.0  ;;  %v6066_v39 = vmax.f32 %v5881_v24, 0.0 }
0x1af8   : > { %v6079_v9 = vmax.f32 %v5840_v30, 0.0  ;;  %v6081_v4 = vmax.f32 %v5883_v37, 0.0  ;;  %6398 = vmatprep.subr.bf16.mxu0 %v6206_v51  ;;  %6439 = vmatprep.subr.bf16.mxu1 %v6216_v34  ;;  %v6214_v26 = vcombine.high %v6192_v1, %v6192_v1  ;;  %v5539_v2 = vrot.slane %v8170_v31, %v7512_v20 }
0x1af9   : > { %v6080_v11 = vmax.f32 %v5842_v6, 0.0  ;;  %v6082_v10 = vmax.f32 %v5885_v13, 0.0  ;;  %v6215_v49 = vcombine.high %v6199_v28, %v6199_v28 }
0x1afa   : > { %v6095_v45 = vpack.c.bf16 %v6079_v9, %v6063_v61  ;;  %v6097_v38 = vpack.c.bf16 %v6081_v4, %v6065_v3 }
0x1afb   : > { %v6096_v55 = vpack.c.bf16 %v6080_v11, %v6064_v12  ;;  %v6098_v56 = vpack.c.bf16 %v6082_v10, %v6066_v39  ;;  %v5921_v62 = vpop.f32.mrb[108].mxu0  ;;  %v5964_v50 = vpop.f32.mrb[108].mxu1 }
0x1afc   : > { %v5922_v32 = vadd.f32 %v5921_v62, %v8178_v46  ;;  %v5965_v8 = vadd.f32 %v5964_v50, %v5527_v21  ;;  %v5923_v36 = vpop.f32.mrb[109].mxu0  ;;  %v5966_v51 = vpop.f32.mrb[109].mxu1 }
0x1afd   : > { %v5924_v18 = vadd.f32 %v5923_v36, %v5523_v29  ;;  %v5967_v58 = vadd.f32 %v5966_v51, %v5531_v7  ;;  %v5925_v54 = vpop.f32.mrb[110].mxu0  ;;  %v5968_v63 = vpop.f32.mrb[110].mxu1  ;;  %6348 = vmatprep.mubr.bf16.mxu0 %v6096_v55  ;;  %6389 = vmatprep.mubr.bf16.mxu1 %v6098_v56 }
0x1afe   : > { %v5926_v16 = vadd.f32 %v5925_v54, %v8178_v46  ;;  %v5969_v41 = vadd.f32 %v5968_v63, %v5527_v21  ;;  %v5927_v14 = vpop.f32.mrb[111].mxu0  ;;  %v5970_v0 = vpop.f32.mrb[111].mxu1  ;;  %6349 = vmatmul.mubr.bf16.vlgmr.msra.gmra.mrb[120].mxu0 %v6095_v45  ;;  %6390 = vmatmul.mubr.bf16.vlgmr.msra.gmra.mrb[120].mxu1 %v6097_v38  ;;  %v6067_v52 = vmax.f32 %v5922_v32, 0.0  ;;  %v6069_v43 = vmax.f32 %v5965_v8, 0.0 }
0x1aff   : > { %v5928_v33 = vadd.f32 %v5927_v14, %v5523_v29  ;;  %v5971_v25 = vadd.f32 %v5970_v0, %v5531_v7  ;;  %6399 = vmatpush1.bf16.xpose.msra.mxu0 %v6192_v1  ;;  %6440 = vmatpush1.bf16.xpose.msra.mxu1 %v6214_v26  ;;  %v6068_v46 = vmax.f32 %v5924_v18, 0.0  ;;  %v6070_v21 = vmax.f32 %v5967_v58, 0.0  ;;  %v6802_v26 = vld [vmem:[%s8232_s12 + $0x3] ss:$0 sm:$0xff] }
0x1b00   : > { %v6083_v20 = vmax.f32 %v5926_v16, 0.0  ;;  %v6085_v27 = vmax.f32 %v5969_v41, 0.0  ;;  %6480 = vmatprep.subr.bf16.mxu0 %v6213_v17  ;;  %6521 = vmatprep.subr.bf16.mxu1 %v6217_v35 }
0x1b01   : > { %v6084_v60 = vmax.f32 %v5928_v33, 0.0  ;;  %v6086_v23 = vmax.f32 %v5971_v25, 0.0 }
0x1b02   : > { %v6099_v34 = vpack.c.bf16 %v6083_v20, %v6067_v52  ;;  %v6101_v5 = vpack.c.bf16 %v6085_v27, %v6069_v43 }
0x1b03   : > { %v6100_v22 = vpack.c.bf16 %v6084_v60, %v6068_v46  ;;  %v6102_v31 = vpack.c.bf16 %v6086_v23, %v6070_v21  ;;  %v6007_v29 = vpop.f32.mrb[112].mxu0  ;;  %v6050_v24 = vpop.f32.mrb[112].mxu1 }
0x1b04   : > { %v6008_v59 = vadd.f32 %v6007_v29, %v5535_v40  ;;  %v6051_v7 = vadd.f32 %v6050_v24, %v5543_v57  ;;  %v6009_v48 = vpop.f32.mrb[113].mxu0  ;;  %v6052_v44 = vpop.f32.mrb[113].mxu1 }
0x1b05   : > { %v6010_v30 = vadd.f32 %v6009_v48, %v5539_v2  ;;  %v6053_v37 = vadd.f32 %v6052_v44, %v5547_v19  ;;  %v6011_v42 = vpop.f32.mrb[114].mxu0  ;;  %v6054_v15 = vpop.f32.mrb[114].mxu1  ;;  %6430 = vmatprep.mubr.bf16.mxu0 %v6100_v22  ;;  %6471 = vmatprep.mubr.bf16.mxu1 %v6102_v31 }
0x1b06   : > { %v6012_v1 = vadd.f32 %v6011_v42, %v5535_v40  ;;  %v6055_v6 = vadd.f32 %v6054_v15, %v5543_v57  ;;  %v6013_v13 = vpop.f32.mrb[115].mxu0  ;;  %v6056_v17 = vpop.f32.mrb[115].mxu1  ;;  %6431 = vmatmul.mubr.bf16.vlgmr.msra.gmra.mrb[124].mxu0 %v6099_v34  ;;  %6472 = vmatmul.mubr.bf16.vlgmr.msra.gmra.mrb[124].mxu1 %v6101_v5  ;;  %v6071_v9 = vmax.f32 %v6008_v59, 0.0  ;;  %v6073_v4 = vmax.f32 %v6051_v7, 0.0 }
0x1b07   : > { %v6014_v61 = vadd.f32 %v6013_v13, %v5539_v2  ;;  %v6057_v3 = vadd.f32 %v6056_v17, %v5547_v19  ;;  %6481 = vmatpush1.bf16.xpose.msra.mxu0 %v6199_v28  ;;  %6522 = vmatpush1.bf16.xpose.msra.mxu1 %v6215_v49  ;;  %v6072_v11 = vmax.f32 %v6010_v30, 0.0  ;;  %v6074_v10 = vmax.f32 %v6053_v37, 0.0 }
0x1b08   : > { %v6087_v12 = vmax.f32 %v6012_v1, 0.0  ;;  %v6089_v39 = vmax.f32 %v6055_v6, 0.0 }
0x1b09   : > { %v6088_v45 = vmax.f32 %v6014_v61, 0.0  ;;  %v6090_v38 = vmax.f32 %v6057_v3, 0.0 }
0x1b0a   : > { %v6103_v55 = vpack.c.bf16 %v6087_v12, %v6071_v9  ;;  %v6105_v56 = vpack.c.bf16 %v6089_v39, %v6073_v4 }
0x1b0b   : > { %v6104_v62 = vpack.c.bf16 %v6088_v45, %v6072_v11  ;;  %v6106_v50 = vpack.c.bf16 %v6090_v38, %v6074_v10 }
0x1b0d   : > { %6512 = vmatprep.mubr.bf16.mxu0 %v6104_v62  ;;  %6553 = vmatprep.mubr.bf16.mxu1 %v6106_v50  ;;  %v6575_v62 = vld [vmem:[%s8233_s13] sm:$0x1] }
0x1b0e   : > { %6513 = vmatmul.mubr.bf16.vlgmr.msra.gmra.mrb[128].mxu0 %v6103_v55  ;;  %6554 = vmatmul.mubr.bf16.vlgmr.msra.gmra.mrb[128].mxu1 %v6105_v56 }
0x1bc9   : > { %v6268_v40 = vpop.f32.mrb[116].mxu0  ;;  %v6309_v32 = vpop.f32.mrb[116].mxu1 }
0x1bca   : > { %v6269_v8 = vadd.f32 %v6802_v26, %v6268_v40  ;;  %v6270_v36 = vpop.f32.mrb[117].mxu0  ;;  %v6311_v51 = vpop.f32.mrb[117].mxu1 }
0x1bcb   : > { %v6271_v57 = vpop.f32.mrb[118].mxu0  ;;  %v6312_v35 = vpop.f32.mrb[118].mxu1 }
0x1bcc   : > { %v6310_v18 = vadd.f32 %v6309_v32, %v6269_v8  ;;  %v6272_v58 = vadd.f32 %v6802_v26, %v6271_v57  ;;  %v6273_v54 = vpop.f32.mrb[119].mxu0  ;;  %v6314_v63 = vpop.f32.mrb[119].mxu1  ;;  %v6581_v26 = vld [vmem:[#allocation2] sm:$0x1] }
0x1bce   : > { %v6313_v2 = vadd.f32 %v6312_v35, %v6272_v58 }
0x1bd1   : > { %v6350_v16 = vpop.f32.mrb[120].mxu0  ;;  %v6391_v41 = vpop.f32.mrb[120].mxu1 }
0x1bd2   : > { %v6351_v14 = vadd.f32 %v6350_v16, %v6310_v18  ;;  %v6352_v0 = vpop.f32.mrb[121].mxu0  ;;  %v6393_v19 = vpop.f32.mrb[121].mxu1 }
0x1bd3   : > { %v6353_v33 = vpop.f32.mrb[122].mxu0  ;;  %v6394_v25 = vpop.f32.mrb[122].mxu1 }
0x1bd4   : > { %v6392_v28 = vadd.f32 %v6391_v41, %v6351_v14  ;;  %v6354_v52 = vadd.f32 %v6353_v33, %v6313_v2  ;;  %v6355_v43 = vpop.f32.mrb[123].mxu0  ;;  %v6396_v20 = vpop.f32.mrb[123].mxu1 }
0x1bd6   : > { %v6395_v27 = vadd.f32 %v6394_v25, %v6354_v52 }
0x1bd9   : > { %v6432_v46 = vpop.f32.mrb[124].mxu0  ;;  %v6473_v21 = vpop.f32.mrb[124].mxu1 }
0x1bda   : > { %v6433_v60 = vadd.f32 %v6432_v46, %v6392_v28  ;;  %v6434_v23 = vpop.f32.mrb[125].mxu0  ;;  %v6475_v34 = vpop.f32.mrb[125].mxu1 }
0x1bdb   : > { %v6435_v5 = vpop.f32.mrb[126].mxu0  ;;  %v6476_v22 = vpop.f32.mrb[126].mxu1 }
0x1bdc   : > { %v6474_v31 = vadd.f32 %v6473_v21, %v6433_v60  ;;  %v6436_v29 = vadd.f32 %v6435_v5, %v6395_v27  ;;  %v6437_v24 = vpop.f32.mrb[127].mxu0  ;;  %v6478_v49 = vpop.f32.mrb[127].mxu1 }
0x1bde   : > { %v6477_v59 = vadd.f32 %v6476_v22, %v6436_v29 }
0x1be1   : > { %v6514_v7 = vpop.f32.mrb[128].mxu0  ;;  %v6555_v48 = vpop.f32.mrb[128].mxu1 }
0x1be2   : > { %v6515_v44 = vadd.f32 %v6514_v7, %v6474_v31  ;;  %v6516_v30 = vpop.f32.mrb[129].mxu0  ;;  %v6557_v37 = vpop.f32.mrb[129].mxu1 }
0x1be3   : > { %v6517_v42 = vpop.f32.mrb[130].mxu0  ;;  %v6558_v15 = vpop.f32.mrb[130].mxu1 }
0x1be4   : > { %v6556_v1 = vadd.f32 %v6555_v48, %v6515_v44  ;;  %v6518_v6 = vadd.f32 %v6517_v42, %v6477_v59  ;;  %v6519_v13 = vpop.f32.mrb[131].mxu0  ;;  %v6560_v17 = vpop.f32.mrb[131].mxu1 }
0x1be6   : > { %v6562_v61 = vadd.f32 %v6556_v1, %v8082_v47  ;;  %v6559_v3 = vadd.f32 %v6558_v15, %v6518_v6 }
0x1be8   : > { %v6563_v9 = vadd.f32 %v6559_v3, %v8087_v53  ;;  %v6564_v4 = vsel %vm633_vm5, %v6562_v61, 0.0 }
0x1bea   : > { %v6565_v12 = vsel %vm633_vm5, %v6563_v9, 0.0 }
0x1beb   : > { %v6566_v39 = vadd.f32 %v6565_v12, %v6564_v4 }
0x1bed   : > { %v6567_v11 = vrot.slane %v6566_v39, 4 }
0x1bef   : > { %v6568_v10 = vadd.f32 %v6567_v11, %v6566_v39 }
0x1bf1   : > { %v6569_v45 = vrot.slane %v6568_v10, 2 }
0x1bf3   : > { %v6570_v38 = vadd.f32 %v6569_v45, %v6568_v10 }
0x1bf5   : > { %v6571_v55 = vrot.slane %v6570_v38, 1 }
0x1bf7   : > { %v6572_v56 = vadd.f32 %v6571_v55, %v6570_v38 }
0x1bf9   : > { %v6574_v47 = vmul.f32 0.0625, %v6572_v56 }
0x1bfb   : > { %v6576_v50 = vmul.f32 %v6575_v62, %v6574_v47 }
0x1bfd   : > { %v6578_v53 = vsel %vm6577_vm7, %v6576_v50, 0.0 }
0x1bfe   : > { %6579 = vadd.xlane.f32.xlu1 %v6578_v53 }
0x1c8b   : > { %v6580_v40 = vpop.xlane.xlu1 %6579 }
0x1c8c   : > { %v6582_v32 = vadd.f32 %v6581_v26, %v6580_v40 }
0x1c8e   : > { %6584 = vst.msk [vmem:[%s519_s22] sm:$0x1] %vm6583_vm8, %v6582_v32 }
0x1c8f PF: > { %s8247_s24 = sld [smem:[#allocation9_spill]] }
0x1c95   : > { %s29_s20 = sadd.s32 1, %s8247_s24  }
0x1c96   : > { %p26_p5 = scmp.ge.s32.totalorder %s29_s20, 4  }
0x1c98   :  { %28 = sbr.rel (!%p26_p5) target bundleno = 5 (0x5), region = 155 }
0x1c9f   :  { %6602 = vsyncpa [#allocation4], 1 }
0x1ca0   :  { %6604 = vsyncpa [#allocation4 + $0x1], 1 }
0x1ca1   :  { %6605 = vsyncpa [#allocation6], 1 }

</bundles_post_ra>
